<compile_context>
chip_gen: v5e
topology: v5e:2x2
jax: 0.10.0
libtpu: 0.0.40
codegen_flags: <defaults>
</compile_context>

<pallas_src>
import functools

import jax
import jax.numpy as jnp
from jax.experimental import pallas as pl
from jax.experimental.pallas import tpu as pltpu

EPS = 1e-5          # nn.InstanceNorm2d default eps
LEAKY_SLOPE = 0.01  # nn.LeakyReLU default negative_slope
LANE = 128


def _round_up(v, m):
    return (v + m - 1) // m * m


# ---------------------------------------------------------------------------
# VMEM budgeting (generation aware: v5e/v6e 128 MiB, v7x 64 MiB per core)
# ---------------------------------------------------------------------------
@functools.lru_cache(maxsize=None)
def _vmem_capacity_bytes():
    try:
        return int(pltpu.get_tpu_info().vmem_capacity_bytes)
    except Exception:
        return 64 * 1024 * 1024            # conservative fallback (v7x-sized)


def _vmem_limit_bytes():
    return min(_vmem_capacity_bytes() * 3 // 4, 100 * 1024 * 1024)


def _tile_budget_bytes():
    # Leave headroom inside the scoped limit for compiler temporaries.
    return _vmem_limit_bytes() // 2


def _conv_tile_bytes(th, W, Cp):
    halo = 2 * (th + 2) * W * Cp * 2       # double-buffered bf16 halo tiles
    outb = 2 * th * W * Cp * 2             # double-buffered bf16 output blocks
    acc = th * W * Cp * 4                  # f32 accumulator
    stage = 3 * (th + 2) * W * Cp * 2      # dj-shifted bf16 operand slabs
    wgt = 2 * 9 * Cp * Cp * 2              # weights (default double-buffered)
    return halo + outb + acc + stage + wgt


def _pick_th(H, W, Cp):
    """Largest H-tile dividing H whose conv working set fits the VMEM budget."""
    budget = _tile_budget_bytes()
    for th in sorted((d for d in range(1, H + 1) if H % d == 0), reverse=True):
        if _conv_tile_bytes(th, W, Cp) <= budget:
            return th
    return 1


def _inorm_tile_bytes(hw, ct, has_residual, out_bytes):
    b = 2 * hw * ct * 2                    # bf16 input blocks, double-buffered
    if has_residual:
        b += 2 * hw * ct * 2
    b += 2 * hw * ct * out_bytes           # output blocks, double-buffered
    b += 4 * hw * ct * 4                   # f32 working values
    return b


def _pick_ct(hw, Cp, has_residual, out_bytes):
    budget = _tile_budget_bytes()
    cands = [c for c in range(LANE, Cp + 1, LANE) if Cp % c == 0]
    for ct in sorted(cands, reverse=True):
        if _inorm_tile_bytes(hw, ct, has_residual, out_bytes) <= budget:
            return ct
    # TODO(synk): for very large H*W even ct=128 can exceed v7x VMEM; a
    # two-pass (stats then apply) hw-tiled InstanceNorm would be needed then.
    return LANE


# ---------------------------------------------------------------------------
# Conv 3x3 (stride 1, pad 1) + bias, direct (im2col-free) Pallas kernel
# ---------------------------------------------------------------------------
def _halo_copies(x_hbm, xbuf, sems, nn, hh, slot, th):
    """DMA descriptors for H-tile `hh` of image `nn` into buffer slot `slot`.

    Buffer rows: 0 = halo row above, 1..th = body, th+1 = halo row below.
    Destinations are offset only along the leading (slab) dim, so every DMA
    stays (8,128)-tile aligned.
    """
    r0 = hh * th
    body = pltpu.make_async_copy(x_hbm.at[nn, pl.ds(r0, th)],
                                 xbuf.at[slot, pl.ds(1, th)],
                                 sems.at[slot, 0])
    top = pltpu.make_async_copy(x_hbm.at[nn, pl.ds(r0 - 1, 1)],
                                xbuf.at[slot, pl.ds(0, 1)],
                                sems.at[slot, 1])
    bot = pltpu.make_async_copy(x_hbm.at[nn, pl.ds(r0 + th, 1)],
                                xbuf.at[slot, pl.ds(th + 1, 1)],
                                sems.at[slot, 2])
    return body, top, bot


def _start_fetch(x_hbm, xbuf, sems, nn, hh, slot, *, th, num_h):
    body, top, bot = _halo_copies(x_hbm, xbuf, sems, nn, hh, slot, th)
    body.start()

    @pl.when(hh > 0)                       # top halo row exists in the image
    def _():
        top.start()

    @pl.when(hh < num_h - 1)               # bottom halo row exists
    def _():
        bot.start()


def _wait_fetch(x_hbm, xbuf, sems, nn, hh, slot, *, th, num_h):
    body, top, bot = _halo_copies(x_hbm, xbuf, sems, nn, hh, slot, th)
    body.wait()

    @pl.when(hh > 0)
    def _():
        top.wait()

    @pl.when(hh < num_h - 1)
    def _():
        bot.wait()


def _conv3x3_bias_kernel(x_hbm, w_ref, b_ref, o_ref, xbuf, sems, *, th, W, Cp):
    """Direct 3x3 conv, stride 1, zero pad 1 (halo handled in-kernel).

    grid = (N, H // th); batch axis "parallel", H-tile axis "arbitrary".
      x_hbm : (N, H, W, Cp)     bf16 in HBM (memory_space=pl.ANY)
      w_ref : (3, 3, Cp, Cp)    bf16 VMEM (tap-major, from OIHW)
      b_ref : (1, Cp)           f32  VMEM
      o_ref : (th*W, Cp)        bf16 VMEM block of the (N*H*W, Cp) output
      xbuf  : (2, th+2, W, Cp)  bf16 VMEM double-buffered halo tiles
      sems  : (2, 3)            DMA sems (body / top halo / bottom halo)
    """
    n = pl.program_id(0)
    h = pl.program_id(1)
    num_h = pl.num_programs(1)
    slot = h % 2

    # First tile of this image: fetch it ourselves (the prefetch chain does
    # not cross the megacore-parallel batch axis).
    @pl.when(h == 0)
    def _():
        _start_fetch(x_hbm, xbuf, sems, n, h, slot, th=th, num_h=num_h)

    _wait_fetch(x_hbm, xbuf, sems, n, h, slot, th=th, num_h=num_h)

    # Prefetch the next H-tile into the other slot: its HBM->VMEM latency is
    # hidden behind this tile's 9 MXU dots (safe because the h axis is
    # "arbitrary", i.e. sequential per core).
    @pl.when(h + 1 < num_h)
    def _():
        _start_fetch(x_hbm, xbuf, sems, n, h + 1, 1 - slot, th=th, num_h=num_h)

    x_all = xbuf[slot]                                     # (th+2, W, Cp) bf16
    # Virtual zero row-padding: mask halo rows that fall outside the image
    # (no XLA jnp.pad pass needed; un-DMA'd halo rows may contain garbage).
    rows = jax.lax.broadcasted_iota(jnp.int32, (th + 2, 1, 1), 0)
    pad = ((h == 0) & (rows == 0)) | ((h == num_h - 1) & (rows == th + 1))
    x_all = jnp.where(pad, jnp.zeros_like(x_all), x_all)

    # Stage the three column-shifted operand slabs once per tile (3 sublane
    # shifts instead of 9 per-tap unaligned slices); the zero column realizes
    # the left/right spatial padding.
    zcol = jnp.zeros((th + 2, 1, Cp), x_all.dtype)
    win_cols = (
        jnp.concatenate([zcol, x_all[:, :W - 1, :]], axis=1),   # kx = 0
        x_all,                                                  # kx = 1
        jnp.concatenate([x_all[:, 1:, :], zcol], axis=1),       # kx = 2
    )

    # TODO(synk): on v6e/v7x (256-wide MXU) with small C, merge the 9 taps
    # into the K dim (weights reshaped to (9*Cp, Cp) + im2col operand) for
    # better MXU fill; kept as 9 K=Cp dots, the natural shape for v5e's MXU.
    acc = jnp.zeros((th * W, Cp), jnp.float32)
    for di in range(3):
        for dj in range(3):
            win = win_cols[dj][di:di + th].reshape(th * W, Cp)
            acc += jnp.dot(win, w_ref[di, dj],
                           preferred_element_type=jnp.float32)
    # Fused bias + bf16 downcast epilogue: halves conv writeback and the
    # following InstanceNorm read.
    o_ref[...] = (acc + b_ref[...]).astype(o_ref.dtype)


def conv3x3_bias(x_nhwc, w, b, *, th):
    """x_nhwc: (N, H, W, Cp) bf16 -> (N*H*W, Cp) bf16 (3x3 conv, stride 1,
    pad 1, + bias).  No spatially padded copy of the input is materialized."""
    N, H, W, Cp = x_nhwc.shape
    assert H % th == 0 and W % 8 == 0 and Cp % LANE == 0
    num_h = H // th
    kern = functools.partial(_conv3x3_bias_kernel, th=th, W=W, Cp=Cp)
    return pl.pallas_call(
        kern,
        out_shape=jax.ShapeDtypeStruct((N * H * W, Cp), jnp.bfloat16),
        grid_spec=pltpu.PrefetchScalarGridSpec(
            num_scalar_prefetch=0,
            grid=(N, num_h),
            in_specs=[
                pl.BlockSpec(memory_space=pl.ANY),          # x stays in HBM
                # Constant index_map -> fetched only once.  NOTE: default
                # double buffering reserves a 2nd weight copy; accounted for
                # in the VMEM budget (pl.Buffered(1) could reclaim it).
                pl.BlockSpec((3, 3, Cp, Cp), lambda n, h: (0, 0, 0, 0)),
                pl.BlockSpec((1, Cp), lambda n, h: (0, 0)),
            ],
            out_specs=pl.BlockSpec((th * W, Cp),
                                   lambda n, h: (n * num_h + h, 0)),
            scratch_shapes=[
                pltpu.VMEM((2, th + 2, W, Cp), x_nhwc.dtype),
                pltpu.SemaphoreType.DMA((2, 3)),
            ],
        ),
        # TODO(synk): for N == 1 on v7x, add an extra parallel H-split grid
        # axis so both TensorCores get work.
        compiler_params=pltpu.CompilerParams(
            dimension_semantics=("parallel", "arbitrary"),
            vmem_limit_bytes=_vmem_limit_bytes()),
    )(x_nhwc, w, b)


# ---------------------------------------------------------------------------
# InstanceNorm (+ optional fused residual add) + LeakyReLU
# ---------------------------------------------------------------------------
def _normalize(x, leaky):
    # Biased variance over the spatial axis (InstanceNorm2d, affine=False).
    mean = jnp.mean(x, axis=1, keepdims=True)
    xc = x - mean
    var = jnp.mean(xc * xc, axis=1, keepdims=True)
    y = xc * jax.lax.rsqrt(var + EPS)
    if leaky:
        y = jnp.where(y > 0, y, LEAKY_SLOPE * y)
    return y


def _inorm_kernel(x_ref, o_ref, *, leaky):
    x = x_ref[...].astype(jnp.float32)                     # (1, hw, ct)
    o_ref[...] = _normalize(x, leaky).astype(o_ref.dtype)


def _inorm_add_kernel(x_ref, r_ref, o_ref, *, leaky):
    # Residual add in f32 before the stats (matches PyTorch op order).
    x = x_ref[...].astype(jnp.float32) + r_ref[...].astype(jnp.float32)
    o_ref[...] = _normalize(x, leaky).astype(o_ref.dtype)


def instance_norm(y_flat, N, H, W, Cp, *, leaky, residual=None,
                  out_dtype=jnp.float32):
    """Per-(n, c) InstanceNorm over H*W (NHWC), optional fused residual add
    and LeakyReLU.  y_flat: (N*H*W, Cp).  Tiled over channels so large Cp
    still fits v7x's 64 MiB VMEM (single pass over H*W per channel tile)."""
    hw = H * W
    ct = _pick_ct(hw, Cp, residual is not None, jnp.dtype(out_dtype).itemsize)
    y3 = y_flat.reshape(N, hw, Cp)
    spec = pl.BlockSpec((1, hw, ct), lambda n, c: (n, 0, c))
    if residual is None:
        kern = functools.partial(_inorm_kernel, leaky=leaky)
        in_specs, args = [spec], [y3]
    else:
        kern = functools.partial(_inorm_add_kernel, leaky=leaky)
        in_specs, args = [spec, spec], [y3, residual.reshape(N, hw, Cp)]
    return pl.pallas_call(
        kern,
        out_shape=jax.ShapeDtypeStruct((N, hw, Cp), out_dtype),
        grid_spec=pltpu.PrefetchScalarGridSpec(
            num_scalar_prefetch=0, grid=(N, Cp // ct),
            in_specs=in_specs, out_specs=spec),
        compiler_params=pltpu.CompilerParams(
            dimension_semantics=("parallel", "parallel"),
            vmem_limit_bytes=_vmem_limit_bytes()),
    )(*args)


# ---------------------------------------------------------------------------
# ResidualBlock forward
# ---------------------------------------------------------------------------
def prep_conv_params(w, b, Cp):
    """PyTorch Conv2d weight (Cout, Cin, 3, 3) / bias (Cout,) -> zero-padded,
    tap-major bf16 weight (3, 3, Cp, Cp) and f32 bias (1, Cp)."""
    Cout, Cin = w.shape[0], w.shape[1]
    wt = jnp.transpose(w, (2, 3, 1, 0))                    # (3,3,Cin,Cout)
    wt = jnp.pad(wt, ((0, 0), (0, 0), (0, Cp - Cin), (0, Cp - Cout)))
    bp = jnp.pad(b, (0, Cp - Cout)).reshape(1, Cp)
    return wt.astype(jnp.bfloat16), bp.astype(jnp.float32)


def residual_block_forward(x, w1, b1, w2, b2, *, th=None):
    """PyTorch ResidualBlock.forward: LeakyReLU(IN(conv2(LReLU(IN(conv1(x)))) + x)).
    x: (N, C, H, W) f32 (NCHW, matching nn.Conv2d)."""
    N, C, H, W = x.shape
    Cp = _round_up(C, LANE)
    if th is None:
        th = _pick_th(H, W, Cp)

    # NCHW -> lane-dense NHWC once, channel-pad to a lane multiple, bf16.
    xh = jnp.transpose(x, (0, 2, 3, 1))
    xh = jnp.pad(xh, ((0, 0), (0, 0), (0, 0), (0, Cp - C))).astype(jnp.bfloat16)

    w1p, b1p = prep_conv_params(w1, b1, Cp)
    w2p, b2p = prep_conv_params(w2, b2, Cp)

    y = conv3x3_bias(xh, w1p, b1p, th=th)                  # (N*H*W, Cp) bf16
    y = instance_norm(y, N, H, W, Cp, leaky=True,
                      out_dtype=jnp.bfloat16)              # IN + LeakyReLU
    y = conv3x3_bias(y.reshape(N, H, W, Cp), w2p, b2p, th=th)
    # TODO(synk): residual is fed in bf16 (matches MXU operand precision and
    # halves its read); pass an f32 copy here if higher skip-add fidelity is
    # required.
    y = instance_norm(y, N, H, W, Cp, leaky=True, residual=xh,
                      out_dtype=jnp.float32)   # LeakyReLU(IN(conv(x) + x))

    y = y.reshape(N, H, W, Cp)[..., :C]
    return jnp.transpose(y, (0, 3, 1, 2))


# ---------------------------------------------------------------------------
# Pure-JAX reference (same math, f32, XLA conv) for a loose numeric check.
# ---------------------------------------------------------------------------
def reference_forward(x, w1, b1, w2, b2):
    def conv(v, w, b):
        y = jax.lax.conv_general_dilated(
            v, w, window_strides=(1, 1), padding=((1, 1), (1, 1)),
            dimension_numbers=("NCHW", "OIHW", "NCHW"))
        return y + b[None, :, None, None]

    def inorm(v):
        m = jnp.mean(v, axis=(2, 3), keepdims=True)
        s = jnp.mean((v - m) ** 2, axis=(2, 3), keepdims=True)
        return (v - m) * jax.lax.rsqrt(s + EPS)

    def leaky(v):
        return jnp.where(v > 0, v, LEAKY_SLOPE * v)

    y = conv(x, w1, b1)
    y = leaky(inorm(y))
    y = conv(y, w2, b2)
    return leaky(inorm(y + x))


# ---------------------------------------------------------------------------
if __name__ == "__main__":
    key = jax.random.PRNGKey(0)
    N, C, H, W = 2, 16, 16, 16          # ResidualBlock(n=16) on 2x16x16x16
    kx, kw1, kb1, kw2, kb2 = jax.random.split(key, 5)
    fan_in = C * 3 * 3
    w1 = jax.random.normal(kw1, (C, C, 3, 3), jnp.float32) / jnp.sqrt(fan_in)
    b1 = 0.05 * jax.random.normal(kb1, (C,), jnp.float32)
    w2 = jax.random.normal(kw2, (C, C, 3, 3), jnp.float32) / jnp.sqrt(fan_in)
    b2 = 0.05 * jax.random.normal(kb2, (C,), jnp.float32)
    x = jax.random.normal(kx, (N, C, H, W), jnp.float32)

    fwd = jax.jit(residual_block_forward, static_argnames=("th",))
    y_ref = reference_forward(x, w1, b1, w2, b2)

    # Default (budget-aware) tiling: th == H here -> single H-tile per image.
    y = jax.block_until_ready(fwd(x, w1, b1, w2, b2))
    assert y.shape == (N, C, H, W), y.shape
    assert bool(jnp.all(jnp.isfinite(y)))
    max_err = float(jnp.max(jnp.abs(y - y_ref)))
    assert max_err < 0.1, max_err

    # Forced multi-tile run (th=4 -> 4 H-tiles) exercising the double-buffered
    # halo-DMA prefetch and the top/interior/bottom halo paths.
    y2 = jax.block_until_ready(fwd(x, w1, b1, w2, b2, th=4))
    max_err2 = float(jnp.max(jnp.abs(y2 - y_ref)))
    assert max_err2 < 0.1, max_err2

    print("KERNEL_OK")
</pallas_src>

<mosaic_0001>
module attributes {stable_mosaic.version = 11 : i64} {
  func.func @_inorm_add_kernel(%arg0: i32, %arg1: i32, %arg2: memref<1x256x128xbf16, #tpu.memory_space<vmem>>, %arg3: memref<1x256x128xbf16, #tpu.memory_space<vmem>>, %arg4: memref<1x256x128xf32, #tpu.memory_space<vmem>>) attributes {dimension_semantics = [#tpu.dimension_semantics<parallel>, #tpu.dimension_semantics<parallel>], iteration_bounds = array<i64: 2, 1>, scalar_prefetch = 0 : i64, scratch_operands = 0 : i64, tpu.core_type = #tpu.core_type<tc>, window_params = [{transform_indices = @transform_0, window_bounds = array<i64: 1, 256, 128>}, {transform_indices = @transform_1, window_bounds = array<i64: 1, 256, 128>}, {transform_indices = @transform_2, window_bounds = array<i64: 1, 256, 128>}]} {
    %c0 = arith.constant 0 : index
    %c0_0 = arith.constant 0 : index
    %c0_1 = arith.constant 0 : index
    %0 = vector.load %arg2[%c0, %c0_0, %c0_1] : memref<1x256x128xbf16, #tpu.memory_space<vmem>>, vector<1x256x128xbf16>
    %1 = arith.extf %0 : vector<1x256x128xbf16> to vector<1x256x128xf32>
    %c0_2 = arith.constant 0 : index
    %c0_3 = arith.constant 0 : index
    %c0_4 = arith.constant 0 : index
    %2 = vector.load %arg3[%c0_2, %c0_3, %c0_4] : memref<1x256x128xbf16, #tpu.memory_space<vmem>>, vector<1x256x128xbf16>
    %3 = arith.extf %2 : vector<1x256x128xbf16> to vector<1x256x128xf32>
    %4 = arith.addf %1, %3 : vector<1x256x128xf32>
    %cst = arith.constant dense<0.000000e+00> : vector<1x128xf32>
    %5 = vector.multi_reduction <add>, %4, %cst [1] : vector<1x256x128xf32> to vector<1x128xf32>
    %6 = vector.shape_cast %5 : vector<1x128xf32> to vector<1x1x128xf32>
    %cst_5 = arith.constant 2.560000e+02 : f32
    %7 = vector.broadcast %cst_5 : f32 to vector<1x1x128xf32>
    %8 = arith.divf %6, %7 : vector<1x1x128xf32>
    %9 = vector.broadcast %8 : vector<1x1x128xf32> to vector<1x256x128xf32>
    %10 = arith.subf %4, %9 : vector<1x256x128xf32>
    %11 = arith.mulf %10, %10 : vector<1x256x128xf32>
    %cst_6 = arith.constant dense<0.000000e+00> : vector<1x128xf32>
    %12 = vector.multi_reduction <add>, %11, %cst_6 [1] : vector<1x256x128xf32> to vector<1x128xf32>
    %13 = vector.shape_cast %12 : vector<1x128xf32> to vector<1x1x128xf32>
    %cst_7 = arith.constant 2.560000e+02 : f32
    %14 = vector.broadcast %cst_7 : f32 to vector<1x1x128xf32>
    %15 = arith.divf %13, %14 : vector<1x1x128xf32>
    %cst_8 = arith.constant 9.99999974E-6 : f32
    %16 = vector.broadcast %cst_8 : f32 to vector<1x1x128xf32>
    %17 = arith.addf %15, %16 : vector<1x1x128xf32>
    %18 = math.rsqrt %17 : vector<1x1x128xf32>
    %19 = vector.broadcast %18 : vector<1x1x128xf32> to vector<1x256x128xf32>
    %20 = arith.mulf %10, %19 : vector<1x256x128xf32>
    %cst_9 = arith.constant 0.000000e+00 : f32
    %21 = vector.broadcast %cst_9 : f32 to vector<1x256x128xf32>
    %22 = arith.cmpf ogt, %20, %21 : vector<1x256x128xf32>
    %cst_10 = arith.constant 0.00999999977 : f32
    %23 = vector.broadcast %cst_10 : f32 to vector<1x256x128xf32>
    %24 = arith.mulf %23, %20 : vector<1x256x128xf32>
    %25 = arith.select %22, %20, %24 : vector<1x256x128xi1>, vector<1x256x128xf32>
    %c0_11 = arith.constant 0 : index
    %c0_12 = arith.constant 0 : index
    %c0_13 = arith.constant 0 : index
    %26 = vector.load %arg4[%c0_11, %c0_12, %c0_13] : memref<1x256x128xf32, #tpu.memory_space<vmem>>, vector<1x256x128xf32>
    tpu.vector_store %arg4[%c0_11, %c0_12, %c0_13], %25 {strides = array<i32>} : memref<1x256x128xf32, #tpu.memory_space<vmem>>, vector<1x256x128xf32>,
    return
  }
  func.func @transform_0(%arg0: i32, %arg1: i32) -> (i32, i32, i32) {
    %c0_i32 = arith.constant 0 : i32
    %c0_i32_0 = arith.constant 0 : i32
    return %arg0, %c0_i32, %arg1 : i32, i32, i32
  }
  func.func @transform_1(%arg0: i32, %arg1: i32) -> (i32, i32, i32) {
    %c0_i32 = arith.constant 0 : i32
    %c0_i32_0 = arith.constant 0 : i32
    return %arg0, %c0_i32, %arg1 : i32, i32, i32
  }
  func.func @transform_2(%arg0: i32, %arg1: i32) -> (i32, i32, i32) {
    %c0_i32 = arith.constant 0 : i32
    %c0_i32_0 = arith.constant 0 : i32
    return %arg0, %c0_i32, %arg1 : i32, i32, i32
  }
}

module attributes {stable_mosaic.version = 11 : i64} {
  func.func @_inorm_kernel(%arg0: i32, %arg1: i32, %arg2: memref<1x256x128xbf16, #tpu.memory_space<vmem>>, %arg3: memref<1x256x128xbf16, #tpu.memory_space<vmem>>) attributes {dimension_semantics = [#tpu.dimension_semantics<parallel>, #tpu.dimension_semantics<parallel>], iteration_bounds = array<i64: 2, 1>, scalar_prefetch = 0 : i64, scratch_operands = 0 : i64, tpu.core_type = #tpu.core_type<tc>, window_params = [{transform_indices = @transform_0, window_bounds = array<i64: 1, 256, 128>}, {transform_indices = @transform_1, window_bounds = array<i64: 1, 256, 128>}]} {
    %c0 = arith.constant 0 : index
    %c0_0 = arith.constant 0 : index
    %c0_1 = arith.constant 0 : index
    %0 = vector.load %arg2[%c0, %c0_0, %c0_1] : memref<1x256x128xbf16, #tpu.memory_space<vmem>>, vector<1x256x128xbf16>
    %1 = arith.extf %0 : vector<1x256x128xbf16> to vector<1x256x128xf32>
    %cst = arith.constant dense<0.000000e+00> : vector<1x128xf32>
    %2 = vector.multi_reduction <add>, %1, %cst [1] : vector<1x256x128xf32> to vector<1x128xf32>
    %3 = vector.shape_cast %2 : vector<1x128xf32> to vector<1x1x128xf32>
    %cst_2 = arith.constant 2.560000e+02 : f32
    %4 = vector.broadcast %cst_2 : f32 to vector<1x1x128xf32>
    %5 = arith.divf %3, %4 : vector<1x1x128xf32>
    %6 = vector.broadcast %5 : vector<1x1x128xf32> to vector<1x256x128xf32>
    %7 = arith.subf %1, %6 : vector<1x256x128xf32>
    %8 = arith.mulf %7, %7 : vector<1x256x128xf32>
    %cst_3 = arith.constant dense<0.000000e+00> : vector<1x128xf32>
    %9 = vector.multi_reduction <add>, %8, %cst_3 [1] : vector<1x256x128xf32> to vector<1x128xf32>
    %10 = vector.shape_cast %9 : vector<1x128xf32> to vector<1x1x128xf32>
    %cst_4 = arith.constant 2.560000e+02 : f32
    %11 = vector.broadcast %cst_4 : f32 to vector<1x1x128xf32>
    %12 = arith.divf %10, %11 : vector<1x1x128xf32>
    %cst_5 = arith.constant 9.99999974E-6 : f32
    %13 = vector.broadcast %cst_5 : f32 to vector<1x1x128xf32>
    %14 = arith.addf %12, %13 : vector<1x1x128xf32>
    %15 = math.rsqrt %14 : vector<1x1x128xf32>
    %16 = vector.broadcast %15 : vector<1x1x128xf32> to vector<1x256x128xf32>
    %17 = arith.mulf %7, %16 : vector<1x256x128xf32>
    %cst_6 = arith.constant 0.000000e+00 : f32
    %18 = vector.broadcast %cst_6 : f32 to vector<1x256x128xf32>
    %19 = arith.cmpf ogt, %17, %18 : vector<1x256x128xf32>
    %cst_7 = arith.constant 0.00999999977 : f32
    %20 = vector.broadcast %cst_7 : f32 to vector<1x256x128xf32>
    %21 = arith.mulf %20, %17 : vector<1x256x128xf32>
    %22 = arith.select %19, %17, %21 : vector<1x256x128xi1>, vector<1x256x128xf32>
    %23 = arith.truncf %22 : vector<1x256x128xf32> to vector<1x256x128xbf16>
    %c0_8 = arith.constant 0 : index
    %c0_9 = arith.constant 0 : index
    %c0_10 = arith.constant 0 : index
    %24 = vector.load %arg3[%c0_8, %c0_9, %c0_10] : memref<1x256x128xbf16, #tpu.memory_space<vmem>>, vector<1x256x128xbf16>
    tpu.vector_store %arg3[%c0_8, %c0_9, %c0_10], %23 {strides = array<i32>} : memref<1x256x128xbf16, #tpu.memory_space<vmem>>, vector<1x256x128xbf16>,
    return
  }
  func.func @transform_0(%arg0: i32, %arg1: i32) -> (i32, i32, i32) {
    %c0_i32 = arith.constant 0 : i32
    %c0_i32_0 = arith.constant 0 : i32
    return %arg0, %c0_i32, %arg1 : i32, i32, i32
  }
  func.func @transform_1(%arg0: i32, %arg1: i32) -> (i32, i32, i32) {
    %c0_i32 = arith.constant 0 : i32
    %c0_i32_0 = arith.constant 0 : i32
    return %arg0, %c0_i32, %arg1 : i32, i32, i32
  }
}

module attributes {stable_mosaic.version = 11 : i64} {
  func.func @_conv3x3_bias_kernel(%arg0: i32, %arg1: i32, %arg2: memref<2x16x16x128xbf16, #tpu.memory_space<any>>, %arg3: memref<3x3x128x128xbf16, #tpu.memory_space<vmem>>, %arg4: memref<1x128xf32, #tpu.memory_space<vmem>>, %arg5: memref<256x128xbf16, #tpu.memory_space<vmem>>, %arg6: memref<2x18x16x128xbf16, #tpu.memory_space<vmem>>, %arg7: memref<2x3x!tpu.dma_semaphore, #tpu.memory_space<semaphore_mem>>) attributes {dimension_semantics = [#tpu.dimension_semantics<parallel>, #tpu.dimension_semantics<arbitrary>], iteration_bounds = array<i64: 2, 1>, scalar_prefetch = 0 : i64, scratch_operands = 2 : i64, tpu.core_type = #tpu.core_type<tc>, window_params = [{}, {pipeline_mode = #tpu.pipeline_mode<synchronous>, transform_indices = @transform_1, window_bounds = array<i64: 3, 3, 128, 128>}, {pipeline_mode = #tpu.pipeline_mode<synchronous>, transform_indices = @transform_2, window_bounds = array<i64: 1, 128>}, {transform_indices = @transform_3, window_bounds = array<i64: 256, 128>}]} {
    %c2_i32 = arith.constant 2 : i32
    %c0_i32 = arith.constant 0 : i32
    %0 = arith.cmpi eq, %c2_i32, %c0_i32 : i32
    %c1_i32 = arith.constant 1 : i32
    %1 = arith.select %0, %c1_i32, %c2_i32 : i32
    %2 = arith.remsi %arg1, %1 : i32
    %c0_i32_0 = arith.constant 0 : i32
    %3 = arith.cmpi ne, %2, %c0_i32_0 : i32
    %c0_i32_1 = arith.constant 0 : i32
    %4 = arith.cmpi slt, %2, %c0_i32_1 : i32
    %c0_i32_2 = arith.constant 0 : i32
    %5 = arith.cmpi slt, %1, %c0_i32_2 : i32
    %6 = arith.xori %4, %5 : i1
    %7 = arith.andi %6, %3 : i1
    %8 = arith.addi %2, %1 : i32
    %9 = arith.select %7, %8, %2 : i32
    %c0_i32_3 = arith.constant 0 : i32
    %10 = arith.cmpi eq, %arg1, %c0_i32_3 : i32
    %11 = arith.extui %10 : i1 to i32
    %c0_i32_4 = arith.constant 0 : i32
    %12 = arith.cmpi ne, %11, %c0_i32_4 : i32
    scf.if %12 {
      %c16_i32_76 = arith.constant 16 : i32
      %116 = arith.muli %arg1, %c16_i32_76 : i32
      %c1_i32_77 = arith.constant 1 : i32
      %117 = arith.subi %116, %c1_i32_77 : i32
      %c16_i32_78 = arith.constant 16 : i32
      %118 = arith.addi %116, %c16_i32_78 : i32
      %c0_i32_79 = arith.constant 0 : i32
      %c0_i32_80 = arith.constant 0 : i32
      %c0_i32_81 = arith.constant 0 : i32
      %119 = tpu.memref_slice %arg2[%arg0, %116, %c0_i32_80, %c0_i32_81] : memref<2x16x16x128xbf16, #tpu.memory_space<any>> -> memref<1x16x16x128xbf16, #tpu.memory_space<any>>
      %120 = tpu.memref_squeeze %119 : memref<1x16x16x128xbf16, #tpu.memory_space<any>> -> memref<16x16x128xbf16, #tpu.memory_space<any>>
      %c1_i32_82 = arith.constant 1 : i32
      %c0_i32_83 = arith.constant 0 : i32
      %c0_i32_84 = arith.constant 0 : i32
      %121 = tpu.memref_slice %arg6[%9, %c1_i32_82, %c0_i32_83, %c0_i32_84] : memref<2x18x16x128xbf16, #tpu.memory_space<vmem>> -> memref<1x16x16x128xbf16, #tpu.memory_space<vmem>>
      %122 = tpu.memref_squeeze %121 : memref<1x16x16x128xbf16, #tpu.memory_space<vmem>> -> memref<16x16x128xbf16, #tpu.memory_space<vmem>>
      %123 = tpu.memref_slice %arg7[%9, %c0_i32_79] : memref<2x3x!tpu.dma_semaphore, #tpu.memory_space<semaphore_mem>> -> memref<1x1x!tpu.dma_semaphore, #tpu.memory_space<semaphore_mem>>
      %124 = tpu.memref_squeeze %123 : memref<1x1x!tpu.dma_semaphore, #tpu.memory_space<semaphore_mem>> -> memref<!tpu.dma_semaphore, #tpu.memory_space<semaphore_mem>>
      tpu.enqueue_dma source(%120 : memref<16x16x128xbf16, #tpu.memory_space<any>>) target(%122 : memref<16x16x128xbf16, #tpu.memory_space<vmem>>) target_semaphore(%124 : memref<!tpu.dma_semaphore, #tpu.memory_space<semaphore_mem>>)
      %c0_i32_85 = arith.constant 0 : i32
      %125 = arith.cmpi sgt, %arg1, %c0_i32_85 : i32
      %126 = arith.extui %125 : i1 to i32
      %c1_i32_86 = arith.constant 1 : i32
      %c0_i32_87 = arith.constant 0 : i32
      %127 = arith.cmpi ne, %126, %c0_i32_87 : i32
      scf.if %127 {
        %c0_i32_91 = arith.constant 0 : i32
        %c0_i32_92 = arith.constant 0 : i32
        %131 = tpu.memref_slice %arg2[%arg0, %117, %c0_i32_91, %c0_i32_92] : memref<2x16x16x128xbf16, #tpu.memory_space<any>> -> memref<1x1x16x128xbf16, #tpu.memory_space<any>>
        %132 = tpu.memref_squeeze %131 : memref<1x1x16x128xbf16, #tpu.memory_space<any>> -> memref<1x16x128xbf16, #tpu.memory_space<any>>
        %c0_i32_93 = arith.constant 0 : i32
        %c0_i32_94 = arith.constant 0 : i32
        %c0_i32_95 = arith.constant 0 : i32
        %133 = tpu.memref_slice %arg6[%9, %c0_i32_93, %c0_i32_94, %c0_i32_95] : memref<2x18x16x128xbf16, #tpu.memory_space<vmem>> -> memref<1x1x16x128xbf16, #tpu.memory_space<vmem>>
        %134 = tpu.memref_squeeze %133 : memref<1x1x16x128xbf16, #tpu.memory_space<vmem>> -> memref<1x16x128xbf16, #tpu.memory_space<vmem>>
        %135 = tpu.memref_slice %arg7[%9, %c1_i32_86] : memref<2x3x!tpu.dma_semaphore, #tpu.memory_space<semaphore_mem>> -> memref<1x1x!tpu.dma_semaphore, #tpu.memory_space<semaphore_mem>>
        %136 = tpu.memref_squeeze %135 : memref<1x1x!tpu.dma_semaphore, #tpu.memory_space<semaphore_mem>> -> memref<!tpu.dma_semaphore, #tpu.memory_space<semaphore_mem>>
        tpu.enqueue_dma source(%132 : memref<1x16x128xbf16, #tpu.memory_space<any>>) target(%134 : memref<1x16x128xbf16, #tpu.memory_space<vmem>>) target_semaphore(%136 : memref<!tpu.dma_semaphore, #tpu.memory_space<semaphore_mem>>)
      } else {
      }
      %c0_i32_88 = arith.constant 0 : i32
      %128 = arith.cmpi slt, %arg1, %c0_i32_88 : i32
      %129 = arith.extui %128 : i1 to i32
      %c2_i32_89 = arith.constant 2 : i32
      %c0_i32_90 = arith.constant 0 : i32
      %130 = arith.cmpi ne, %129, %c0_i32_90 : i32
      scf.if %130 {
        %c0_i32_91 = arith.constant 0 : i32
        %c0_i32_92 = arith.constant 0 : i32
        %131 = tpu.memref_slice %arg2[%arg0, %118, %c0_i32_91, %c0_i32_92] : memref<2x16x16x128xbf16, #tpu.memory_space<any>> -> memref<1x1x16x128xbf16, #tpu.memory_space<any>>
        %132 = tpu.memref_squeeze %131 : memref<1x1x16x128xbf16, #tpu.memory_space<any>> -> memref<1x16x128xbf16, #tpu.memory_space<any>>
        %c17_i32_93 = arith.constant 17 : i32
        %c0_i32_94 = arith.constant 0 : i32
        %c0_i32_95 = arith.constant 0 : i32
        %133 = tpu.memref_slice %arg6[%9, %c17_i32_93, %c0_i32_94, %c0_i32_95] : memref<2x18x16x128xbf16, #tpu.memory_space<vmem>> -> memref<1x1x16x128xbf16, #tpu.memory_space<vmem>>
        %134 = tpu.memref_squeeze %133 : memref<1x1x16x128xbf16, #tpu.memory_space<vmem>> -> memref<1x16x128xbf16, #tpu.memory_space<vmem>>
        %135 = tpu.memref_slice %arg7[%9, %c2_i32_89] : memref<2x3x!tpu.dma_semaphore, #tpu.memory_space<semaphore_mem>> -> memref<1x1x!tpu.dma_semaphore, #tpu.memory_space<semaphore_mem>>
        %136 = tpu.memref_squeeze %135 : memref<1x1x!tpu.dma_semaphore, #tpu.memory_space<semaphore_mem>> -> memref<!tpu.dma_semaphore, #tpu.memory_space<semaphore_mem>>
        tpu.enqueue_dma source(%132 : memref<1x16x128xbf16, #tpu.memory_space<any>>) target(%134 : memref<1x16x128xbf16, #tpu.memory_space<vmem>>) target_semaphore(%136 : memref<!tpu.dma_semaphore, #tpu.memory_space<semaphore_mem>>)
      } else {
      }
    } else {
    }
    %c16_i32 = arith.constant 16 : i32
    %13 = arith.muli %arg1, %c16_i32 : i32
    %c1_i32_5 = arith.constant 1 : i32
    %14 = arith.subi %13, %c1_i32_5 : i32
    %c16_i32_6 = arith.constant 16 : i32
    %15 = arith.addi %13, %c16_i32_6 : i32
    %c0_i32_7 = arith.constant 0 : i32
    %c0_i32_8 = arith.constant 0 : i32
    %c0_i32_9 = arith.constant 0 : i32
    %16 = tpu.memref_slice %arg2[%arg0, %13, %c0_i32_8, %c0_i32_9] : memref<2x16x16x128xbf16, #tpu.memory_space<any>> -> memref<1x16x16x128xbf16, #tpu.memory_space<any>>
    %17 = tpu.memref_squeeze %16 : memref<1x16x16x128xbf16, #tpu.memory_space<any>> -> memref<16x16x128xbf16, #tpu.memory_space<any>>
    %c1_i32_10 = arith.constant 1 : i32
    %c0_i32_11 = arith.constant 0 : i32
    %c0_i32_12 = arith.constant 0 : i32
    %18 = tpu.memref_slice %arg6[%9, %c1_i32_10, %c0_i32_11, %c0_i32_12] : memref<2x18x16x128xbf16, #tpu.memory_space<vmem>> -> memref<1x16x16x128xbf16, #tpu.memory_space<vmem>>
    %19 = tpu.memref_squeeze %18 : memref<1x16x16x128xbf16, #tpu.memory_space<vmem>> -> memref<16x16x128xbf16, #tpu.memory_space<vmem>>
    %20 = tpu.memref_slice %arg7[%9, %c0_i32_7] : memref<2x3x!tpu.dma_semaphore, #tpu.memory_space<semaphore_mem>> -> memref<1x1x!tpu.dma_semaphore, #tpu.memory_space<semaphore_mem>>
    %21 = tpu.memref_squeeze %20 : memref<1x1x!tpu.dma_semaphore, #tpu.memory_space<semaphore_mem>> -> memref<!tpu.dma_semaphore, #tpu.memory_space<semaphore_mem>>
    tpu.wait_dma2 semaphore(%21 : memref<!tpu.dma_semaphore, #tpu.memory_space<semaphore_mem>>) src(%17 : memref<16x16x128xbf16, #tpu.memory_space<any>>) dst(%19 : memref<16x16x128xbf16, #tpu.memory_space<vmem>>)
    %c0_i32_13 = arith.constant 0 : i32
    %22 = arith.cmpi sgt, %arg1, %c0_i32_13 : i32
    %23 = arith.extui %22 : i1 to i32
    %c1_i32_14 = arith.constant 1 : i32
    %c0_i32_15 = arith.constant 0 : i32
    %24 = arith.cmpi ne, %23, %c0_i32_15 : i32
    scf.if %24 {
      %c0_i32_76 = arith.constant 0 : i32
      %c0_i32_77 = arith.constant 0 : i32
      %116 = tpu.memref_slice %arg2[%arg0, %14, %c0_i32_76, %c0_i32_77] : memref<2x16x16x128xbf16, #tpu.memory_space<any>> -> memref<1x1x16x128xbf16, #tpu.memory_space<any>>
      %117 = tpu.memref_squeeze %116 : memref<1x1x16x128xbf16, #tpu.memory_space<any>> -> memref<1x16x128xbf16, #tpu.memory_space<any>>
      %c0_i32_78 = arith.constant 0 : i32
      %c0_i32_79 = arith.constant 0 : i32
      %c0_i32_80 = arith.constant 0 : i32
      %118 = tpu.memref_slice %arg6[%9, %c0_i32_78, %c0_i32_79, %c0_i32_80] : memref<2x18x16x128xbf16, #tpu.memory_space<vmem>> -> memref<1x1x16x128xbf16, #tpu.memory_space<vmem>>
      %119 = tpu.memref_squeeze %118 : memref<1x1x16x128xbf16, #tpu.memory_space<vmem>> -> memref<1x16x128xbf16, #tpu.memory_space<vmem>>
      %120 = tpu.memref_slice %arg7[%9, %c1_i32_14] : memref<2x3x!tpu.dma_semaphore, #tpu.memory_space<semaphore_mem>> -> memref<1x1x!tpu.dma_semaphore, #tpu.memory_space<semaphore_mem>>
      %121 = tpu.memref_squeeze %120 : memref<1x1x!tpu.dma_semaphore, #tpu.memory_space<semaphore_mem>> -> memref<!tpu.dma_semaphore, #tpu.memory_space<semaphore_mem>>
      tpu.wait_dma2 semaphore(%121 : memref<!tpu.dma_semaphore, #tpu.memory_space<semaphore_mem>>) src(%117 : memref<1x16x128xbf16, #tpu.memory_space<any>>) dst(%119 : memref<1x16x128xbf16, #tpu.memory_space<vmem>>)
    } else {
    }
    %c0_i32_16 = arith.constant 0 : i32
    %25 = arith.cmpi slt, %arg1, %c0_i32_16 : i32
    %26 = arith.extui %25 : i1 to i32
    %c2_i32_17 = arith.constant 2 : i32
    %c0_i32_18 = arith.constant 0 : i32
    %27 = arith.cmpi ne, %26, %c0_i32_18 : i32
    scf.if %27 {
      %c0_i32_76 = arith.constant 0 : i32
      %c0_i32_77 = arith.constant 0 : i32
      %116 = tpu.memref_slice %arg2[%arg0, %15, %c0_i32_76, %c0_i32_77] : memref<2x16x16x128xbf16, #tpu.memory_space<any>> -> memref<1x1x16x128xbf16, #tpu.memory_space<any>>
      %117 = tpu.memref_squeeze %116 : memref<1x1x16x128xbf16, #tpu.memory_space<any>> -> memref<1x16x128xbf16, #tpu.memory_space<any>>
      %c17_i32_78 = arith.constant 17 : i32
      %c0_i32_79 = arith.constant 0 : i32
      %c0_i32_80 = arith.constant 0 : i32
      %118 = tpu.memref_slice %arg6[%9, %c17_i32_78, %c0_i32_79, %c0_i32_80] : memref<2x18x16x128xbf16, #tpu.memory_space<vmem>> -> memref<1x1x16x128xbf16, #tpu.memory_space<vmem>>
      %119 = tpu.memref_squeeze %118 : memref<1x1x16x128xbf16, #tpu.memory_space<vmem>> -> memref<1x16x128xbf16, #tpu.memory_space<vmem>>
      %120 = tpu.memref_slice %arg7[%9, %c2_i32_17] : memref<2x3x!tpu.dma_semaphore, #tpu.memory_space<semaphore_mem>> -> memref<1x1x!tpu.dma_semaphore, #tpu.memory_space<semaphore_mem>>
      %121 = tpu.memref_squeeze %120 : memref<1x1x!tpu.dma_semaphore, #tpu.memory_space<semaphore_mem>> -> memref<!tpu.dma_semaphore, #tpu.memory_space<semaphore_mem>>
      tpu.wait_dma2 semaphore(%121 : memref<!tpu.dma_semaphore, #tpu.memory_space<semaphore_mem>>) src(%117 : memref<1x16x128xbf16, #tpu.memory_space<any>>) dst(%119 : memref<1x16x128xbf16, #tpu.memory_space<vmem>>)
    } else {
    }
    %c1_i32_19 = arith.constant 1 : i32
    %28 = arith.addi %arg1, %c1_i32_19 : i32
    %c1_i32_20 = arith.constant 1 : i32
    %29 = arith.cmpi slt, %28, %c1_i32_20 : i32
    %30 = arith.extui %29 : i1 to i32
    %c0_i32_21 = arith.constant 0 : i32
    %31 = arith.cmpi ne, %30, %c0_i32_21 : i32
    scf.if %31 {
      %c1_i32_76 = arith.constant 1 : i32
      %116 = arith.addi %arg1, %c1_i32_76 : i32
      %c1_i32_77 = arith.constant 1 : i32
      %117 = arith.subi %c1_i32_77, %9 : i32
      %c16_i32_78 = arith.constant 16 : i32
      %118 = arith.muli %116, %c16_i32_78 : i32
      %c1_i32_79 = arith.constant 1 : i32
      %119 = arith.subi %118, %c1_i32_79 : i32
      %c16_i32_80 = arith.constant 16 : i32
      %120 = arith.addi %118, %c16_i32_80 : i32
      %c0_i32_81 = arith.constant 0 : i32
      %c0_i32_82 = arith.constant 0 : i32
      %c0_i32_83 = arith.constant 0 : i32
      %121 = tpu.memref_slice %arg2[%arg0, %118, %c0_i32_82, %c0_i32_83] : memref<2x16x16x128xbf16, #tpu.memory_space<any>> -> memref<1x16x16x128xbf16, #tpu.memory_space<any>>
      %122 = tpu.memref_squeeze %121 : memref<1x16x16x128xbf16, #tpu.memory_space<any>> -> memref<16x16x128xbf16, #tpu.memory_space<any>>
      %c1_i32_84 = arith.constant 1 : i32
      %c0_i32_85 = arith.constant 0 : i32
      %c0_i32_86 = arith.constant 0 : i32
      %123 = tpu.memref_slice %arg6[%117, %c1_i32_84, %c0_i32_85, %c0_i32_86] : memref<2x18x16x128xbf16, #tpu.memory_space<vmem>> -> memref<1x16x16x128xbf16, #tpu.memory_space<vmem>>
      %124 = tpu.memref_squeeze %123 : memref<1x16x16x128xbf16, #tpu.memory_space<vmem>> -> memref<16x16x128xbf16, #tpu.memory_space<vmem>>
      %125 = tpu.memref_slice %arg7[%117, %c0_i32_81] : memref<2x3x!tpu.dma_semaphore, #tpu.memory_space<semaphore_mem>> -> memref<1x1x!tpu.dma_semaphore, #tpu.memory_space<semaphore_mem>>
      %126 = tpu.memref_squeeze %125 : memref<1x1x!tpu.dma_semaphore, #tpu.memory_space<semaphore_mem>> -> memref<!tpu.dma_semaphore, #tpu.memory_space<semaphore_mem>>
      tpu.enqueue_dma source(%122 : memref<16x16x128xbf16, #tpu.memory_space<any>>) target(%124 : memref<16x16x128xbf16, #tpu.memory_space<vmem>>) target_semaphore(%126 : memref<!tpu.dma_semaphore, #tpu.memory_space<semaphore_mem>>)
      %c0_i32_87 = arith.constant 0 : i32
      %127 = arith.cmpi sgt, %116, %c0_i32_87 : i32
      %128 = arith.extui %127 : i1 to i32
      %c1_i32_88 = arith.constant 1 : i32
      %c0_i32_89 = arith.constant 0 : i32
      %129 = arith.cmpi ne, %128, %c0_i32_89 : i32
      scf.if %129 {
        %c0_i32_93 = arith.constant 0 : i32
        %c0_i32_94 = arith.constant 0 : i32
        %133 = tpu.memref_slice %arg2[%arg0, %119, %c0_i32_93, %c0_i32_94] : memref<2x16x16x128xbf16, #tpu.memory_space<any>> -> memref<1x1x16x128xbf16, #tpu.memory_space<any>>
        %134 = tpu.memref_squeeze %133 : memref<1x1x16x128xbf16, #tpu.memory_space<any>> -> memref<1x16x128xbf16, #tpu.memory_space<any>>
        %c0_i32_95 = arith.constant 0 : i32
        %c0_i32_96 = arith.constant 0 : i32
        %c0_i32_97 = arith.constant 0 : i32
        %135 = tpu.memref_slice %arg6[%117, %c0_i32_95, %c0_i32_96, %c0_i32_97] : memref<2x18x16x128xbf16, #tpu.memory_space<vmem>> -> memref<1x1x16x128xbf16, #tpu.memory_space<vmem>>
        %136 = tpu.memref_squeeze %135 : memref<1x1x16x128xbf16, #tpu.memory_space<vmem>> -> memref<1x16x128xbf16, #tpu.memory_space<vmem>>
        %137 = tpu.memref_slice %arg7[%117, %c1_i32_88] : memref<2x3x!tpu.dma_semaphore, #tpu.memory_space<semaphore_mem>> -> memref<1x1x!tpu.dma_semaphore, #tpu.memory_space<semaphore_mem>>
        %138 = tpu.memref_squeeze %137 : memref<1x1x!tpu.dma_semaphore, #tpu.memory_space<semaphore_mem>> -> memref<!tpu.dma_semaphore, #tpu.memory_space<semaphore_mem>>
        tpu.enqueue_dma source(%134 : memref<1x16x128xbf16, #tpu.memory_space<any>>) target(%136 : memref<1x16x128xbf16, #tpu.memory_space<vmem>>) target_semaphore(%138 : memref<!tpu.dma_semaphore, #tpu.memory_space<semaphore_mem>>)
      } else {
      }
      %c0_i32_90 = arith.constant 0 : i32
      %130 = arith.cmpi slt, %116, %c0_i32_90 : i32
      %131 = arith.extui %130 : i1 to i32
      %c2_i32_91 = arith.constant 2 : i32
      %c0_i32_92 = arith.constant 0 : i32
      %132 = arith.cmpi ne, %131, %c0_i32_92 : i32
      scf.if %132 {
        %c0_i32_93 = arith.constant 0 : i32
        %c0_i32_94 = arith.constant 0 : i32
        %133 = tpu.memref_slice %arg2[%arg0, %120, %c0_i32_93, %c0_i32_94] : memref<2x16x16x128xbf16, #tpu.memory_space<any>> -> memref<1x1x16x128xbf16, #tpu.memory_space<any>>
        %134 = tpu.memref_squeeze %133 : memref<1x1x16x128xbf16, #tpu.memory_space<any>> -> memref<1x16x128xbf16, #tpu.memory_space<any>>
        %c17_i32_95 = arith.constant 17 : i32
        %c0_i32_96 = arith.constant 0 : i32
        %c0_i32_97 = arith.constant 0 : i32
        %135 = tpu.memref_slice %arg6[%117, %c17_i32_95, %c0_i32_96, %c0_i32_97] : memref<2x18x16x128xbf16, #tpu.memory_space<vmem>> -> memref<1x1x16x128xbf16, #tpu.memory_space<vmem>>
        %136 = tpu.memref_squeeze %135 : memref<1x1x16x128xbf16, #tpu.memory_space<vmem>> -> memref<1x16x128xbf16, #tpu.memory_space<vmem>>
        %137 = tpu.memref_slice %arg7[%117, %c2_i32_91] : memref<2x3x!tpu.dma_semaphore, #tpu.memory_space<semaphore_mem>> -> memref<1x1x!tpu.dma_semaphore, #tpu.memory_space<semaphore_mem>>
        %138 = tpu.memref_squeeze %137 : memref<1x1x!tpu.dma_semaphore, #tpu.memory_space<semaphore_mem>> -> memref<!tpu.dma_semaphore, #tpu.memory_space<semaphore_mem>>
        tpu.enqueue_dma source(%134 : memref<1x16x128xbf16, #tpu.memory_space<any>>) target(%136 : memref<1x16x128xbf16, #tpu.memory_space<vmem>>) target_semaphore(%138 : memref<!tpu.dma_semaphore, #tpu.memory_space<semaphore_mem>>)
      } else {
      }
    } else {
    }
    %32 = arith.index_cast %9 : i32 to index
    %c0 = arith.constant 0 : index
    %c0_22 = arith.constant 0 : index
    %c0_23 = arith.constant 0 : index
    %33 = vector.load %arg6[%32, %c0, %c0_22, %c0_23] : memref<2x18x16x128xbf16, #tpu.memory_space<vmem>>, vector<1x18x16x128xbf16>
    %34 = vector.shape_cast %33 : vector<1x18x16x128xbf16> to vector<18x16x128xbf16>
    %35 = tpu.iota {dimensions = array<i32: 0>} : vector<18x1x1xi32>
    %c0_i32_24 = arith.constant 0 : i32
    %36 = arith.cmpi eq, %arg1, %c0_i32_24 : i32
    %c0_i32_25 = arith.constant 0 : i32
    %37 = vector.broadcast %c0_i32_25 : i32 to vector<18x1x1xi32>
    %38 = arith.cmpi eq, %35, %37 : vector<18x1x1xi32>
    %39 = vector.broadcast %36 : i1 to vector<18x1x1xi1>
    %40 = arith.andi %39, %38 : vector<18x1x1xi1>
    %c0_i32_26 = arith.constant 0 : i32
    %41 = arith.cmpi eq, %arg1, %c0_i32_26 : i32
    %c17_i32 = arith.constant 17 : i32
    %42 = vector.broadcast %c17_i32 : i32 to vector<18x1x1xi32>
    %43 = arith.cmpi eq, %35, %42 : vector<18x1x1xi32>
    %44 = vector.broadcast %41 : i1 to vector<18x1x1xi1>
    %45 = arith.andi %44, %43 : vector<18x1x1xi1>
    %46 = arith.ori %40, %45 : vector<18x1x1xi1>
    %cst = arith.constant 0.000000e+00 : bf16
    %47 = vector.broadcast %cst : bf16 to vector<18x16x128xbf16>
    %48 = vector.shape_cast %46 : vector<18x1x1xi1> to vector<18x1x1xi1>
    %49 = vector.broadcast %48 : vector<18x1x1xi1> to vector<18x16x128xi1>
    %50 = arith.select %49, %47, %34 : vector<18x16x128xi1>, vector<18x16x128xbf16>
    %cst_27 = arith.constant 0.000000e+00 : bf16
    %51 = vector.broadcast %cst_27 : bf16 to vector<18x1x128xbf16>
    %52 = vector.extract_strided_slice %50 {offsets = [0, 0, 0], sizes = [18, 15, 128], strides = [1, 1, 1]} : vector<18x16x128xbf16> to vector<18x15x128xbf16>
    %53 = tpu.concatenate %51, %52 in 1 : vector<18x1x128xbf16>, vector<18x15x128xbf16> -> vector<18x16x128xbf16>
    %54 = vector.extract_strided_slice %50 {offsets = [0, 1, 0], sizes = [18, 15, 128], strides = [1, 1, 1]} : vector<18x16x128xbf16> to vector<18x15x128xbf16>
    %55 = tpu.concatenate %54, %51 in 1 : vector<18x15x128xbf16>, vector<18x1x128xbf16> -> vector<18x16x128xbf16>
    %cst_28 = arith.constant 0.000000e+00 : f32
    %56 = vector.broadcast %cst_28 : f32 to vector<256x128xf32>
    %57 = vector.extract_strided_slice %53 {offsets = [0, 0, 0], sizes = [16, 16, 128], strides = [1, 1, 1]} : vector<18x16x128xbf16> to vector<16x16x128xbf16>
    %58 = vector.shape_cast %57 : vector<16x16x128xbf16> to vector<256x128xbf16>
    %c0_29 = arith.constant 0 : index
    %c0_30 = arith.constant 0 : index
    %c0_31 = arith.constant 0 : index
    %c0_32 = arith.constant 0 : index
    %59 = vector.load %arg3[%c0_29, %c0_30, %c0_31, %c0_32] : memref<3x3x128x128xbf16, #tpu.memory_space<vmem>>, vector<1x1x128x128xbf16>
    %60 = vector.shape_cast %59 : vector<1x1x128x128xbf16> to vector<128x128xbf16>
    %cst_33 = arith.constant dense<0.000000e+00> : vector<256x128xf32>
    %61 = tpu.matmul %58, %60, %cst_33 {dimension_numbers = #tpu.dot_dimension_numbers<[1], [0], [0], [1], [0, 0, 1, 1], [], []>} : vector<256x128xbf16>, vector<128x128xbf16>, vector<256x128xf32> -> vector<256x128xf32>
    %62 = arith.addf %56, %61 : vector<256x128xf32>
    %63 = vector.extract_strided_slice %50 {offsets = [0, 0, 0], sizes = [16, 16, 128], strides = [1, 1, 1]} : vector<18x16x128xbf16> to vector<16x16x128xbf16>
    %64 = vector.shape_cast %63 : vector<16x16x128xbf16> to vector<256x128xbf16>
    %c0_34 = arith.constant 0 : index
    %c1 = arith.constant 1 : index
    %c0_35 = arith.constant 0 : index
    %c0_36 = arith.constant 0 : index
    %65 = vector.load %arg3[%c0_34, %c1, %c0_35, %c0_36] : memref<3x3x128x128xbf16, #tpu.memory_space<vmem>>, vector<1x1x128x128xbf16>
    %66 = vector.shape_cast %65 : vector<1x1x128x128xbf16> to vector<128x128xbf16>
    %cst_37 = arith.constant dense<0.000000e+00> : vector<256x128xf32>
    %67 = tpu.matmul %64, %66, %cst_37 {dimension_numbers = #tpu.dot_dimension_numbers<[1], [0], [0], [1], [0, 0, 1, 1], [], []>} : vector<256x128xbf16>, vector<128x128xbf16>, vector<256x128xf32> -> vector<256x128xf32>
    %68 = arith.addf %62, %67 : vector<256x128xf32>
    %69 = vector.extract_strided_slice %55 {offsets = [0, 0, 0], sizes = [16, 16, 128], strides = [1, 1, 1]} : vector<18x16x128xbf16> to vector<16x16x128xbf16>
    %70 = vector.shape_cast %69 : vector<16x16x128xbf16> to vector<256x128xbf16>
    %c0_38 = arith.constant 0 : index
    %c2 = arith.constant 2 : index
    %c0_39 = arith.constant 0 : index
    %c0_40 = arith.constant 0 : index
    %71 = vector.load %arg3[%c0_38, %c2, %c0_39, %c0_40] : memref<3x3x128x128xbf16, #tpu.memory_space<vmem>>, vector<1x1x128x128xbf16>
    %72 = vector.shape_cast %71 : vector<1x1x128x128xbf16> to vector<128x128xbf16>
    %cst_41 = arith.constant dense<0.000000e+00> : vector<256x128xf32>
    %73 = tpu.matmul %70, %72, %cst_41 {dimension_numbers = #tpu.dot_dimension_numbers<[1], [0], [0], [1], [0, 0, 1, 1], [], []>} : vector<256x128xbf16>, vector<128x128xbf16>, vector<256x128xf32> -> vector<256x128xf32>
    %74 = arith.addf %68, %73 : vector<256x128xf32>
    %75 = vector.extract_strided_slice %53 {offsets = [1, 0, 0], sizes = [16, 16, 128], strides = [1, 1, 1]} : vector<18x16x128xbf16> to vector<16x16x128xbf16>
    %76 = vector.shape_cast %75 : vector<16x16x128xbf16> to vector<256x128xbf16>
    %c1_42 = arith.constant 1 : index
    %c0_43 = arith.constant 0 : index
    %c0_44 = arith.constant 0 : index
    %c0_45 = arith.constant 0 : index
    %77 = vector.load %arg3[%c1_42, %c0_43, %c0_44, %c0_45] : memref<3x3x128x128xbf16, #tpu.memory_space<vmem>>, vector<1x1x128x128xbf16>
    %78 = vector.shape_cast %77 : vector<1x1x128x128xbf16> to vector<128x128xbf16>
    %cst_46 = arith.constant dense<0.000000e+00> : vector<256x128xf32>
    %79 = tpu.matmul %76, %78, %cst_46 {dimension_numbers = #tpu.dot_dimension_numbers<[1], [0], [0], [1], [0, 0, 1, 1], [], []>} : vector<256x128xbf16>, vector<128x128xbf16>, vector<256x128xf32> -> vector<256x128xf32>
    %80 = arith.addf %74, %79 : vector<256x128xf32>
    %81 = vector.extract_strided_slice %50 {offsets = [1, 0, 0], sizes = [16, 16, 128], strides = [1, 1, 1]} : vector<18x16x128xbf16> to vector<16x16x128xbf16>
    %82 = vector.shape_cast %81 : vector<16x16x128xbf16> to vector<256x128xbf16>
    %c1_47 = arith.constant 1 : index
    %c1_48 = arith.constant 1 : index
    %c0_49 = arith.constant 0 : index
    %c0_50 = arith.constant 0 : index
    %83 = vector.load %arg3[%c1_47, %c1_48, %c0_49, %c0_50] : memref<3x3x128x128xbf16, #tpu.memory_space<vmem>>, vector<1x1x128x128xbf16>
    %84 = vector.shape_cast %83 : vector<1x1x128x128xbf16> to vector<128x128xbf16>
    %cst_51 = arith.constant dense<0.000000e+00> : vector<256x128xf32>
    %85 = tpu.matmul %82, %84, %cst_51 {dimension_numbers = #tpu.dot_dimension_numbers<[1], [0], [0], [1], [0, 0, 1, 1], [], []>} : vector<256x128xbf16>, vector<128x128xbf16>, vector<256x128xf32> -> vector<256x128xf32>
    %86 = arith.addf %80, %85 : vector<256x128xf32>
    %87 = vector.extract_strided_slice %55 {offsets = [1, 0, 0], sizes = [16, 16, 128], strides = [1, 1, 1]} : vector<18x16x128xbf16> to vector<16x16x128xbf16>
    %88 = vector.shape_cast %87 : vector<16x16x128xbf16> to vector<256x128xbf16>
    %c1_52 = arith.constant 1 : index
    %c2_53 = arith.constant 2 : index
    %c0_54 = arith.constant 0 : index
    %c0_55 = arith.constant 0 : index
    %89 = vector.load %arg3[%c1_52, %c2_53, %c0_54, %c0_55] : memref<3x3x128x128xbf16, #tpu.memory_space<vmem>>, vector<1x1x128x128xbf16>
    %90 = vector.shape_cast %89 : vector<1x1x128x128xbf16> to vector<128x128xbf16>
    %cst_56 = arith.constant dense<0.000000e+00> : vector<256x128xf32>
    %91 = tpu.matmul %88, %90, %cst_56 {dimension_numbers = #tpu.dot_dimension_numbers<[1], [0], [0], [1], [0, 0, 1, 1], [], []>} : vector<256x128xbf16>, vector<128x128xbf16>, vector<256x128xf32> -> vector<256x128xf32>
    %92 = arith.addf %86, %91 : vector<256x128xf32>
    %93 = vector.extract_strided_slice %53 {offsets = [2, 0, 0], sizes = [16, 16, 128], strides = [1, 1, 1]} : vector<18x16x128xbf16> to vector<16x16x128xbf16>
    %94 = vector.shape_cast %93 : vector<16x16x128xbf16> to vector<256x128xbf16>
    %c2_57 = arith.constant 2 : index
    %c0_58 = arith.constant 0 : index
    %c0_59 = arith.constant 0 : index
    %c0_60 = arith.constant 0 : index
    %95 = vector.load %arg3[%c2_57, %c0_58, %c0_59, %c0_60] : memref<3x3x128x128xbf16, #tpu.memory_space<vmem>>, vector<1x1x128x128xbf16>
    %96 = vector.shape_cast %95 : vector<1x1x128x128xbf16> to vector<128x128xbf16>
    %cst_61 = arith.constant dense<0.000000e+00> : vector<256x128xf32>
    %97 = tpu.matmul %94, %96, %cst_61 {dimension_numbers = #tpu.dot_dimension_numbers<[1], [0], [0], [1], [0, 0, 1, 1], [], []>} : vector<256x128xbf16>, vector<128x128xbf16>, vector<256x128xf32> -> vector<256x128xf32>
    %98 = arith.addf %92, %97 : vector<256x128xf32>
    %99 = vector.extract_strided_slice %50 {offsets = [2, 0, 0], sizes = [16, 16, 128], strides = [1, 1, 1]} : vector<18x16x128xbf16> to vector<16x16x128xbf16>
    %100 = vector.shape_cast %99 : vector<16x16x128xbf16> to vector<256x128xbf16>
    %c2_62 = arith.constant 2 : index
    %c1_63 = arith.constant 1 : index
    %c0_64 = arith.constant 0 : index
    %c0_65 = arith.constant 0 : index
    %101 = vector.load %arg3[%c2_62, %c1_63, %c0_64, %c0_65] : memref<3x3x128x128xbf16, #tpu.memory_space<vmem>>, vector<1x1x128x128xbf16>
    %102 = vector.shape_cast %101 : vector<1x1x128x128xbf16> to vector<128x128xbf16>
    %cst_66 = arith.constant dense<0.000000e+00> : vector<256x128xf32>
    %103 = tpu.matmul %100, %102, %cst_66 {dimension_numbers = #tpu.dot_dimension_numbers<[1], [0], [0], [1], [0, 0, 1, 1], [], []>} : vector<256x128xbf16>, vector<128x128xbf16>, vector<256x128xf32> -> vector<256x128xf32>
    %104 = arith.addf %98, %103 : vector<256x128xf32>
    %105 = vector.extract_strided_slice %55 {offsets = [2, 0, 0], sizes = [16, 16, 128], strides = [1, 1, 1]} : vector<18x16x128xbf16> to vector<16x16x128xbf16>
    %106 = vector.shape_cast %105 : vector<16x16x128xbf16> to vector<256x128xbf16>
    %c2_67 = arith.constant 2 : index
    %c2_68 = arith.constant 2 : index
    %c0_69 = arith.constant 0 : index
    %c0_70 = arith.constant 0 : index
    %107 = vector.load %arg3[%c2_67, %c2_68, %c0_69, %c0_70] : memref<3x3x128x128xbf16, #tpu.memory_space<vmem>>, vector<1x1x128x128xbf16>
    %108 = vector.shape_cast %107 : vector<1x1x128x128xbf16> to vector<128x128xbf16>
    %cst_71 = arith.constant dense<0.000000e+00> : vector<256x128xf32>
    %109 = tpu.matmul %106, %108, %cst_71 {dimension_numbers = #tpu.dot_dimension_numbers<[1], [0], [0], [1], [0, 0, 1, 1], [], []>} : vector<256x128xbf16>, vector<128x128xbf16>, vector<256x128xf32> -> vector<256x128xf32>
    %110 = arith.addf %104, %109 : vector<256x128xf32>
    %c0_72 = arith.constant 0 : index
    %c0_73 = arith.constant 0 : index
    %111 = vector.load %arg4[%c0_72, %c0_73] : memref<1x128xf32, #tpu.memory_space<vmem>>, vector<1x128xf32>
    %112 = vector.broadcast %111 : vector<1x128xf32> to vector<256x128xf32>
    %113 = arith.addf %110, %112 : vector<256x128xf32>
    %114 = arith.truncf %113 : vector<256x128xf32> to vector<256x128xbf16>
    %c0_74 = arith.constant 0 : index
    %c0_75 = arith.constant 0 : index
    %115 = vector.load %arg5[%c0_74, %c0_75] : memref<256x128xbf16, #tpu.memory_space<vmem>>, vector<256x128xbf16>
    tpu.vector_store %arg5[%c0_74, %c0_75], %114 {strides = array<i32>} : memref<256x128xbf16, #tpu.memory_space<vmem>>, vector<256x128xbf16>,
    return
  }
  func.func @transform_1(%arg0: i32, %arg1: i32) -> (i32, i32, i32, i32) {
    %c0_i32 = arith.constant 0 : i32
    %c0_i32_0 = arith.constant 0 : i32
    %c0_i32_1 = arith.constant 0 : i32
    %c0_i32_2 = arith.constant 0 : i32
    %c0_i32_3 = arith.constant 0 : i32
    return %c0_i32, %c0_i32_0, %c0_i32_1, %c0_i32_2 : i32, i32, i32, i32
  }
  func.func @transform_2(%arg0: i32, %arg1: i32) -> (i32, i32) {
    %c0_i32 = arith.constant 0 : i32
    %c0_i32_0 = arith.constant 0 : i32
    %c0_i32_1 = arith.constant 0 : i32
    return %c0_i32, %c0_i32_0 : i32, i32
  }
  func.func @transform_3(%arg0: i32, %arg1: i32) -> (i32, i32) {
    %c1_i32 = arith.constant 1 : i32
    %0 = arith.muli %arg0, %c1_i32 : i32
    %1 = arith.addi %0, %arg1 : i32
    %c0_i32 = arith.constant 0 : i32
    %c0_i32_0 = arith.constant 0 : i32
    return %1, %c0_i32 : i32, i32
  }
}

</mosaic_0001>

<bundles_post_ra>
// kernel: residual_block_forward.5
= control target key start
LH: loop header
LB: loop body
LE: loop exit
PB: predicated region body
PF: predicated region fallthrough
CT: control target
= control target key end

     0   :  { %s896_s6 = smov 0   ;;  %s898_s7 = smov 0   ;;  %s1396_s0 = inlined_call_operand.vmem [shape: bf16[2,256,128], index: 0, kind: input, shape index: {}]   ;;  %s1397_s1 = inlined_call_operand.vmem [shape: bf16[2,256,128], index: 1, kind: output, shape index: {}]  }
   0x1   :  { %s900_s8 = smov 0  }
   0x2 LB: > { %s23_s9 = sadd.s32 1, %s879_s7  ;;  %p649_p0 = scmp.ge.s32.totalorder %s883_s8, 1  ;;  %s883_s8 = sphi %s900_s8, %s11_s8   ;;  %s879_s7 = sphi %s898_s7, %s1399_s7   ;;  %s875_s6 = sphi %s896_s6, %s1398_s6  }
   0x3   : > { %p25_p1 = scmp.ge.s32.totalorder %s23_s9, 2  ;;  %p106_p2 = scmp.lt.s32.totalorder %s883_s8, 3 }
   0x5   : > { %s1401_s9 = smov (%p25_p1, %s23_s9), 0  ;;  %p107_p3 = pnand %p649_p0, %p106_p2 }
   0x6   : > { %p132_p4 = scmp.lt.s32.totalorder (!%p107_p3), %s875_s6, 1 }
   0x7   : > { %110 = sbr.rel (%p107_p3) target bundleno = 235 (0xeb), region = 24 }
   0xc   : > { %s1403_s6 = smov (!%p132_p4, %s875_s6), 1 }
   0xd   : > { %s656_s10 = sshll.u32 %s1403_s6, 7 }
   0xe   : > { %s922_s13 = scalar_lea.vmem %s1396_s0, %s656_s10  ;;  %s1321_s16 = scalar_lea.vmem %s1397_s1, %s656_s10 }
   0xf   : > { %v925_v0 = vld [vmem:[%s922_s13] sm:$0xff]   ;;  %v928_v1 = vld [vmem:[%s922_s13 + $0x8] sm:$0xff]   ;;  %v934_v5 = vld [vmem:[%s922_s13 + $0x10] sm:$0xff]  }
  0x10   : > { %v660_v2 = vunpack.c.l.bf16 %v925_v0  ;;  %v661_v3 = vunpack.c.h.bf16 %v925_v0  ;;  %v664_v4 = vunpack.c.l.bf16 %v928_v1  ;;  %v665_v6 = vunpack.c.h.bf16 %v928_v1  ;;  %v945_v10 = vld [vmem:[%s922_s13 + $0x18] sm:$0xff]   ;;  %v954_v15 = vld [vmem:[%s922_s13 + $0x20] sm:$0xff]   ;;  %v963_v20 = vld [vmem:[%s922_s13 + $0x28] sm:$0xff]  }
  0x11   : > { %v668_v8 = vunpack.c.l.bf16 %v934_v5  ;;  %v669_v11 = vunpack.c.h.bf16 %v934_v5  ;;  %v672_v13 = vunpack.c.l.bf16 %v945_v10  ;;  %v673_v16 = vunpack.c.h.bf16 %v945_v10  ;;  %v972_v25 = vld [vmem:[%s922_s13 + $0x30] sm:$0xff]   ;;  %v981_v30 = vld [vmem:[%s922_s13 + $0x38] sm:$0xff]   ;;  %v990_v35 = vld [vmem:[%s922_s13 + $0x40] sm:$0xff]  }
  0x12   : > { %v212_v7 = vadd.f32 %v661_v3, %v660_v2  ;;  %v676_v18 = vunpack.c.l.bf16 %v954_v15  ;;  %v677_v21 = vunpack.c.h.bf16 %v954_v15  ;;  %v680_v23 = vunpack.c.l.bf16 %v963_v20  ;;  %v999_v40 = vld [vmem:[%s922_s13 + $0x48] sm:$0xff]   ;;  %v1008_v45 = vld [vmem:[%s922_s13 + $0x50] sm:$0xff]   ;;  %v1017_v50 = vld [vmem:[%s922_s13 + $0x58] sm:$0xff]  }
  0x13   : > { %v681_v26 = vunpack.c.h.bf16 %v963_v20  ;;  %v684_v28 = vunpack.c.l.bf16 %v972_v25  ;;  %v685_v31 = vunpack.c.h.bf16 %v972_v25  ;;  %v688_v33 = vunpack.c.l.bf16 %v981_v30  ;;  %v1026_v55 = vld [vmem:[%s922_s13 + $0x60] sm:$0xff]   ;;  %v1035_v60 = vld [vmem:[%s922_s13 + $0x68] sm:$0xff]  }
  0x14   : > { %v213_v9 = vadd.f32 %v664_v4, %v212_v7  ;;  %v689_v36 = vunpack.c.h.bf16 %v981_v30  ;;  %v692_v38 = vunpack.c.l.bf16 %v990_v35  ;;  %v693_v41 = vunpack.c.h.bf16 %v990_v35 }
  0x15   : > { %v696_v43 = vunpack.c.l.bf16 %v999_v40  ;;  %v697_v46 = vunpack.c.h.bf16 %v999_v40  ;;  %v700_v48 = vunpack.c.l.bf16 %v1008_v45  ;;  %v701_v51 = vunpack.c.h.bf16 %v1008_v45 }
  0x16   : > { %v214_v12 = vadd.f32 %v665_v6, %v213_v9  ;;  %v704_v53 = vunpack.c.l.bf16 %v1017_v50  ;;  %v705_v56 = vunpack.c.h.bf16 %v1017_v50  ;;  %v708_v58 = vunpack.c.l.bf16 %v1026_v55  ;;  %v1044_v9 = vld [vmem:[%s922_s13 + $0x70] sm:$0xff]  }
  0x17   : > { %v709_v61 = vunpack.c.h.bf16 %v1026_v55  ;;  %v712_v63 = vunpack.c.l.bf16 %v1035_v60 }
  0x18   : > { %v215_v14 = vadd.f32 %v668_v8, %v214_v12  ;;  %v713_v12 = vunpack.c.h.bf16 %v1035_v60 }
  0x1a   : > { %v216_v17 = vadd.f32 %v669_v11, %v215_v14 }
  0x1c   : > { %v217_v19 = vadd.f32 %v672_v13, %v216_v17  ;;  %v716_v17 = vunpack.c.l.bf16 %v1044_v9 }
  0x1e   : > { %v218_v22 = vadd.f32 %v673_v16, %v217_v19 }
  0x20   : > { %v219_v24 = vadd.f32 %v676_v18, %v218_v22  ;;  %v1053_v22 = vld [vmem:[%s922_s13 + $0x78] sm:$0xff]  }
  0x22   : > { %v220_v27 = vadd.f32 %v677_v21, %v219_v24  ;;  %v717_v24 = vunpack.c.h.bf16 %v1044_v9 }
  0x24   : > { %v221_v29 = vadd.f32 %v680_v23, %v220_v27 }
  0x26   : > { %v222_v32 = vadd.f32 %v681_v26, %v221_v29  ;;  %v885_v29 = vmov 256.0  }
  0x27   : > { %857 = vrcp.f32 %v885_v29 }
  0x28   : > { %v223_v34 = vadd.f32 %v684_v28, %v222_v32  ;;  %v720_v32 = vunpack.c.l.bf16 %v1053_v22 }
  0x2a   : > { %v224_v37 = vadd.f32 %v685_v31, %v223_v34 }
  0x2c   : > { %v225_v39 = vadd.f32 %v688_v33, %v224_v37  ;;  %v721_v37 = vunpack.c.h.bf16 %v1053_v22 }
  0x2e   : > { %v226_v42 = vadd.f32 %v689_v36, %v225_v39 }
  0x30   : > { %v227_v44 = vadd.f32 %v692_v38, %v226_v42  ;;  %v858_v42 = vpop.eup %857 }
  0x31   : > { %vm254_vm0 = vweird.f32 %v858_v42 }
  0x32   : > { %v228_v47 = vadd.f32 %v693_v41, %v227_v44 }
  0x34   : > { %v229_v49 = vadd.f32 %v696_v43, %v228_v47 }
  0x36   : > { %v230_v52 = vadd.f32 %v697_v46, %v229_v49  ;;  %v250_v49 = vmul.f32 256.0, %v858_v42 }
  0x38   : > { %v231_v54 = vadd.f32 %v700_v48, %v230_v52 }
  0x3a   : > { %v232_v57 = vadd.f32 %v701_v51, %v231_v54 }
  0x3c   : > { %v233_v59 = vadd.f32 %v704_v53, %v232_v57  ;;  %v251_v57 = vsub.f32 1.0, %v250_v49 }
  0x3e   : > { %v234_v62 = vadd.f32 %v705_v56, %v233_v59 }
  0x40   : > { %v235_v7 = vadd.f32 %v708_v58, %v234_v62 }
  0x42   : > { %v236_v14 = vadd.f32 %v709_v61, %v235_v7  ;;  %v252_v7 = vmul.f32 %v858_v42, %v251_v57 }
  0x44   : > { %v237_v19 = vadd.f32 %v712_v63, %v236_v14 }
  0x46   : > { %v238_v27 = vadd.f32 %v713_v12, %v237_v19  ;;  %v253_v19 = vadd.f32 %v858_v42, %v252_v7 }
  0x48   : > { %v239_v34 = vadd.f32 %v716_v17, %v238_v27  ;;  %v1068_v29 = vsel %vm254_vm0, %v858_v42, %v253_v19 }
  0x4a   : > { %v240_v39 = vadd.f32 %v717_v24, %v239_v34 }
  0x4c   : > { %v241_v44 = vadd.f32 %v720_v32, %v240_v39 }
  0x4e   : > { %v242_v47 = vadd.f32 %v721_v37, %v241_v44 }
  0x50   : > { %v243_v52 = vrot.slane %v242_v47, 4 }
  0x52   : > { %v244_v54 = vadd.f32 %v243_v52, %v242_v47 }
  0x54   : > { %v245_v59 = vrot.slane %v244_v54, 2 }
  0x56   : > { %v246_v62 = vadd.f32 %v245_v59, %v244_v54 }
  0x58   : > { %v247_v14 = vrot.slane %v246_v62, 1 }
  0x5a   : > { %v248_v27 = vadd.f32 %v247_v14, %v246_v62 }
  0x5c   : > { %v1071_v34 = vmul.f32 %v1068_v29, %v248_v27 }
  0x5e   : > { %v1076_v39 = vsub.f32 %v660_v2, %v1071_v34  ;;  %v1081_v44 = vsub.f32 %v661_v3, %v1071_v34  ;;  %v1086_v47 = vsub.f32 %v664_v4, %v1071_v34  ;;  %v1091_v42 = vsub.f32 %v665_v6, %v1071_v34 }
  0x5f   : > { %v1100_v0 = vsub.f32 %v668_v8, %v1071_v34  ;;  %v1107_v1 = vsub.f32 %v669_v11, %v1071_v34  ;;  %v1114_v52 = vsub.f32 %v672_v13, %v1071_v34  ;;  %v1121_v57 = vsub.f32 %v673_v16, %v1071_v34 }
  0x60   : > { %v289_v49 = vmul.f32 %v1076_v39, %v1076_v39  ;;  %v290_v2 = vmul.f32 %v1081_v44, %v1081_v44  ;;  %v291_v3 = vmul.f32 %v1086_v47, %v1086_v47  ;;  %v292_v4 = vmul.f32 %v1091_v42, %v1091_v42 }
  0x61   : > { %v293_v8 = vmul.f32 %v1100_v0, %v1100_v0  ;;  %v294_v5 = vmul.f32 %v1107_v1, %v1107_v1  ;;  %v1128_v59 = vsub.f32 %v676_v18, %v1071_v34  ;;  %v295_v13 = vmul.f32 %v1114_v52, %v1114_v52 }
  0x62   : > { %v321_v6 = vadd.f32 %v290_v2, %v289_v49  ;;  %v1135_v7 = vsub.f32 %v677_v21, %v1071_v34  ;;  %v296_v10 = vmul.f32 %v1121_v57, %v1121_v57  ;;  %v1142_v14 = vsub.f32 %v680_v23, %v1071_v34 }
  0x63   : > { %v297_v18 = vmul.f32 %v1128_v59, %v1128_v59  ;;  %v1149_v27 = vsub.f32 %v681_v26, %v1071_v34  ;;  %v1156_v49 = vsub.f32 %v684_v28, %v1071_v34 }
  0x64   : > { %v322_v54 = vadd.f32 %v321_v6, %v291_v3  ;;  %v298_v15 = vmul.f32 %v1135_v7, %v1135_v7  ;;  %v299_v23 = vmul.f32 %v1142_v14, %v1142_v14  ;;  %v1163_v3 = vsub.f32 %v685_v31, %v1071_v34 }
  0x65   : > { %v300_v20 = vmul.f32 %v1149_v27, %v1149_v27  ;;  %v301_v28 = vmul.f32 %v1156_v49, %v1156_v49 }
  0x66   : > { %v323_v11 = vadd.f32 %v322_v54, %v292_v4  ;;  %v1170_v4 = vsub.f32 %v688_v33, %v1071_v34  ;;  %v302_v25 = vmul.f32 %v1163_v3, %v1163_v3  ;;  %v1184_v54 = vsub.f32 %v692_v38, %v1071_v34 }
  0x68   : > { %v324_v62 = vadd.f32 %v323_v11, %v293_v8  ;;  %v1177_v8 = vsub.f32 %v689_v36, %v1071_v34  ;;  %v303_v33 = vmul.f32 %v1170_v4, %v1170_v4  ;;  %v1191_v11 = vsub.f32 %v693_v41, %v1071_v34 }
  0x69   : > { %v305_v38 = vmul.f32 %v1184_v54, %v1184_v54 }
  0x6a   : > { %v325_v16 = vadd.f32 %v324_v62, %v294_v5  ;;  %v304_v30 = vmul.f32 %v1177_v8, %v1177_v8  ;;  %v306_v35 = vmul.f32 %v1191_v11, %v1191_v11 }
  0x6c   : > { %v326_v19 = vadd.f32 %v325_v16, %v295_v13  ;;  %v1198_v13 = vsub.f32 %v696_v43, %v1071_v34  ;;  %v1212_v16 = vsub.f32 %v700_v48, %v1071_v34 }
  0x6e   : > { %v327_v21 = vadd.f32 %v326_v19, %v296_v10  ;;  %v1205_v10 = vsub.f32 %v697_v46, %v1071_v34  ;;  %v307_v43 = vmul.f32 %v1198_v13, %v1198_v13  ;;  %v1219_v19 = vsub.f32 %v701_v51, %v1071_v34 }
  0x6f   : > { %v309_v48 = vmul.f32 %v1212_v16, %v1212_v16 }
  0x70   : > { %v328_v2 = vadd.f32 %v327_v21, %v297_v18  ;;  %v308_v40 = vmul.f32 %v1205_v10, %v1205_v10  ;;  %v310_v45 = vmul.f32 %v1219_v19, %v1219_v19 }
  0x72   : > { %v329_v26 = vadd.f32 %v328_v2, %v298_v15  ;;  %v1226_v15 = vsub.f32 %v704_v53, %v1071_v34  ;;  %v1240_v2 = vsub.f32 %v708_v58, %v1071_v34 }
  0x74   : > { %v330_v6 = vadd.f32 %v329_v26, %v299_v23  ;;  %v1233_v23 = vsub.f32 %v705_v56, %v1071_v34  ;;  %v311_v53 = vmul.f32 %v1226_v15, %v1226_v15  ;;  %v1247_v26 = vsub.f32 %v709_v61, %v1071_v34 }
  0x75   : > { %v313_v58 = vmul.f32 %v1240_v2, %v1240_v2 }
  0x76   : > { %v331_v31 = vadd.f32 %v330_v6, %v300_v20  ;;  %v312_v50 = vmul.f32 %v1233_v23, %v1233_v23  ;;  %v314_v55 = vmul.f32 %v1247_v26, %v1247_v26 }
  0x78   : > { %v332_v5 = vadd.f32 %v331_v31, %v301_v28  ;;  %v1254_v28 = vsub.f32 %v712_v63, %v1071_v34  ;;  %v1268_v31 = vsub.f32 %v716_v17, %v1071_v34 }
  0x7a   : > { %v333_v36 = vadd.f32 %v332_v5, %v302_v25  ;;  %v1261_v25 = vsub.f32 %v713_v12, %v1071_v34  ;;  %v315_v63 = vmul.f32 %v1254_v28, %v1254_v28  ;;  %v1275_v5 = vsub.f32 %v717_v24, %v1071_v34 }
  0x7b   : > { %v317_v17 = vmul.f32 %v1268_v31, %v1268_v31 }
  0x7c   : > { %v334_v62 = vadd.f32 %v333_v36, %v303_v33  ;;  %v316_v60 = vmul.f32 %v1261_v25, %v1261_v25  ;;  %v318_v9 = vmul.f32 %v1275_v5, %v1275_v5 }
  0x7e   : > { %v335_v41 = vadd.f32 %v334_v62, %v304_v30  ;;  %v1282_v30 = vsub.f32 %v720_v32, %v1071_v34 }
  0x80   : > { %v336_v18 = vadd.f32 %v335_v41, %v305_v38  ;;  %v1289_v38 = vsub.f32 %v721_v37, %v1071_v34  ;;  %v319_v62 = vmul.f32 %v1282_v30, %v1282_v30 }
  0x82   : > { %v337_v46 = vadd.f32 %v336_v18, %v306_v35  ;;  %v320_v32 = vmul.f32 %v1289_v38, %v1289_v38 }
  0x84   : > { %v338_v21 = vadd.f32 %v337_v46, %v307_v43 }
  0x86   : > { %v339_v51 = vadd.f32 %v338_v21, %v308_v40 }
  0x88   : > { %v340_v20 = vadd.f32 %v339_v51, %v309_v48 }
  0x8a   : > { %v341_v56 = vadd.f32 %v340_v20, %v310_v45 }
  0x8c   : > { %v342_v6 = vadd.f32 %v341_v56, %v311_v53 }
  0x8e   : > { %v343_v61 = vadd.f32 %v342_v6, %v312_v50 }
  0x90   : > { %v344_v33 = vadd.f32 %v343_v61, %v313_v58 }
  0x92   : > { %v345_v12 = vadd.f32 %v344_v33, %v314_v55 }
  0x94   : > { %v346_v36 = vadd.f32 %v345_v12, %v315_v63 }
  0x96   : > { %v347_v24 = vadd.f32 %v346_v36, %v316_v60 }
  0x98   : > { %v348_v35 = vadd.f32 %v347_v24, %v317_v17 }
  0x9a   : > { %v349_v41 = vadd.f32 %v348_v35, %v318_v9 }
  0x9c   : > { %v350_v43 = vadd.f32 %v349_v41, %v319_v62 }
  0x9e   : > { %v351_v18 = vadd.f32 %v350_v43, %v320_v32 }
  0xa0   : > { %v352_v40 = vrot.slane %v351_v18, 4 }
  0xa2   : > { %v353_v46 = vadd.f32 %v352_v40, %v351_v18 }
  0xa4   : > { %v354_v48 = vrot.slane %v353_v46, 2 }
  0xa6   : > { %v355_v22 = vadd.f32 %v354_v48, %v353_v46 }
  0xa8   : > { %v356_v37 = vrot.slane %v355_v22, 1 }
  0xaa   : > { %v357_v34 = vadd.f32 %v356_v37, %v355_v22 }
  0xac   : > { %v358_v21 = vmul.f32 %v357_v34, %v1068_v29 }
  0xae   : > { %v359_v45 = vadd.f32 1e-05, %v358_v21 }
  0xb0   : > { %859 = vrsqrt.f32 %v359_v45  ;;  %vm366_vm1 = vweird.f32 %v359_v45 }
  0xb6   : > { %v860_v51 = vpop.eup %859 }
  0xb7   : > { %v361_v53 = vmul.f32 %v860_v51, %v359_v45  ;;  %vm367_vm2 = vweird.f32 %v860_v51 }
  0xb8   : > { %vm368_vm3 = vmor %vm366_vm1, %vm367_vm2 }
  0xb9   : > { %v362_v20 = vmul.f32 %v860_v51, %v361_v53 }
  0xbb   : > { %v363_v50 = vmul.f32 0.5, %v362_v20 }
  0xbd   : > { %v364_v56 = vsub.f32 1.5, %v363_v50 }
  0xbf   : > { %v365_v58 = vmul.f32 %v860_v51, %v364_v56 }
  0xc1   : > { %v1298_v6 = vsel %vm368_vm3, %v860_v51, %v365_v58 }
  0xc2   : > { %v370_v55 = vmul.f32 %v1298_v6, %v1076_v39  ;;  %v371_v29 = vmul.f32 %v1298_v6, %v1081_v44  ;;  %v372_v61 = vmul.f32 %v1298_v6, %v1086_v47  ;;  %v373_v63 = vmul.f32 %v1298_v6, %v1091_v42 }
  0xc3   : > { %v374_v33 = vmul.f32 %v1298_v6, %v1100_v0  ;;  %v375_v60 = vmul.f32 %v1298_v6, %v1107_v1  ;;  %v376_v12 = vmul.f32 %v1298_v6, %v1114_v52  ;;  %v377_v39 = vmul.f32 %v1298_v6, %v1121_v57 }
  0xc4   : > { %vm402_vm4 = vcmp.gt.f32.partialorder %v370_v55, 0.0  ;;  %vm403_vm5 = vcmp.gt.f32.partialorder %v371_v29, 0.0  ;;  %v434_v44 = vmul.f32 0.01, %v370_v55  ;;  %v435_v17 = vmul.f32 0.01, %v371_v29 }
  0xc5   : > { %vm404_vm6 = vcmp.gt.f32.partialorder %v372_v61, 0.0  ;;  %vm405_vm7 = vcmp.gt.f32.partialorder %v373_v63, 0.0  ;;  %v436_v47 = vmul.f32 0.01, %v372_v61  ;;  %v437_v42 = vmul.f32 0.01, %v373_v63 }
  0xc6   : > { %v466_v0 = vsel %vm402_vm4, %v370_v55, %v434_v44  ;;  %v467_v1 = vsel %vm403_vm5, %v371_v29, %v435_v17  ;;  %vm406_vm8 = vcmp.gt.f32.partialorder %v374_v33, 0.0  ;;  %vm407_vm9 = vcmp.gt.f32.partialorder %v375_v60, 0.0 }
  0xc7   : > { %v725_v52 = vpack.c.bf16 %v467_v1, %v466_v0  ;;  %v468_v57 = vsel %vm404_vm6, %v372_v61, %v436_v47  ;;  %v469_v36 = vsel %vm405_vm7, %v373_v63, %v437_v42  ;;  %v438_v9 = vmul.f32 0.01, %v374_v33 }
  0xc8   : > { %v730_v24 = vpack.c.bf16 %v469_v36, %v468_v57  ;;  %v439_v62 = vmul.f32 0.01, %v375_v60  ;;  %vm408_vm10 = vcmp.gt.f32.partialorder %v376_v12, 0.0  ;;  %vm409_vm11 = vcmp.gt.f32.partialorder %v377_v39, 0.0 }
  0xc9   : > { %726 = vst [vmem:[%s1321_s16] sm:$0xff] %v725_v52   ;;  %v470_v35 = vsel %vm406_vm8, %v374_v33, %v438_v9  ;;  %v440_v32 = vmul.f32 0.01, %v376_v12  ;;  %v441_v41 = vmul.f32 0.01, %v377_v39  ;;  %v378_v43 = vmul.f32 %v1298_v6, %v1128_v59 }
  0xca   : > { %817 = vst [vmem:[%s1321_s16 + $0x8] sm:$0xff] %v730_v24   ;;  %v471_v18 = vsel %vm407_vm9, %v375_v60, %v439_v62  ;;  %v379_v40 = vmul.f32 %v1298_v6, %v1135_v7  ;;  %v380_v46 = vmul.f32 %v1298_v6, %v1142_v14  ;;  %v381_v48 = vmul.f32 %v1298_v6, %v1149_v27 }
  0xcb   : > { %v735_v22 = vpack.c.bf16 %v471_v18, %v470_v35  ;;  %v472_v37 = vsel %vm408_vm10, %v376_v12, %v440_v32  ;;  %v473_v34 = vsel %vm409_vm11, %v377_v39, %v441_v41  ;;  %vm410_vm12 = vcmp.gt.f32.partialorder %v378_v43, 0.0 }
  0xcc   : > { %v740_v21 = vpack.c.bf16 %v473_v34, %v472_v37  ;;  %vm411_vm13 = vcmp.gt.f32.partialorder %v379_v40, 0.0  ;;  %v442_v45 = vmul.f32 0.01, %v378_v43  ;;  %v443_v59 = vmul.f32 0.01, %v379_v40 }
  0xcd   : > { %818 = vst [vmem:[%s1321_s16 + $0x10] sm:$0xff] %v735_v22   ;;  %vm412_vm14 = vcmp.gt.f32.partialorder %v380_v46, 0.0  ;;  %vm413_vm15 = vcmp.gt.f32.partialorder %v381_v48, 0.0  ;;  %v444_v7 = vmul.f32 0.01, %v380_v46  ;;  %v382_v51 = vmul.f32 %v1298_v6, %v1156_v49 }
  0xce   : > { %819 = vst [vmem:[%s1321_s16 + $0x18] sm:$0xff] %v740_v21   ;;  %v474_v14 = vsel %vm410_vm12, %v378_v43, %v442_v45  ;;  %v475_v53 = vsel %vm411_vm13, %v379_v40, %v443_v59  ;;  %v445_v27 = vmul.f32 0.01, %v381_v48  ;;  %v383_v20 = vmul.f32 %v1298_v6, %v1163_v3 }
  0xcf   : > { %v745_v50 = vpack.c.bf16 %v475_v53, %v474_v14  ;;  %v476_v56 = vsel %vm412_vm14, %v380_v46, %v444_v7  ;;  %vm414_vm0 = vcmp.gt.f32.partialorder %v382_v51, 0.0  ;;  %v446_v58 = vmul.f32 0.01, %v382_v51 }
  0xd0   : > { %v477_v55 = vsel %vm413_vm15, %v381_v48, %v445_v27  ;;  %vm415_vm1 = vcmp.gt.f32.partialorder %v383_v20, 0.0  ;;  %v447_v29 = vmul.f32 0.01, %v383_v20  ;;  %v384_v61 = vmul.f32 %v1298_v6, %v1170_v4 }
  0xd1   : > { %820 = vst [vmem:[%s1321_s16 + $0x20] sm:$0xff] %v745_v50   ;;  %v750_v49 = vpack.c.bf16 %v477_v55, %v476_v56  ;;  %v478_v63 = vsel %vm414_vm0, %v382_v51, %v446_v58  ;;  %v385_v33 = vmul.f32 %v1298_v6, %v1177_v8  ;;  %v386_v3 = vmul.f32 %v1298_v6, %v1184_v54 }
  0xd2   : > { %v479_v60 = vsel %vm415_vm1, %v383_v20, %v447_v29  ;;  %vm416_vm2 = vcmp.gt.f32.partialorder %v384_v61, 0.0  ;;  %v448_v12 = vmul.f32 0.01, %v384_v61  ;;  %v387_v39 = vmul.f32 %v1298_v6, %v1191_v11 }
  0xd3   : > { %821 = vst [vmem:[%s1321_s16 + $0x28] sm:$0xff] %v750_v49   ;;  %v755_v44 = vpack.c.bf16 %v479_v60, %v478_v63  ;;  %vm417_vm3 = vcmp.gt.f32.partialorder %v385_v33, 0.0  ;;  %v449_v4 = vmul.f32 0.01, %v385_v33  ;;  %vm418_vm4 = vcmp.gt.f32.partialorder %v386_v3, 0.0 }
  0xd4   : > { %v480_v17 = vsel %vm416_vm2, %v384_v61, %v448_v12  ;;  %vm419_vm5 = vcmp.gt.f32.partialorder %v387_v39, 0.0  ;;  %v450_v47 = vmul.f32 0.01, %v386_v3  ;;  %v451_v42 = vmul.f32 0.01, %v387_v39 }
  0xd5   : > { %822 = vst [vmem:[%s1321_s16 + $0x30] sm:$0xff] %v755_v44   ;;  %v481_v8 = vsel %vm417_vm3, %v385_v33, %v449_v4  ;;  %v388_v54 = vmul.f32 %v1298_v6, %v1198_v13  ;;  %v389_v0 = vmul.f32 %v1298_v6, %v1205_v10  ;;  %v390_v11 = vmul.f32 %v1298_v6, %v1212_v16 }
  0xd6   : > { %v760_v1 = vpack.c.bf16 %v481_v8, %v480_v17  ;;  %v482_v52 = vsel %vm418_vm4, %v386_v3, %v450_v47  ;;  %v483_v57 = vsel %vm419_vm5, %v387_v39, %v451_v42  ;;  %v391_v36 = vmul.f32 %v1298_v6, %v1219_v19 }
  0xd7   : > { %v765_v9 = vpack.c.bf16 %v483_v57, %v482_v52  ;;  %vm420_vm6 = vcmp.gt.f32.partialorder %v388_v54, 0.0  ;;  %vm421_vm7 = vcmp.gt.f32.partialorder %v389_v0, 0.0  ;;  %v452_v24 = vmul.f32 0.01, %v388_v54 }
  0xd8   : > { %823 = vst [vmem:[%s1321_s16 + $0x38] sm:$0xff] %v760_v1   ;;  %v453_v62 = vmul.f32 0.01, %v389_v0  ;;  %vm422_vm8 = vcmp.gt.f32.partialorder %v390_v11, 0.0  ;;  %vm423_vm9 = vcmp.gt.f32.partialorder %v391_v36, 0.0  ;;  %v392_v13 = vmul.f32 %v1298_v6, %v1226_v15 }
  0xd9   : > { %824 = vst [vmem:[%s1321_s16 + $0x40] sm:$0xff] %v765_v9   ;;  %v484_v10 = vsel %vm420_vm6, %v388_v54, %v452_v24  ;;  %v454_v16 = vmul.f32 0.01, %v390_v11  ;;  %v455_v35 = vmul.f32 0.01, %v391_v36  ;;  %v393_v32 = vmul.f32 %v1298_v6, %v1233_v23 }
  0xda   : > { %v485_v19 = vsel %vm421_vm7, %v389_v0, %v453_v62  ;;  %vm424_vm10 = vcmp.gt.f32.partialorder %v392_v13, 0.0  ;;  %v456_v41 = vmul.f32 0.01, %v392_v13  ;;  %v394_v43 = vmul.f32 %v1298_v6, %v1240_v2 }
  0xdb   : > { %v770_v18 = vpack.c.bf16 %v485_v19, %v484_v10  ;;  %v486_v40 = vsel %vm422_vm8, %v390_v11, %v454_v16  ;;  %v487_v46 = vsel %vm423_vm9, %v391_v36, %v455_v35  ;;  %vm425_vm11 = vcmp.gt.f32.partialorder %v393_v32, 0.0 }
  0xdc   : > { %v775_v15 = vpack.c.bf16 %v487_v46, %v486_v40  ;;  %v457_v48 = vmul.f32 0.01, %v393_v32  ;;  %v488_v22 = vsel %vm424_vm10, %v392_v13, %v456_v41  ;;  %v395_v37 = vmul.f32 %v1298_v6, %v1247_v26 }
  0xdd   : > { %825 = vst [vmem:[%s1321_s16 + $0x48] sm:$0xff] %v770_v18   ;;  %vm426_vm12 = vcmp.gt.f32.partialorder %v394_v43, 0.0  ;;  %v458_v23 = vmul.f32 0.01, %v394_v43  ;;  %v396_v34 = vmul.f32 %v1298_v6, %v1254_v28  ;;  %v397_v2 = vmul.f32 %v1298_v6, %v1261_v25 }
  0xde   : > { %826 = vst [vmem:[%s1321_s16 + $0x50] sm:$0xff] %v775_v15   ;;  %v489_v21 = vsel %vm425_vm11, %v393_v32, %v457_v48  ;;  %vm427_vm13 = vcmp.gt.f32.partialorder %v395_v37, 0.0  ;;  %v459_v45 = vmul.f32 0.01, %v395_v37  ;;  %v398_v59 = vmul.f32 %v1298_v6, %v1268_v31 }
  0xdf   : > { %v780_v7 = vpack.c.bf16 %v489_v21, %v488_v22  ;;  %v490_v51 = vsel %vm426_vm12, %v394_v43, %v458_v23  ;;  %vm428_vm14 = vcmp.gt.f32.partialorder %v396_v34, 0.0  ;;  %vm429_vm15 = vcmp.gt.f32.partialorder %v397_v2, 0.0 }
  0xe0   : > { %v491_v26 = vsel %vm427_vm13, %v395_v37, %v459_v45  ;;  %v460_v14 = vmul.f32 0.01, %v396_v34  ;;  %v461_v53 = vmul.f32 0.01, %v397_v2  ;;  %v399_v28 = vmul.f32 %v1298_v6, %v1275_v5 }
  0xe1   : > { %827 = vst [vmem:[%s1321_s16 + $0x58] sm:$0xff] %v780_v7   ;;  %v785_v25 = vpack.c.bf16 %v491_v26, %v490_v51  ;;  %vm430_vm0 = vcmp.gt.f32.partialorder %v398_v59, 0.0  ;;  %v462_v27 = vmul.f32 0.01, %v398_v59  ;;  %v400_v20 = vmul.f32 %v1298_v6, %v1282_v30 }
  0xe2   : > { %v492_v31 = vsel %vm428_vm14, %v396_v34, %v460_v14  ;;  %v493_v50 = vsel %vm429_vm15, %v397_v2, %v461_v53  ;;  %vm431_vm1 = vcmp.gt.f32.partialorder %v399_v28, 0.0  ;;  %v463_v56 = vmul.f32 0.01, %v399_v28 }
  0xe3   : > { %828 = vst [vmem:[%s1321_s16 + $0x60] sm:$0xff] %v785_v25   ;;  %v790_v58 = vpack.c.bf16 %v493_v50, %v492_v31  ;;  %v494_v55 = vsel %vm430_vm0, %v398_v59, %v462_v27  ;;  %v401_v5 = vmul.f32 %v1298_v6, %v1289_v38  ;;  %vm432_vm2 = vcmp.gt.f32.partialorder %v400_v20, 0.0 }
  0xe4   : > { %v495_v29 = vsel %vm431_vm1, %v399_v28, %v463_v56  ;;  %v464_v61 = vmul.f32 0.01, %v400_v20 }
  0xe5   : > { %829 = vst [vmem:[%s1321_s16 + $0x68] sm:$0xff] %v790_v58   ;;  %v795_v49 = vpack.c.bf16 %v495_v29, %v494_v55  ;;  %vm433_vm3 = vcmp.gt.f32.partialorder %v401_v5, 0.0  ;;  %v465_v63 = vmul.f32 0.01, %v401_v5 }
  0xe6   : > { %v496_v30 = vsel %vm432_vm2, %v400_v20, %v464_v61 }
  0xe7   : > { %830 = vst [vmem:[%s1321_s16 + $0x70] sm:$0xff] %v795_v49   ;;  %v497_v33 = vsel %vm433_vm3, %v401_v5, %v465_v63 }
  0xe8   : > { %v800_v3 = vpack.c.bf16 %v497_v33, %v496_v30 }
  0xea   : > { %831 = vst [vmem:[%s1321_s16 + $0x78] sm:$0xff] %v800_v3  }
  0xeb PF: > { %s11_s8 = sadd.s32 1, %s883_s8   ;;  %s1398_s6 = smov %s879_s7 }
  0xec   : > { %p8_p5 = scmp.ge.s32.totalorder %s11_s8, 4   ;;  %s1399_s7 = smov %s1401_s9 }
  0xee   :  { %10 = sbr.rel (!%p8_p5) target bundleno = 2 (0x2), region = 54 }

// kernel: residual_block_forward.7
= control target key start
LH: loop header
LB: loop body
LE: loop exit
PB: predicated region body
PF: predicated region fallthrough
CT: control target
= control target key end

     0   :  { %s1028_s9 = smov 0   ;;  %s1030_s10 = smov 0   ;;  %s1498_s0 = inlined_call_operand.vmem [shape: bf16[2,256,128], index: 0, kind: input, shape index: {}]   ;;  %s1499_s1 = inlined_call_operand.vmem [shape: bf16[2,256,128], index: 1, kind: input, shape index: {}]   ;;  %s1500_s2 = inlined_call_operand.vmem [shape: f32[2,256,128], index: 2, kind: output, shape index: {}]  }
   0x1   :  { %s1032_s11 = smov 0  }
   0x2 LB: > { %s24_s12 = sadd.s32 1, %s1006_s10  ;;  %p789_p0 = scmp.ge.s32.totalorder %s1010_s11, 1  ;;  %s1010_s11 = sphi %s1032_s11, %s12_s11   ;;  %s1006_s10 = sphi %s1030_s10, %s1502_s10   ;;  %s1002_s9 = sphi %s1028_s9, %s1501_s9  }
   0x3   : > { %p26_p1 = scmp.ge.s32.totalorder %s24_s12, 2  ;;  %p146_p2 = scmp.lt.s32.totalorder %s1010_s11, 3 }
   0x5   : > { %s1504_s12 = smov (%p26_p1, %s24_s12), 0  ;;  %p147_p3 = pnand %p789_p0, %p146_p2 }
   0x6   : > { %p182_p4 = scmp.lt.s32.totalorder (!%p147_p3), %s1002_s9, 1 }
   0x7   : > { %150 = sbr.rel (%p147_p3) target bundleno = 234 (0xea), region = 28 }
   0xc   : > { %s1506_s9 = smov (!%p182_p4, %s1002_s9), 1 }
   0xd   : > { %s798_s13 = sshll.u32 %s1506_s9, 7  ;;  %s800_s20 = sshll.u32 %s1506_s9, 8 }
   0xe   : > { %s1052_s16 = scalar_lea.vmem %s1498_s0, %s798_s13  ;;  %s1057_s19 = scalar_lea.vmem %s1499_s1, %s798_s13 }
   0xf   : > { %v802_v0 = vld [vmem:[%s1052_s16] sm:$0xff]   ;;  %v929_v2 = vld [vmem:[%s1052_s16 + $0x8] sm:$0xff]   ;;  %v930_v10 = vld [vmem:[%s1052_s16 + $0x10] sm:$0xff]   ;;  %s1407_s23 = scalar_lea.vmem %s1500_s2, %s800_s20 }
  0x10   : > { %v866_v1 = vld [vmem:[%s1057_s19] sm:$0xff]   ;;  %v944_v3 = vld [vmem:[%s1057_s19 + $0x8] sm:$0xff]   ;;  %v803_v4 = vunpack.c.l.bf16 %v802_v0  ;;  %v804_v5 = vunpack.c.h.bf16 %v802_v0  ;;  %v807_v8 = vunpack.c.l.bf16 %v929_v2  ;;  %v945_v11 = vld [vmem:[%s1057_s19 + $0x10] sm:$0xff]   ;;  %v808_v12 = vunpack.c.h.bf16 %v929_v2 }
  0x11   : > { %v867_v6 = vunpack.c.l.bf16 %v866_v1  ;;  %v868_v7 = vunpack.c.h.bf16 %v866_v1  ;;  %v871_v9 = vunpack.c.l.bf16 %v944_v3  ;;  %v872_v13 = vunpack.c.h.bf16 %v944_v3  ;;  %v931_v19 = vld [vmem:[%s1052_s16 + $0x18] sm:$0xff]   ;;  %v932_v29 = vld [vmem:[%s1052_s16 + $0x20] sm:$0xff]   ;;  %v933_v39 = vld [vmem:[%s1052_s16 + $0x28] sm:$0xff]  }
  0x12   : > { %v811_v16 = vunpack.c.l.bf16 %v930_v10  ;;  %v875_v17 = vunpack.c.l.bf16 %v945_v11  ;;  %v946_v20 = vld [vmem:[%s1057_s19 + $0x18] sm:$0xff]   ;;  %v812_v21 = vunpack.c.h.bf16 %v930_v10  ;;  %v876_v22 = vunpack.c.h.bf16 %v945_v11  ;;  %v947_v30 = vld [vmem:[%s1057_s19 + $0x20] sm:$0xff]   ;;  %v948_v40 = vld [vmem:[%s1057_s19 + $0x28] sm:$0xff]  }
  0x13   : > { %v1065_v14 = vadd.f32 %v867_v6, %v803_v4  ;;  %v1067_v15 = vadd.f32 %v868_v7, %v804_v5  ;;  %v1069_v18 = vadd.f32 %v871_v9, %v807_v8  ;;  %v1073_v23 = vadd.f32 %v872_v13, %v808_v12  ;;  %v934_v49 = vld [vmem:[%s1052_s16 + $0x30] sm:$0xff]   ;;  %v935_v59 = vld [vmem:[%s1052_s16 + $0x38] sm:$0xff]   ;;  %v936_v5 = vld [vmem:[%s1052_s16 + $0x40] sm:$0xff]  }
  0x14   : > { %v815_v25 = vunpack.c.l.bf16 %v931_v19  ;;  %v879_v26 = vunpack.c.l.bf16 %v946_v20  ;;  %v1077_v27 = vadd.f32 %v875_v17, %v811_v16  ;;  %v816_v31 = vunpack.c.h.bf16 %v931_v19  ;;  %v949_v50 = vld [vmem:[%s1057_s19 + $0x30] sm:$0xff]   ;;  %v950_v60 = vld [vmem:[%s1057_s19 + $0x38] sm:$0xff]   ;;  %v951_v6 = vld [vmem:[%s1057_s19 + $0x40] sm:$0xff]  }
  0x15   : > { %v366_v24 = vadd.f32 %v1067_v15, %v1065_v14  ;;  %v880_v32 = vunpack.c.h.bf16 %v946_v20  ;;  %v1082_v33 = vadd.f32 %v876_v22, %v812_v21  ;;  %v819_v35 = vunpack.c.l.bf16 %v932_v29  ;;  %v937_v17 = vld [vmem:[%s1052_s16 + $0x48] sm:$0xff]  }
  0x16   : > { %v883_v36 = vunpack.c.l.bf16 %v947_v30  ;;  %v1085_v37 = vadd.f32 %v879_v26, %v815_v25  ;;  %v820_v41 = vunpack.c.h.bf16 %v932_v29  ;;  %v884_v42 = vunpack.c.h.bf16 %v947_v30  ;;  %v952_v19 = vld [vmem:[%s1057_s19 + $0x48] sm:$0xff]   ;;  %v938_v30 = vld [vmem:[%s1052_s16 + $0x50] sm:$0xff]  }
  0x17   : > { %v367_v28 = vadd.f32 %v366_v24, %v1069_v18  ;;  %v1090_v43 = vadd.f32 %v880_v32, %v816_v31  ;;  %v823_v45 = vunpack.c.l.bf16 %v933_v39  ;;  %v887_v46 = vunpack.c.l.bf16 %v948_v40  ;;  %v953_v31 = vld [vmem:[%s1057_s19 + $0x50] sm:$0xff]  }
  0x18   : > { %v1093_v47 = vadd.f32 %v883_v36, %v819_v35  ;;  %v824_v51 = vunpack.c.h.bf16 %v933_v39  ;;  %v888_v52 = vunpack.c.h.bf16 %v948_v40  ;;  %v1098_v53 = vadd.f32 %v884_v42, %v820_v41  ;;  %v939_v42 = vld [vmem:[%s1052_s16 + $0x58] sm:$0xff]  }
  0x19   : > { %v368_v34 = vadd.f32 %v367_v28, %v1073_v23  ;;  %v827_v55 = vunpack.c.l.bf16 %v934_v49  ;;  %v891_v56 = vunpack.c.l.bf16 %v949_v50  ;;  %v1101_v57 = vadd.f32 %v887_v46, %v823_v45 }
  0x1a   : > { %v828_v61 = vunpack.c.h.bf16 %v934_v49  ;;  %v892_v62 = vunpack.c.h.bf16 %v949_v50  ;;  %v1106_v63 = vadd.f32 %v888_v52, %v824_v51  ;;  %v831_v1 = vunpack.c.l.bf16 %v935_v59 }
  0x1b   : > { %v369_v38 = vadd.f32 %v368_v34, %v1077_v27  ;;  %v895_v2 = vunpack.c.l.bf16 %v950_v60  ;;  %v1109_v3 = vadd.f32 %v891_v56, %v827_v55  ;;  %v832_v7 = vunpack.c.h.bf16 %v935_v59  ;;  %v940_v55 = vld [vmem:[%s1052_s16 + $0x60] sm:$0xff]  }
  0x1c   : > { %v896_v8 = vunpack.c.h.bf16 %v950_v60  ;;  %v1114_v9 = vadd.f32 %v892_v62, %v828_v61  ;;  %v835_v11 = vunpack.c.l.bf16 %v936_v5  ;;  %v899_v12 = vunpack.c.l.bf16 %v951_v6  ;;  %v955_v56 = vld [vmem:[%s1057_s19 + $0x60] sm:$0xff]  }
  0x1d   : > { %v370_v44 = vadd.f32 %v369_v38, %v1082_v33  ;;  %v1117_v13 = vadd.f32 %v895_v2, %v831_v1  ;;  %v836_v20 = vunpack.c.h.bf16 %v936_v5  ;;  %v900_v21 = vunpack.c.h.bf16 %v951_v6  ;;  %v956_v5 = vld [vmem:[%s1057_s19 + $0x68] sm:$0xff]  }
  0x1e   : > { %v1122_v22 = vadd.f32 %v896_v8, %v832_v7  ;;  %v839_v25 = vunpack.c.l.bf16 %v937_v17  ;;  %v903_v26 = vunpack.c.l.bf16 %v952_v19  ;;  %v1125_v28 = vadd.f32 %v899_v12, %v835_v11 }
  0x1f   : > { %v371_v48 = vadd.f32 %v370_v44, %v1085_v37  ;;  %v840_v32 = vunpack.c.h.bf16 %v937_v17  ;;  %v904_v34 = vunpack.c.h.bf16 %v952_v19  ;;  %v1130_v35 = vadd.f32 %v900_v21, %v836_v20  ;;  %v954_v44 = vld [vmem:[%s1057_s19 + $0x58] sm:$0xff]   ;;  %v942_v19 = vld [vmem:[%s1052_s16 + $0x70] sm:$0xff]  }
  0x20   : > { %v843_v38 = vunpack.c.l.bf16 %v938_v30  ;;  %v907_v39 = vunpack.c.l.bf16 %v953_v31  ;;  %v1133_v40 = vadd.f32 %v903_v26, %v839_v25  ;;  %v844_v45 = vunpack.c.h.bf16 %v938_v30  ;;  %v957_v20 = vld [vmem:[%s1057_s19 + $0x70] sm:$0xff]  }
  0x21   : > { %v372_v54 = vadd.f32 %v371_v48, %v1090_v43  ;;  %v908_v46 = vunpack.c.h.bf16 %v953_v31  ;;  %v1138_v48 = vadd.f32 %v904_v34, %v840_v32  ;;  %v847_v50 = vunpack.c.l.bf16 %v939_v42  ;;  %v943_v34 = vld [vmem:[%s1052_s16 + $0x78] sm:$0xff]  }
  0x22   : > { %v911_v51 = vunpack.c.l.bf16 %v954_v44  ;;  %v1141_v52 = vadd.f32 %v907_v39, %v843_v38  ;;  %v912_v59 = vunpack.c.h.bf16 %v954_v44  ;;  %v851_v62 = vunpack.c.l.bf16 %v940_v55 }
  0x23   : > { %v373_v58 = vadd.f32 %v372_v54, %v1093_v47  ;;  %v1146_v60 = vadd.f32 %v908_v46, %v844_v45  ;;  %v852_v6 = vunpack.c.h.bf16 %v940_v55  ;;  %v916_v7 = vunpack.c.h.bf16 %v955_v56 }
  0x24   : > { %v1149_v1 = vadd.f32 %v911_v51, %v847_v50  ;;  %v919_v12 = vunpack.c.l.bf16 %v956_v5  ;;  %v923_v30 = vunpack.c.l.bf16 %v957_v20  ;;  %v860_v38 = vunpack.c.h.bf16 %v942_v19 }
  0x25   : > { %v374_v0 = vadd.f32 %v373_v58, %v1098_v53  ;;  %v848_v58 = vunpack.c.h.bf16 %v939_v42  ;;  %v1162_v25 = vadd.f32 %v916_v7, %v852_v6  ;;  %v924_v39 = vunpack.c.h.bf16 %v957_v20 }
  0x26   : > { %v863_v44 = vunpack.c.l.bf16 %v943_v34  ;;  %v864_v50 = vunpack.c.h.bf16 %v943_v34 }
  0x27   : > { %v375_v4 = vadd.f32 %v374_v0, %v1101_v57  ;;  %v915_v0 = vunpack.c.l.bf16 %v955_v56  ;;  %v1154_v8 = vadd.f32 %v912_v59, %v848_v58  ;;  %v1012_v56 = vmov 256.0  }
  0x28   : > { %984 = vrcp.f32 %v1012_v56 }
  0x29   : > { %v376_v10 = vadd.f32 %v375_v4, %v1106_v63  ;;  %v941_v4 = vld [vmem:[%s1052_s16 + $0x68] sm:$0xff]  }
  0x2a   : > { %v855_v11 = vunpack.c.l.bf16 %v941_v4  ;;  %v856_v21 = vunpack.c.h.bf16 %v941_v4 }
  0x2b   : > { %v377_v16 = vadd.f32 %v376_v10, %v1109_v3 }
  0x2c   : > { %v1165_v31 = vadd.f32 %v919_v12, %v855_v11 }
  0x2d   : > { %v378_v24 = vadd.f32 %v377_v16, %v1114_v9  ;;  %v1157_v16 = vadd.f32 %v915_v0, %v851_v62 }
  0x2e   : > { %v985_v0 = vpop.eup %984 }
  0x2f   : > { %v379_v29 = vadd.f32 %v378_v24, %v1117_v13  ;;  %v920_v24 = vunpack.c.h.bf16 %v956_v5  ;;  %v404_v5 = vmul.f32 256.0, %v985_v0  ;;  %vm408_vm0 = vweird.f32 %v985_v0 }
  0x31   : > { %v380_v36 = vadd.f32 %v379_v29, %v1122_v22  ;;  %v859_v29 = vunpack.c.l.bf16 %v942_v19 }
  0x33   : > { %v381_v41 = vadd.f32 %v380_v36, %v1125_v28  ;;  %v958_v36 = vld [vmem:[%s1057_s19 + $0x78] sm:$0xff]   ;;  %v1173_v46 = vadd.f32 %v923_v30, %v859_v29 }
  0x34   : > { %v927_v45 = vunpack.c.l.bf16 %v958_v36  ;;  %v928_v51 = vunpack.c.h.bf16 %v958_v36 }
  0x35   : > { %v382_v49 = vadd.f32 %v381_v41, %v1130_v35  ;;  %v1170_v41 = vadd.f32 %v920_v24, %v856_v21 }
  0x36   : > { %v1179_v58 = vadd.f32 %v927_v45, %v863_v44 }
  0x37   : > { %v383_v54 = vadd.f32 %v382_v49, %v1133_v40 }
  0x39   : > { %v384_v61 = vadd.f32 %v383_v54, %v1138_v48  ;;  %v1176_v54 = vadd.f32 %v924_v39, %v860_v38 }
  0x3b   : > { %v385_v2 = vadd.f32 %v384_v61, %v1141_v52  ;;  %v1182_v61 = vadd.f32 %v928_v51, %v864_v50 }
  0x3d   : > { %v386_v10 = vadd.f32 %v385_v2, %v1146_v60 }
  0x3f   : > { %v387_v17 = vadd.f32 %v386_v10, %v1149_v1  ;;  %v405_v10 = vsub.f32 1.0, %v404_v5 }
  0x41   : > { %v388_v26 = vadd.f32 %v387_v17, %v1154_v8  ;;  %v406_v17 = vmul.f32 %v985_v0, %v405_v10 }
  0x43   : > { %v389_v32 = vadd.f32 %v388_v26, %v1157_v16  ;;  %v407_v20 = vadd.f32 %v985_v0, %v406_v17 }
  0x45   : > { %v390_v42 = vadd.f32 %v389_v32, %v1162_v25  ;;  %v1187_v24 = vsel %vm408_vm0, %v985_v0, %v407_v20 }
  0x47   : > { %v391_v49 = vadd.f32 %v390_v42, %v1165_v31 }
  0x49   : > { %v392_v55 = vadd.f32 %v391_v49, %v1170_v41 }
  0x4b   : > { %v393_v59 = vadd.f32 %v392_v55, %v1173_v46 }
  0x4d   : > { %v394_v62 = vadd.f32 %v393_v59, %v1176_v54 }
  0x4f   : > { %v395_v2 = vadd.f32 %v394_v62, %v1179_v58 }
  0x51   : > { %v396_v4 = vadd.f32 %v395_v2, %v1182_v61 }
  0x53   : > { %v397_v6 = vrot.slane %v396_v4, 4 }
  0x55   : > { %v398_v7 = vadd.f32 %v397_v6, %v396_v4 }
  0x57   : > { %v399_v11 = vrot.slane %v398_v7, 2 }
  0x59   : > { %v400_v12 = vadd.f32 %v399_v11, %v398_v7 }
  0x5b   : > { %v401_v19 = vrot.slane %v400_v12, 1 }
  0x5d   : > { %v402_v21 = vadd.f32 %v401_v19, %v400_v12 }
  0x5f   : > { %v1190_v26 = vmul.f32 %v1187_v24, %v402_v21 }
  0x61   : > { %v1194_v29 = vsub.f32 %v1065_v14, %v1190_v26  ;;  %v1198_v30 = vsub.f32 %v1067_v15, %v1190_v26  ;;  %v1202_v32 = vsub.f32 %v1069_v18, %v1190_v26  ;;  %v1206_v34 = vsub.f32 %v1073_v23, %v1190_v26 }
  0x62   : > { %v1214_v14 = vsub.f32 %v1077_v27, %v1190_v26  ;;  %v1220_v18 = vsub.f32 %v1082_v33, %v1190_v26  ;;  %v1226_v42 = vsub.f32 %v1085_v37, %v1190_v26  ;;  %v1232_v45 = vsub.f32 %v1090_v43, %v1190_v26 }
  0x63   : > { %v443_v36 = vmul.f32 %v1194_v29, %v1194_v29  ;;  %v444_v38 = vmul.f32 %v1198_v30, %v1198_v30  ;;  %v445_v15 = vmul.f32 %v1202_v32, %v1202_v32  ;;  %v446_v23 = vmul.f32 %v1206_v34, %v1206_v34 }
  0x64   : > { %v447_v44 = vmul.f32 %v1214_v14, %v1214_v14  ;;  %v448_v33 = vmul.f32 %v1220_v18, %v1220_v18  ;;  %v1238_v50 = vsub.f32 %v1093_v47, %v1190_v26  ;;  %v449_v37 = vmul.f32 %v1226_v42, %v1226_v42 }
  0x65   : > { %v475_v39 = vadd.f32 %v444_v38, %v443_v36  ;;  %v1244_v55 = vsub.f32 %v1098_v53, %v1190_v26  ;;  %v450_v43 = vmul.f32 %v1232_v45, %v1232_v45  ;;  %v1250_v59 = vsub.f32 %v1101_v57, %v1190_v26 }
  0x66   : > { %v451_v47 = vmul.f32 %v1238_v50, %v1238_v50  ;;  %v1256_v0 = vsub.f32 %v1106_v63, %v1190_v26  ;;  %v1262_v4 = vsub.f32 %v1109_v3, %v1190_v26  ;;  %v1268_v6 = vsub.f32 %v1114_v9, %v1190_v26 }
  0x67   : > { %v476_v27 = vadd.f32 %v475_v39, %v445_v15  ;;  %v452_v53 = vmul.f32 %v1244_v55, %v1244_v55  ;;  %v453_v57 = vmul.f32 %v1250_v59, %v1250_v59  ;;  %v1274_v10 = vsub.f32 %v1117_v13, %v1190_v26 }
  0x68   : > { %v454_v63 = vmul.f32 %v1256_v0, %v1256_v0  ;;  %v455_v3 = vmul.f32 %v1262_v4, %v1262_v4  ;;  %v1280_v12 = vsub.f32 %v1122_v22, %v1190_v26  ;;  %v456_v9 = vmul.f32 %v1268_v6, %v1268_v6 }
  0x69   : > { %v477_v49 = vadd.f32 %v476_v27, %v446_v23  ;;  %v1286_v19 = vsub.f32 %v1125_v28, %v1190_v26  ;;  %v457_v13 = vmul.f32 %v1274_v10, %v1274_v10  ;;  %v1292_v21 = vsub.f32 %v1130_v35, %v1190_v26 }
  0x6a   : > { %v458_v22 = vmul.f32 %v1280_v12, %v1280_v12  ;;  %v1298_v38 = vsub.f32 %v1133_v40, %v1190_v26  ;;  %v1304_v23 = vsub.f32 %v1138_v48, %v1190_v26 }
  0x6b   : > { %v478_v51 = vadd.f32 %v477_v49, %v447_v44  ;;  %v459_v28 = vmul.f32 %v1286_v19, %v1286_v19  ;;  %v460_v35 = vmul.f32 %v1292_v21, %v1292_v21  ;;  %v1310_v44 = vsub.f32 %v1141_v52, %v1190_v26 }
  0x6c   : > { %v461_v40 = vmul.f32 %v1298_v38, %v1298_v38  ;;  %v462_v48 = vmul.f32 %v1304_v23, %v1304_v23 }
  0x6d   : > { %v479_v56 = vadd.f32 %v478_v51, %v448_v33  ;;  %v1316_v33 = vsub.f32 %v1146_v60, %v1190_v26  ;;  %v463_v52 = vmul.f32 %v1310_v44, %v1310_v44 }
  0x6f   : > { %v480_v62 = vadd.f32 %v479_v56, %v449_v37  ;;  %v1322_v37 = vsub.f32 %v1149_v1, %v1190_v26  ;;  %v464_v60 = vmul.f32 %v1316_v33, %v1316_v33 }
  0x71   : > { %v481_v2 = vadd.f32 %v480_v62, %v450_v43  ;;  %v1328_v43 = vsub.f32 %v1154_v8, %v1190_v26  ;;  %v465_v1 = vmul.f32 %v1322_v37, %v1322_v37 }
  0x73   : > { %v482_v5 = vadd.f32 %v481_v2, %v451_v47  ;;  %v1334_v47 = vsub.f32 %v1157_v16, %v1190_v26  ;;  %v466_v8 = vmul.f32 %v1328_v43, %v1328_v43 }
  0x75   : > { %v483_v7 = vadd.f32 %v482_v5, %v452_v53  ;;  %v1340_v53 = vsub.f32 %v1162_v25, %v1190_v26  ;;  %v467_v16 = vmul.f32 %v1334_v47, %v1334_v47 }
  0x77   : > { %v484_v11 = vadd.f32 %v483_v7, %v453_v57  ;;  %v1346_v57 = vsub.f32 %v1165_v31, %v1190_v26  ;;  %v468_v25 = vmul.f32 %v1340_v53, %v1340_v53 }
  0x79   : > { %v485_v17 = vadd.f32 %v484_v11, %v454_v63  ;;  %v1352_v63 = vsub.f32 %v1170_v41, %v1190_v26  ;;  %v469_v31 = vmul.f32 %v1346_v57, %v1346_v57 }
  0x7b   : > { %v486_v20 = vadd.f32 %v485_v17, %v455_v3  ;;  %v1358_v3 = vsub.f32 %v1173_v46, %v1190_v26  ;;  %v470_v41 = vmul.f32 %v1352_v63, %v1352_v63 }
  0x7d   : > { %v487_v36 = vadd.f32 %v486_v20, %v456_v9  ;;  %v1364_v9 = vsub.f32 %v1176_v54, %v1190_v26  ;;  %v471_v46 = vmul.f32 %v1358_v3, %v1358_v3 }
  0x7f   : > { %v488_v15 = vadd.f32 %v487_v36, %v457_v13  ;;  %v1370_v13 = vsub.f32 %v1179_v58, %v1190_v26  ;;  %v472_v54 = vmul.f32 %v1364_v9, %v1364_v9 }
  0x81   : > { %v489_v39 = vadd.f32 %v488_v15, %v458_v22  ;;  %v1376_v22 = vsub.f32 %v1182_v61, %v1190_v26 }
  0x83   : > { %v490_v27 = vadd.f32 %v489_v39, %v459_v28  ;;  %v473_v28 = vmul.f32 %v1370_v13, %v1370_v13  ;;  %v474_v58 = vmul.f32 %v1376_v22, %v1376_v22 }
  0x85   : > { %v491_v49 = vadd.f32 %v490_v27, %v460_v35 }
  0x87   : > { %v492_v51 = vadd.f32 %v491_v49, %v461_v40 }
  0x89   : > { %v493_v56 = vadd.f32 %v492_v51, %v462_v48 }
  0x8b   : > { %v494_v62 = vadd.f32 %v493_v56, %v463_v52 }
  0x8d   : > { %v495_v2 = vadd.f32 %v494_v62, %v464_v60 }
  0x8f   : > { %v496_v5 = vadd.f32 %v495_v2, %v465_v1 }
  0x91   : > { %v497_v7 = vadd.f32 %v496_v5, %v466_v8 }
  0x93   : > { %v498_v11 = vadd.f32 %v497_v7, %v467_v16 }
  0x95   : > { %v499_v17 = vadd.f32 %v498_v11, %v468_v25 }
  0x97   : > { %v500_v20 = vadd.f32 %v499_v17, %v469_v31 }
  0x99   : > { %v501_v36 = vadd.f32 %v500_v20, %v470_v41 }
  0x9b   : > { %v502_v15 = vadd.f32 %v501_v36, %v471_v46 }
  0x9d   : > { %v503_v35 = vadd.f32 %v502_v15, %v472_v54 }
  0x9f   : > { %v504_v39 = vadd.f32 %v503_v35, %v473_v28 }
  0xa1   : > { %v505_v40 = vadd.f32 %v504_v39, %v474_v58 }
  0xa3   : > { %v506_v27 = vrot.slane %v505_v40, 4 }
  0xa5   : > { %v507_v48 = vadd.f32 %v506_v27, %v505_v40 }
  0xa7   : > { %v508_v49 = vrot.slane %v507_v48, 2 }
  0xa9   : > { %v509_v61 = vadd.f32 %v508_v49, %v507_v48 }
  0xab   : > { %v510_v26 = vrot.slane %v509_v61, 1 }
  0xad   : > { %v511_v52 = vadd.f32 %v510_v26, %v509_v61 }
  0xaf   : > { %v512_v51 = vmul.f32 %v511_v52, %v1187_v24 }
  0xb1   : > { %v513_v60 = vadd.f32 1e-05, %v512_v51 }
  0xb3   : > { %986 = vrsqrt.f32 %v513_v60  ;;  %vm520_vm1 = vweird.f32 %v513_v60 }
  0xb9   : > { %v987_v56 = vpop.eup %986 }
  0xba   : > { %v515_v1 = vmul.f32 %v987_v56, %v513_v60  ;;  %vm521_vm2 = vweird.f32 %v987_v56 }
  0xbb   : > { %vm522_vm3 = vmor %vm520_vm1, %vm521_vm2 }
  0xbc   : > { %v516_v62 = vmul.f32 %v987_v56, %v515_v1 }
  0xbe   : > { %v517_v8 = vmul.f32 0.5, %v516_v62 }
  0xc0   : > { %v518_v2 = vsub.f32 1.5, %v517_v8 }
  0xc2   : > { %v519_v16 = vmul.f32 %v987_v56, %v518_v2 }
  0xc4   : > { %v1386_v5 = vsel %vm522_vm3, %v987_v56, %v519_v16 }
  0xc5   : > { %v524_v25 = vmul.f32 %v1386_v5, %v1194_v29  ;;  %v525_v24 = vmul.f32 %v1386_v5, %v1198_v30  ;;  %v526_v7 = vmul.f32 %v1386_v5, %v1202_v32  ;;  %v527_v31 = vmul.f32 %v1386_v5, %v1206_v34 }
  0xc6   : > { %v528_v11 = vmul.f32 %v1386_v5, %v1214_v14  ;;  %v529_v41 = vmul.f32 %v1386_v5, %v1220_v18  ;;  %v530_v17 = vmul.f32 %v1386_v5, %v1226_v42  ;;  %v531_v29 = vmul.f32 %v1386_v5, %v1232_v45 }
  0xc7   : > { %vm556_vm4 = vcmp.gt.f32.partialorder %v524_v25, 0.0  ;;  %v588_v30 = vmul.f32 0.01, %v524_v25  ;;  %vm557_vm5 = vcmp.gt.f32.partialorder %v525_v24, 0.0  ;;  %v589_v32 = vmul.f32 0.01, %v525_v24 }
  0xc8   : > { %vm558_vm6 = vcmp.gt.f32.partialorder %v526_v7, 0.0  ;;  %v590_v34 = vmul.f32 0.01, %v526_v7  ;;  %vm559_vm7 = vcmp.gt.f32.partialorder %v527_v31, 0.0  ;;  %v591_v14 = vmul.f32 0.01, %v527_v31 }
  0xc9   : > { %v620_v18 = vsel %vm556_vm4, %v524_v25, %v588_v30  ;;  %v621_v42 = vsel %vm557_vm5, %v525_v24, %v589_v32  ;;  %vm560_vm8 = vcmp.gt.f32.partialorder %v528_v11, 0.0  ;;  %v592_v45 = vmul.f32 0.01, %v528_v11 }
  0xca   : > { %652 = vst [vmem:[%s1407_s23] sm:$0xff] %v620_v18  ;;  %v622_v46 = vsel %vm558_vm6, %v526_v7, %v590_v34  ;;  %v623_v20 = vsel %vm559_vm7, %v527_v31, %v591_v14  ;;  %vm561_vm9 = vcmp.gt.f32.partialorder %v529_v41, 0.0  ;;  %v593_v54 = vmul.f32 0.01, %v529_v41 }
  0xcb   : > { %653 = vst [vmem:[%s1407_s23 + $0x8] sm:$0xff] %v621_v42  ;;  %v624_v36 = vsel %vm560_vm8, %v528_v11, %v592_v45  ;;  %vm562_vm10 = vcmp.gt.f32.partialorder %v530_v17, 0.0  ;;  %v594_v28 = vmul.f32 0.01, %v530_v17  ;;  %vm563_vm11 = vcmp.gt.f32.partialorder %v531_v29, 0.0 }
  0xcc   : > { %654 = vst [vmem:[%s1407_s23 + $0x10] sm:$0xff] %v622_v46  ;;  %v625_v15 = vsel %vm561_vm9, %v529_v41, %v593_v54  ;;  %v595_v58 = vmul.f32 0.01, %v531_v29  ;;  %v532_v35 = vmul.f32 %v1386_v5, %v1238_v50  ;;  %v533_v39 = vmul.f32 %v1386_v5, %v1244_v55 }
  0xcd   : > { %655 = vst [vmem:[%s1407_s23 + $0x18] sm:$0xff] %v623_v20  ;;  %v626_v40 = vsel %vm562_vm10, %v530_v17, %v594_v28  ;;  %v534_v27 = vmul.f32 %v1386_v5, %v1250_v59  ;;  %v535_v48 = vmul.f32 %v1386_v5, %v1256_v0  ;;  %v536_v49 = vmul.f32 %v1386_v5, %v1262_v4 }
  0xce   : > { %656 = vst [vmem:[%s1407_s23 + $0x20] sm:$0xff] %v624_v36  ;;  %v627_v61 = vsel %vm563_vm11, %v531_v29, %v595_v58  ;;  %vm564_vm12 = vcmp.gt.f32.partialorder %v532_v35, 0.0  ;;  %v596_v50 = vmul.f32 0.01, %v532_v35  ;;  %vm565_vm13 = vcmp.gt.f32.partialorder %v533_v39, 0.0 }
  0xcf   : > { %657 = vst [vmem:[%s1407_s23 + $0x28] sm:$0xff] %v625_v15  ;;  %v597_v55 = vmul.f32 0.01, %v533_v39  ;;  %vm566_vm14 = vcmp.gt.f32.partialorder %v534_v27, 0.0  ;;  %v598_v26 = vmul.f32 0.01, %v534_v27  ;;  %v537_v59 = vmul.f32 %v1386_v5, %v1268_v6 }
  0xd0   : > { %658 = vst [vmem:[%s1407_s23 + $0x30] sm:$0xff] %v626_v40  ;;  %v628_v0 = vsel %vm564_vm12, %v532_v35, %v596_v50  ;;  %vm567_vm15 = vcmp.gt.f32.partialorder %v535_v48, 0.0  ;;  %v599_v52 = vmul.f32 0.01, %v535_v48  ;;  %vm568_vm0 = vcmp.gt.f32.partialorder %v536_v49, 0.0 }
  0xd1   : > { %659 = vst [vmem:[%s1407_s23 + $0x38] sm:$0xff] %v627_v61  ;;  %v629_v4 = vsel %vm565_vm13, %v533_v39, %v597_v55  ;;  %v630_v51 = vsel %vm566_vm14, %v534_v27, %v598_v26  ;;  %v600_v60 = vmul.f32 0.01, %v536_v49  ;;  %vm569_vm1 = vcmp.gt.f32.partialorder %v537_v59, 0.0 }
  0xd2   : > { %660 = vst [vmem:[%s1407_s23 + $0x40] sm:$0xff] %v628_v0  ;;  %v631_v56 = vsel %vm567_vm15, %v535_v48, %v599_v52  ;;  %v601_v1 = vmul.f32 0.01, %v537_v59  ;;  %v538_v62 = vmul.f32 %v1386_v5, %v1274_v10  ;;  %v539_v6 = vmul.f32 %v1386_v5, %v1280_v12 }
  0xd3   : > { %661 = vst [vmem:[%s1407_s23 + $0x48] sm:$0xff] %v629_v4  ;;  %v632_v8 = vsel %vm568_vm0, %v536_v49, %v600_v60  ;;  %v540_v2 = vmul.f32 %v1386_v5, %v1286_v19  ;;  %v541_v16 = vmul.f32 %v1386_v5, %v1292_v21  ;;  %v542_v25 = vmul.f32 %v1386_v5, %v1298_v38 }
  0xd4   : > { %662 = vst [vmem:[%s1407_s23 + $0x50] sm:$0xff] %v630_v51  ;;  %v633_v24 = vsel %vm569_vm1, %v537_v59, %v601_v1  ;;  %vm570_vm2 = vcmp.gt.f32.partialorder %v538_v62, 0.0  ;;  %v602_v10 = vmul.f32 0.01, %v538_v62  ;;  %vm571_vm3 = vcmp.gt.f32.partialorder %v539_v6, 0.0 }
  0xd5   : > { %663 = vst [vmem:[%s1407_s23 + $0x58] sm:$0xff] %v631_v56  ;;  %v603_v12 = vmul.f32 0.01, %v539_v6  ;;  %vm572_vm4 = vcmp.gt.f32.partialorder %v540_v2, 0.0  ;;  %v604_v7 = vmul.f32 0.01, %v540_v2  ;;  %v543_v19 = vmul.f32 %v1386_v5, %v1304_v23 }
  0xd6   : > { %664 = vst [vmem:[%s1407_s23 + $0x60] sm:$0xff] %v632_v8  ;;  %v634_v21 = vsel %vm570_vm2, %v538_v62, %v602_v10  ;;  %vm573_vm5 = vcmp.gt.f32.partialorder %v541_v16, 0.0  ;;  %v605_v31 = vmul.f32 0.01, %v541_v16  ;;  %vm574_vm6 = vcmp.gt.f32.partialorder %v542_v25, 0.0 }
  0xd7   : > { %665 = vst [vmem:[%s1407_s23 + $0x68] sm:$0xff] %v633_v24  ;;  %v635_v38 = vsel %vm571_vm3, %v539_v6, %v603_v12  ;;  %v636_v11 = vsel %vm572_vm4, %v540_v2, %v604_v7  ;;  %v606_v41 = vmul.f32 0.01, %v542_v25  ;;  %vm575_vm7 = vcmp.gt.f32.partialorder %v543_v19, 0.0 }
  0xd8   : > { %666 = vst [vmem:[%s1407_s23 + $0x70] sm:$0xff] %v634_v21  ;;  %v637_v17 = vsel %vm573_vm5, %v541_v16, %v605_v31  ;;  %v607_v29 = vmul.f32 0.01, %v543_v19  ;;  %v544_v30 = vmul.f32 %v1386_v5, %v1310_v44  ;;  %v545_v23 = vmul.f32 %v1386_v5, %v1316_v33 }
  0xd9   : > { %667 = vst [vmem:[%s1407_s23 + $0x78] sm:$0xff] %v635_v38  ;;  %v638_v32 = vsel %vm574_vm6, %v542_v25, %v606_v41  ;;  %v546_v34 = vmul.f32 %v1386_v5, %v1322_v37  ;;  %v547_v14 = vmul.f32 %v1386_v5, %v1328_v43  ;;  %v548_v18 = vmul.f32 %v1386_v5, %v1334_v47 }
  0xda   : > { %668 = vst [vmem:[%s1407_s23 + $0x80] sm:$0xff] %v636_v11  ;;  %v639_v42 = vsel %vm575_vm7, %v543_v19, %v607_v29  ;;  %vm576_vm8 = vcmp.gt.f32.partialorder %v544_v30, 0.0  ;;  %v608_v44 = vmul.f32 0.01, %v544_v30  ;;  %vm577_vm9 = vcmp.gt.f32.partialorder %v545_v23, 0.0 }
  0xdb   : > { %669 = vst [vmem:[%s1407_s23 + $0x88] sm:$0xff] %v637_v17  ;;  %v609_v33 = vmul.f32 0.01, %v545_v23  ;;  %vm578_vm10 = vcmp.gt.f32.partialorder %v546_v34, 0.0  ;;  %v610_v45 = vmul.f32 0.01, %v546_v34  ;;  %v549_v37 = vmul.f32 %v1386_v5, %v1340_v53 }
  0xdc   : > { %670 = vst [vmem:[%s1407_s23 + $0x90] sm:$0xff] %v638_v32  ;;  %v640_v43 = vsel %vm576_vm8, %v544_v30, %v608_v44  ;;  %vm579_vm11 = vcmp.gt.f32.partialorder %v547_v14, 0.0  ;;  %v611_v46 = vmul.f32 0.01, %v547_v14  ;;  %vm580_vm12 = vcmp.gt.f32.partialorder %v548_v18, 0.0 }
  0xdd   : > { %671 = vst [vmem:[%s1407_s23 + $0x98] sm:$0xff] %v639_v42  ;;  %v641_v47 = vsel %vm577_vm9, %v545_v23, %v609_v33  ;;  %v642_v20 = vsel %vm578_vm10, %v546_v34, %v610_v45  ;;  %v612_v54 = vmul.f32 0.01, %v548_v18  ;;  %vm581_vm13 = vcmp.gt.f32.partialorder %v549_v37, 0.0 }
  0xde   : > { %672 = vst [vmem:[%s1407_s23 + $0xa0] sm:$0xff] %v640_v43  ;;  %v643_v36 = vsel %vm579_vm11, %v547_v14, %v611_v46  ;;  %v613_v28 = vmul.f32 0.01, %v549_v37  ;;  %v550_v15 = vmul.f32 %v1386_v5, %v1346_v57  ;;  %v551_v53 = vmul.f32 %v1386_v5, %v1352_v63 }
  0xdf   : > { %673 = vst [vmem:[%s1407_s23 + $0xa8] sm:$0xff] %v641_v47  ;;  %v644_v58 = vsel %vm580_vm12, %v548_v18, %v612_v54  ;;  %v552_v35 = vmul.f32 %v1386_v5, %v1358_v3  ;;  %v553_v39 = vmul.f32 %v1386_v5, %v1364_v9  ;;  %v554_v40 = vmul.f32 %v1386_v5, %v1370_v13 }
  0xe0   : > { %674 = vst [vmem:[%s1407_s23 + $0xb0] sm:$0xff] %v642_v20  ;;  %v645_v27 = vsel %vm581_vm13, %v549_v37, %v613_v28  ;;  %vm582_vm14 = vcmp.gt.f32.partialorder %v550_v15, 0.0  ;;  %v614_v57 = vmul.f32 0.01, %v550_v15  ;;  %vm583_vm15 = vcmp.gt.f32.partialorder %v551_v53, 0.0 }
  0xe1   : > { %675 = vst [vmem:[%s1407_s23 + $0xb8] sm:$0xff] %v643_v36  ;;  %v615_v63 = vmul.f32 0.01, %v551_v53  ;;  %vm584_vm0 = vcmp.gt.f32.partialorder %v552_v35, 0.0  ;;  %v616_v48 = vmul.f32 0.01, %v552_v35  ;;  %v555_v3 = vmul.f32 %v1386_v5, %v1376_v22 }
  0xe2   : > { %676 = vst [vmem:[%s1407_s23 + $0xc0] sm:$0xff] %v644_v58  ;;  %v646_v9 = vsel %vm582_vm14, %v550_v15, %v614_v57  ;;  %vm585_vm1 = vcmp.gt.f32.partialorder %v553_v39, 0.0  ;;  %v617_v13 = vmul.f32 0.01, %v553_v39  ;;  %vm586_vm2 = vcmp.gt.f32.partialorder %v554_v40, 0.0 }
  0xe3   : > { %677 = vst [vmem:[%s1407_s23 + $0xc8] sm:$0xff] %v645_v27  ;;  %v647_v49 = vsel %vm583_vm15, %v551_v53, %v615_v63  ;;  %v648_v61 = vsel %vm584_vm0, %v552_v35, %v616_v48  ;;  %v618_v50 = vmul.f32 0.01, %v554_v40  ;;  %vm587_vm3 = vcmp.gt.f32.partialorder %v555_v3, 0.0 }
  0xe4   : > { %678 = vst [vmem:[%s1407_s23 + $0xd0] sm:$0xff] %v646_v9  ;;  %v649_v55 = vsel %vm585_vm1, %v553_v39, %v617_v13  ;;  %v619_v26 = vmul.f32 0.01, %v555_v3 }
  0xe5   : > { %679 = vst [vmem:[%s1407_s23 + $0xd8] sm:$0xff] %v647_v49  ;;  %v650_v59 = vsel %vm586_vm2, %v554_v40, %v618_v50 }
  0xe6   : > { %680 = vst [vmem:[%s1407_s23 + $0xe0] sm:$0xff] %v648_v61  ;;  %v651_v22 = vsel %vm587_vm3, %v555_v3, %v619_v26 }
  0xe7   : > { %681 = vst [vmem:[%s1407_s23 + $0xe8] sm:$0xff] %v649_v55 }
  0xe8   : > { %682 = vst [vmem:[%s1407_s23 + $0xf0] sm:$0xff] %v650_v59 }
  0xe9   : > { %683 = vst [vmem:[%s1407_s23 + $0xf8] sm:$0xff] %v651_v22 }
  0xea PF: > { %s12_s11 = sadd.s32 1, %s1010_s11   ;;  %s1501_s9 = smov %s1006_s10 }
  0xeb   : > { %p9_p5 = scmp.ge.s32.totalorder %s12_s11, 4   ;;  %s1502_s10 = smov %s1504_s12 }
  0xed   :  { %11 = sbr.rel (!%p9_p5) target bundleno = 2 (0x2), region = 61 }

// kernel: residual_block_forward.4
= control target key start
LH: loop header
LB: loop body
LE: loop exit
PB: predicated region body
PF: predicated region fallthrough
CT: control target
= control target key end

     0   :  { %s3704_s12 = smov 0   ;;  %s3706_s13 = smov 0   ;;  %s4562_s0 = inlined_call_operand.vmem [shape: bf16[2,16,16,128], index: 0, kind: input, shape index: {}]   ;;  %s4563_s1 = inlined_call_operand.vmem [shape: bf16[3,3,128,128], index: 1, kind: input, shape index: {}]   ;;  %s4564_s2 = inlined_call_operand.vmem [shape: f32[1,128], index: 2, kind: input, shape index: {}]   ;;  %s4565_s3 = inlined_call_operand.vmem [shape: bf16[512,128], index: 3, kind: output, shape index: {}]  }
   0x1   :  { %s3708_s14 = smov 0  }
   0x2 LB: > { %s25_s15 = sadd.s32 1, %s3677_s13  ;;  %p2847_p0 = scmp.ge.s32.totalorder %s3681_s14, 1  ;;  %s3681_s14 = sphi %s3708_s14, %s13_s14   ;;  %s3677_s13 = sphi %s3706_s13, %s4631_s13   ;;  %s3673_s12 = sphi %s3704_s12, %s4630_s12  }
   0x3   : > { %p27_p1 = scmp.ge.s32.totalorder %s25_s15, 2  ;;  %p117_p2 = scmp.lt.s32.totalorder %s3681_s14, 3 }
   0x5   : > { %s4633_s15 = smov (%p27_p1, %s25_s15), 0  ;;  %p118_p3 = pnand %p2847_p0, %p117_p2 }
   0x7   : > { %121 = sbr.rel (%p118_p3) target bundleno = 776 (0x308), region = 28 }
   0xc   : > { %s2848_s16 = sshll.u32 %s3673_s12, 5  ;;  %s3406_s17 = sshll.u32 %s3673_s12, 7 }
   0xd   : > { %p137_p4 = scmp.lt.s32.totalorder %s2848_s16, 63  ;;  %s3725_s20 = scalar_lea.vmem %s4562_s0, %s3406_s17 }
   0xe   : > { %v184_v0 = vld [vmem:[%s3725_s20] sm:$0xff]  ;;  %v186_v1 = vld [vmem:[%s3725_s20 + $0x8] sm:$0xff]  ;;  %v188_v2 = vld [vmem:[%s3725_s20 + $0x10] sm:$0xff] }
   0xf   : > { %s4635_s16 = smov (!%p137_p4, %s2848_s16), 63  ;;  %2852 = vst [vmem:[#allocation2 + $0x38] sm:$0xff] %v184_v0  ;;  %v190_v3 = vld [vmem:[%s3725_s20 + $0x18] sm:$0xff]  ;;  %v192_v4 = vld [vmem:[%s3725_s20 + $0x20] sm:$0xff]  ;;  %v194_v5 = vld [vmem:[%s3725_s20 + $0x28] sm:$0xff] }
  0x10   : > { %2853 = vst [vmem:[#allocation2 + $0x8] sm:$0xff] %v186_v1  ;;  %s2849_s21 = sshll.u32 %s4635_s16, 2  ;;  %v196_v6 = vld [vmem:[%s3725_s20 + $0x30] sm:$0xff]  ;;  %v198_v7 = vld [vmem:[%s3725_s20 + $0x38] sm:$0xff]  ;;  %v200_v8 = vld [vmem:[%s3725_s20 + $0x40] sm:$0xff] }
  0x11   : > { %2854 = vst [vmem:[#allocation2 + $0x60] sm:$0xff] %v188_v2  ;;  %s3736_s24 = scalar_lea.vmem %s4565_s3, %s2849_s21  ;;  %v202_v9 = vld [vmem:[%s3725_s20 + $0x48] sm:$0xff]  ;;  %v204_v10 = vld [vmem:[%s3725_s20 + $0x50] sm:$0xff]  ;;  %v206_v11 = vld [vmem:[%s3725_s20 + $0x58] sm:$0xff] }
  0x12   : > { %2855 = vst [vmem:[#allocation2 + $0x20] sm:$0xff] %v190_v3  ;;  %v208_v12 = vld [vmem:[%s3725_s20 + $0x60] sm:$0xff]  ;;  %v210_v13 = vld [vmem:[%s3725_s20 + $0x68] sm:$0xff]  ;;  %v212_v14 = vld [vmem:[%s3725_s20 + $0x70] sm:$0xff] }
  0x13   : > { %2856 = vst [vmem:[#allocation2 + $0x58] sm:$0xff] %v192_v4  ;;  %v214_v15 = vld [vmem:[%s3725_s20 + $0x78] sm:$0xff] }
  0x14   : > { %2857 = vst [vmem:[#allocation2 + $0x70] sm:$0xff] %v194_v5 }
  0x15   : > { %2858 = vst [vmem:[#allocation2 + $0x10] sm:$0xff] %v196_v6 }
  0x16   : > { %2859 = vst [vmem:[#allocation2 + $0x50] sm:$0xff] %v198_v7 }
  0x17   : > { %2860 = vst [vmem:[#allocation2 + $0x48] sm:$0xff] %v200_v8 }
  0x18   : > { %2861 = vst [vmem:[#allocation2 + $0x28] sm:$0xff] %v202_v9 }
  0x19   : > { %2862 = vst [vmem:[#allocation2 + $0x18] sm:$0xff] %v204_v10 }
  0x1a   : > { %2863 = vst [vmem:[#allocation2 + $0x40] sm:$0xff] %v206_v11 }
  0x1b   : > { %2864 = vst [vmem:[#allocation2 + $0x68] sm:$0xff] %v208_v12 }
  0x1c   : > { %2865 = vst [vmem:[#allocation2 + $0x78] sm:$0xff] %v210_v13 }
  0x1d   : > { %2866 = vst [vmem:[#allocation2 + $0x80] sm:$0xff] %v212_v14 }
  0x1e   : > { %2867 = vst [vmem:[#allocation2 + $0x30] sm:$0xff] %v214_v15 }
  0x1f   : > { %221 = vsyncadd [#allocation3], 2048 }
  0x20   : > { %3669 = dma.done.wait [#allocation3], 2048 }
  0x21   : > { %3670 = vsyncadd [#allocation3], 4294965248  ;;  %v3443_v16 = vld [vmem:[%s4563_s1 + $0x78] sm:$0xff]  ;;  %v3442_v17 = vld [vmem:[%s4563_s1 + $0x70] sm:$0xff]  ;;  %v3683_v24 = vmov 0   ;;  %vm819_vm0 = vcmask 1040384  }
  0x22   : > { %3595 = vmatpush.bf16.msra.mxu1 %v3443_v16  ;;  %3596 = vmatpush.bf16.msra.mxu2 %v3443_v16  ;;  %v3441_v18 = vld [vmem:[%s4563_s1 + $0x68] sm:$0xff]  ;;  %v3440_v19 = vld [vmem:[%s4563_s1 + $0x60] sm:$0xff]  ;;  %v3439_v20 = vld [vmem:[%s4563_s1 + $0x58] sm:$0xff]  ;;  %v621_v25 = vunpack.c.l.b16 %v3683_v24  ;;  %vm820_vm1 = vsmask.f32 256  ;;  %vm894_vm2 = vcmask 1047552  }
  0x23   : > { %3597 = vmatpush.bf16.msra.mxu3 %v3443_v16  ;;  %1012 = vmatpush.bf16.msra.mxu0 %v3443_v16  ;;  %v3438_v21 = vld [vmem:[%s4563_s1 + $0x50] sm:$0xff]  ;;  %v3437_v22 = vld [vmem:[%s4563_s1 + $0x48] sm:$0xff]  ;;  %v3436_v23 = vld [vmem:[%s4563_s1 + $0x40] sm:$0xff]  ;;  %vm895_vm3 = vsmask.f32 7424 }
  0x24   : > { %v3451_v26 = vld [vmem:[%s4563_s1 + $0xb8] sm:$0xff]  ;;  %v3778_v28 = vld [vmem:[#allocation2 + $0x20] sm:$0xff]  ;;  %v3780_v29 = vld [vmem:[#allocation2 + $0x50] sm:$0xff]  ;;  %v3784_v31 = vpack.c.b16 %v621_v25, %v621_v25 }
  0x25   : > { %v3459_v27 = vld [vmem:[%s4563_s1 + $0xf8] sm:$0xff]  ;;  %v3782_v30 = vld [vmem:[#allocation2 + $0x40] sm:$0xff]  ;;  %v3450_v34 = vld [vmem:[%s4563_s1 + $0xb0] sm:$0xff] }
  0x26   : > { %3598 = vmatpush.bf16.msra.mxu1 %v3442_v17  ;;  %3599 = vmatpush.bf16.msra.mxu2 %v3442_v17  ;;  %4579 = vst [vmem:[#allocation11_spill] sm:$0xff] %v3784_v31  ;;  %v3435_v32 = vld [vmem:[%s4563_s1 + $0x38] sm:$0xff]  ;;  %v3458_v35 = vld [vmem:[%s4563_s1 + $0xf0] sm:$0xff]  ;;  %v3449_v38 = vld [vmem:[%s4563_s1 + $0xa8] sm:$0xff]  ;;  %v676_v14 = vshrl.u32 %v3784_v31, 16  ;;  %v679_v15 = vshll.u32 %v3784_v31, 16 }
  0x27   : > { %3600 = vmatpush.bf16.msra.mxu3 %v3442_v17  ;;  %1013 = vmatpush.bf16.msra.mxu0 %v3442_v17  ;;  %v3467_v33 = vld [vmem:[%s4563_s1 + $0x138] sm:$0xff]  ;;  %v3434_v36 = vld [vmem:[%s4563_s1 + $0x30] sm:$0xff]  ;;  %v3457_v39 = vld [vmem:[%s4563_s1 + $0xe8] sm:$0xff] }
  0x28   : > { %v3466_v37 = vld [vmem:[%s4563_s1 + $0x130] sm:$0xff]  ;;  %v3433_v40 = vld [vmem:[%s4563_s1 + $0x28] sm:$0xff]  ;;  %v3448_v42 = vld [vmem:[%s4563_s1 + $0xa0] sm:$0xff]  ;;  %v678_v17 = vrot.slane %v676_v14, 7 }
  0x29   : > { %v3465_v41 = vld [vmem:[%s4563_s1 + $0x128] sm:$0xff]  ;;  %v3456_v43 = vld [vmem:[%s4563_s1 + $0xe0] sm:$0xff]  ;;  %v3447_v46 = vld [vmem:[%s4563_s1 + $0x98] sm:$0xff] }
  0x2a   : > { %3601 = vmatpush.bf16.msra.mxu1 %v3441_v18  ;;  %3602 = vmatpush.bf16.msra.mxu2 %v3441_v18  ;;  %v3432_v44 = vld [vmem:[%s4563_s1 + $0x20] sm:$0xff]  ;;  %v3455_v47 = vld [vmem:[%s4563_s1 + $0xd8] sm:$0xff]  ;;  %v3840_v49 = vld [vmem:[#allocation2 + $0x48] sm:$0xff] }
  0x2b   : > { %3603 = vmatpush.bf16.msra.mxu3 %v3441_v18  ;;  %1014 = vmatpush.bf16.msra.mxu0 %v3441_v18  ;;  %v3464_v45 = vld [vmem:[%s4563_s1 + $0x120] sm:$0xff]  ;;  %v3838_v48 = vld [vmem:[#allocation2 + $0x58] sm:$0xff]  ;;  %v3842_v50 = vld [vmem:[#allocation2 + $0x68] sm:$0xff]  ;;  %v840_v18 = vrot.slane %v679_v15, 1 }
  0x2c   : > { %v3844_v51 = vld [vmem:[#allocation2 + $0x38] sm:$0xff]  ;;  %v3446_v54 = vld [vmem:[%s4563_s1 + $0x90] sm:$0xff]  ;;  %v3445_v58 = vld [vmem:[%s4563_s1 + $0x88] sm:$0xff] }
  0x2d   : > { %v3431_v52 = vld [vmem:[%s4563_s1 + $0x18] sm:$0xff]  ;;  %v3454_v55 = vld [vmem:[%s4563_s1 + $0xd0] sm:$0xff]  ;;  %v3453_v59 = vld [vmem:[%s4563_s1 + $0xc8] sm:$0xff]  ;;  %v683_v16 = vshrl.u32 %v3844_v51, 16 }
  0x2e   : > { %3604 = vmatpush.bf16.msra.mxu1 %v3440_v19  ;;  %3605 = vmatpush.bf16.msra.mxu2 %v3440_v19  ;;  %v3463_v53 = vld [vmem:[%s4563_s1 + $0x118] sm:$0xff]  ;;  %v3430_v56 = vld [vmem:[%s4563_s1 + $0x10] sm:$0xff]  ;;  %v3429_v60 = vld [vmem:[%s4563_s1 + $0x8] sm:$0xff] }
  0x2f   : > { %3606 = vmatpush.bf16.msra.mxu3 %v3440_v19  ;;  %1015 = vmatpush.bf16.msra.mxu0 %v3440_v19  ;;  %v3462_v57 = vld [vmem:[%s4563_s1 + $0x110] sm:$0xff]  ;;  %v3461_v61 = vld [vmem:[%s4563_s1 + $0x108] sm:$0xff]  ;;  %v3444_v62 = vld [vmem:[%s4563_s1 + $0x80] sm:$0xff]  ;;  %v685_v19 = vrot.slane %v683_v16, 7 }
  0x30   : > { %v3452_v63 = vld [vmem:[%s4563_s1 + $0xc0] sm:$0xff]  ;;  %v3892_v2 = vld [vmem:[#allocation2 + $0x70] sm:$0xff]  ;;  %v3894_v3 = vld [vmem:[#allocation2 + $0x28] sm:$0xff] }
  0x31   : > { %v3428_v0 = vld [vmem:[%s4563_s1] sm:$0xff]  ;;  %v3896_v4 = vld [vmem:[#allocation2 + $0x78] sm:$0xff]  ;;  %v3898_v5 = vld [vmem:[#allocation2 + $0x8] sm:$0xff] }
  0x32   : > { %3607 = vmatpush.bf16.msra.mxu1 %v3439_v20  ;;  %3608 = vmatpush.bf16.msra.mxu2 %v3439_v20  ;;  %v3460_v1 = vld [vmem:[%s4563_s1 + $0x100] sm:$0xff]  ;;  %v3483_v6 = vld [vmem:[%s4563_s1 + $0x1b8] sm:$0xff]  ;;  %v3916_v10 = vld [vmem:[#allocation2 + $0x10] sm:$0xff] }
  0x33   : > { %3609 = vmatpush.bf16.msra.mxu3 %v3439_v20  ;;  %1016 = vmatpush.bf16.msra.mxu0 %v3439_v20  ;;  %v3491_v7 = vld [vmem:[%s4563_s1 + $0x1f8] sm:$0xff]  ;;  %v3920_v12 = vld [vmem:[#allocation2 + $0x80] sm:$0xff]  ;;  %v686_v20 = vshll.u32 %v3844_v51, 16  ;;  %vm3932_vm4 = vmand %vm819_vm0, %vm820_vm1 }
  0x34   : > { %v3475_v8 = vld [vmem:[%s4563_s1 + $0x178] sm:$0xff]  ;;  %v3922_v13 = vld [vmem:[#allocation2 + $0x60] sm:$0xff]  ;;  %vm3936_vm5 = vmand %vm894_vm2, %vm895_vm3 }
  0x35   : > { %v3499_v9 = vld [vmem:[%s4563_s1 + $0x238] sm:$0xff]  ;;  %v688_v25 = vor.u32 %v686_v20, %v685_v19 }
  0x36   : > { %3610 = vmatpush.bf16.msra.mxu1 %v3438_v21  ;;  %3611 = vmatpush.bf16.msra.mxu2 %v3438_v21  ;;  %v3918_v11 = vld [vmem:[#allocation2 + $0x18] sm:$0xff] }
  0x37   : > { %3612 = vmatpush.bf16.msra.mxu3 %v3438_v21  ;;  %1017 = vmatpush.bf16.msra.mxu0 %v3438_v21  ;;  %v681_v21 = vor.u32 %v679_v15, %v678_v17  ;;  %v714_v15 = vshll.u32 %v3838_v48, 16 }
  0x3a   : > { %3613 = vmatpush.bf16.msra.mxu1 %v3437_v22  ;;  %3614 = vmatpush.bf16.msra.mxu2 %v3437_v22 }
  0x3b   : > { %3615 = vmatpush.bf16.msra.mxu3 %v3437_v22  ;;  %1018 = vmatpush.bf16.msra.mxu0 %v3437_v22 }
  0x3e   : > { %3616 = vmatpush.bf16.msra.mxu1 %v3436_v23  ;;  %3617 = vmatpush.bf16.msra.mxu2 %v3436_v23 }
  0x3f   : > { %3618 = vmatpush.bf16.msra.mxu3 %v3436_v23  ;;  %1019 = vmatpush.bf16.msra.mxu0 %v3436_v23  ;;  %v841_v23 = vor.u32 %v840_v18, %v676_v14 }
  0x41   : > { %1040 = vmatmul.bf16.vlgmr.msra.gmra.mxu1 %v3778_v28  ;;  %1060 = vmatmul.bf16.vlgmr.msra.gmra.mxu2 %v3780_v29 }
  0x42   : > { %1303 = vmatpush.bf16.msrb.mxu2 %v3451_v26  ;;  %1080 = vmatmul.bf16.vlgmr.msra.gmra.mxu3 %v3782_v30  ;;  %v3942_v26 = vsel %vm3932_vm4, 0, %v681_v21 }
  0x43   : > { %1489 = vmatpush.bf16.msrb.mxu3 %v3459_v27  ;;  %1020 = vmatmul.bf16.vlgmr.msra.gmra.mxu0 %v3784_v31  ;;  %4584 = vst [vmem:[#allocation12_spill] sm:$0xff] %v3942_v26  ;;  %v3946_v27 = vsel %vm3936_vm5, %v841_v23, 0  ;;  %v3488_v23 = vld [vmem:[%s4563_s1 + $0x1e0] sm:$0xff] }
  0x44   : > { %1149 = vmatpush.bf16.msrb.mxu1 %v3435_v32  ;;  %1676 = vmatpush.bf16.msrb.mxu0 %v3467_v33  ;;  %4585 = vst [vmem:[#allocation13_spill] sm:$0xff] %v3946_v27  ;;  %v823_v32 = vsel %vm3932_vm4, 0, %v688_v25  ;;  %v3482_v33 = vld [vmem:[%s4563_s1 + $0x1b0] sm:$0xff]  ;;  %v718_v25 = vshrl.u32 %v3892_v2, 16 }
  0x46   : > { %1304 = vmatpush.bf16.msrb.mxu2 %v3450_v34  ;;  %v3490_v34 = vld [vmem:[%s4563_s1 + $0x1f0] sm:$0xff] }
  0x47   : > { %1490 = vmatpush.bf16.msrb.mxu3 %v3458_v35  ;;  %v3474_v35 = vld [vmem:[%s4563_s1 + $0x170] sm:$0xff] }
  0x48   : > { %1150 = vmatpush.bf16.msrb.mxu1 %v3434_v36  ;;  %1677 = vmatpush.bf16.msrb.mxu0 %v3466_v37  ;;  %v690_v36 = vshrl.u32 %v3898_v5, 16  ;;  %v3498_v37 = vld [vmem:[%s4563_s1 + $0x230] sm:$0xff] }
  0x4a   : > { %1305 = vmatpush.bf16.msrb.mxu2 %v3449_v38  ;;  %v842_v38 = vrot.slane %v686_v20, 1 }
  0x4b   : > { %1491 = vmatpush.bf16.msrb.mxu3 %v3457_v39  ;;  %v692_v39 = vrot.slane %v690_v36, 7 }
  0x4c   : > { %1151 = vmatpush.bf16.msrb.mxu1 %v3433_v40  ;;  %1678 = vmatpush.bf16.msrb.mxu0 %v3465_v41  ;;  %v693_v40 = vshll.u32 %v3898_v5, 16  ;;  %v843_v41 = vor.u32 %v842_v38, %v683_v16  ;;  %v721_v38 = vshll.u32 %v3892_v2, 16 }
  0x4e   : > { %1306 = vmatpush.bf16.msrb.mxu2 %v3448_v42  ;;  %v695_v42 = vor.u32 %v693_v40, %v692_v39  ;;  %v3496_v39 = vld [vmem:[%s4563_s1 + $0x220] sm:$0xff] }
  0x4f   : > { %1492 = vmatpush.bf16.msrb.mxu3 %v3456_v43  ;;  %v3969_v43 = vsel %vm3936_vm5, %v843_v41, 0 }
  0x50   : > { %1152 = vmatpush.bf16.msrb.mxu1 %v3432_v44  ;;  %1679 = vmatpush.bf16.msrb.mxu0 %v3464_v45  ;;  %v3973_v44 = vsel %vm3932_vm4, 0, %v695_v42  ;;  %v697_v45 = vshrl.u32 %v3922_v13, 16 }
  0x51   : > { %1045 = vmatmul.bf16.gmra.mxu1 %v3838_v48  ;;  %1065 = vmatmul.bf16.gmra.mxu2 %v3840_v49 }
  0x52   : > { %1307 = vmatpush.bf16.msrb.mxu2 %v3447_v46  ;;  %1085 = vmatmul.bf16.gmra.mxu3 %v3842_v50  ;;  %v844_v46 = vrot.slane %v693_v40, 1 }
  0x53   : > { %1493 = vmatpush.bf16.msrb.mxu3 %v3455_v47  ;;  %1025 = vmatmul.bf16.gmra.mxu0 %v3844_v51  ;;  %v699_v47 = vrot.slane %v697_v45, 7 }
  0x54   : > { %1153 = vmatpush.bf16.msrb.mxu1 %v3431_v52  ;;  %1680 = vmatpush.bf16.msrb.mxu0 %v3463_v53  ;;  %v845_v52 = vor.u32 %v844_v46, %v690_v36 }
  0x56   : > { %1308 = vmatpush.bf16.msrb.mxu2 %v3446_v54  ;;  %v3982_v54 = vsel %vm3936_vm5, %v845_v52, 0 }
  0x57   : > { %1494 = vmatpush.bf16.msrb.mxu3 %v3454_v55 }
  0x58   : > { %1154 = vmatpush.bf16.msrb.mxu1 %v3430_v56  ;;  %1681 = vmatpush.bf16.msrb.mxu0 %v3462_v57  ;;  %v3481_v56 = vld [vmem:[%s4563_s1 + $0x1a8] sm:$0xff] }
  0x59   : > { %v3489_v57 = vld [vmem:[%s4563_s1 + $0x1e8] sm:$0xff] }
  0x5a   : > { %1309 = vmatpush.bf16.msrb.mxu2 %v3445_v58  ;;  %v704_v58 = vshrl.u32 %v3778_v28, 16 }
  0x5b   : > { %1495 = vmatpush.bf16.msrb.mxu3 %v3453_v59  ;;  %v3473_v59 = vld [vmem:[%s4563_s1 + $0x168] sm:$0xff] }
  0x5c   : > { %1155 = vmatpush.bf16.msrb.mxu1 %v3429_v60  ;;  %1682 = vmatpush.bf16.msrb.mxu0 %v3461_v61  ;;  %v706_v61 = vrot.slane %v704_v58, 7 }
  0x5e   : > { %1310 = vmatpush.bf16.msrb.mxu2 %v3444_v62  ;;  %v707_v62 = vshll.u32 %v3778_v28, 16 }
  0x5f   : > { %1496 = vmatpush.bf16.msrb.mxu3 %v3452_v63  ;;  %v3497_v63 = vld [vmem:[%s4563_s1 + $0x228] sm:$0xff] }
  0x60   : > { %1156 = vmatpush.bf16.msrb.mxu1 %v3428_v0  ;;  %1683 = vmatpush.bf16.msrb.mxu0 %v3460_v1  ;;  %v709_v1 = vor.u32 %v707_v62, %v706_v61 }
  0x61   : > { %1050 = vmatmul.bf16.gmra.mxu1 %v3892_v2  ;;  %1070 = vmatmul.bf16.gmra.mxu2 %v3894_v3 }
  0x62   : > { %1090 = vmatmul.bf16.gmra.mxu3 %v3896_v4  ;;  %2048 = vmatpush.bf16.msra.mxu2 %v3483_v6 }
  0x63   : > { %1030 = vmatmul.bf16.gmra.mxu0 %v3898_v5  ;;  %2235 = vmatpush.bf16.msra.mxu3 %v3491_v7  ;;  %v4012_v7 = vsel %vm3932_vm4, 0, %v709_v1 }
  0x64   : > { %1862 = vmatpush.bf16.msra.mxu1 %v3475_v8  ;;  %2421 = vmatpush.bf16.msra.mxu0 %v3499_v9  ;;  %v711_v8 = vshrl.u32 %v3838_v48, 16  ;;  %v848_v9 = vrot.slane %v707_v62, 1  ;;  %v728_v62 = vshll.u32 %v3916_v10, 16 }
  0x66   : > { %2049 = vmatpush.bf16.msra.mxu2 %v3482_v33  ;;  %v713_v14 = vrot.slane %v711_v8, 7  ;;  %v849_v16 = vor.u32 %v848_v9, %v704_v58 }
  0x67   : > { %2236 = vmatpush.bf16.msra.mxu3 %v3490_v34 }
  0x68   : > { %1863 = vmatpush.bf16.msra.mxu1 %v3474_v35  ;;  %2422 = vmatpush.bf16.msra.mxu0 %v3498_v37  ;;  %v716_v17 = vor.u32 %v714_v15, %v713_v14  ;;  %v4024_v19 = vsel %vm3936_vm5, %v849_v16, 0  ;;  %v850_v35 = vrot.slane %v714_v15, 1  ;;  %v720_v37 = vrot.slane %v718_v25, 7  ;;  %v3479_v16 = vld [vmem:[%s4563_s1 + $0x198] sm:$0xff] }
  0x6a   : > { %2050 = vmatpush.bf16.msra.mxu2 %v3481_v56  ;;  %v4030_v21 = vsel %vm3932_vm4, 0, %v716_v17  ;;  %v851_v40 = vor.u32 %v850_v35, %v711_v8  ;;  %v723_v41 = vor.u32 %v721_v38, %v720_v37  ;;  %v3487_v17 = vld [vmem:[%s4563_s1 + $0x1d8] sm:$0xff]  ;;  %v854_v35 = vrot.slane %v728_v62, 1 }
  0x6b   : > { %2237 = vmatpush.bf16.msra.mxu3 %v3489_v57 }
  0x6c   : > { %1864 = vmatpush.bf16.msra.mxu1 %v3473_v59  ;;  %2423 = vmatpush.bf16.msra.mxu0 %v3497_v63  ;;  %v4072_v52 = vsel %vm3932_vm4, 0, %v723_v41  ;;  %v852_v59 = vrot.slane %v721_v38, 1  ;;  %v735_v38 = vshll.u32 %v3780_v29, 16 }
  0x6d   : > { %4588 = vst [vmem:[#allocation16_spill] sm:$0xff] %v4072_v52 }
  0x6e   : > { %v853_v63 = vor.u32 %v852_v59, %v718_v25 }
  0x6f   : > { %2238 = vmatpush.bf16.msra.mxu3 %v3488_v23 }
  0x70   : > { %2424 = vmatpush.bf16.msra.mxu0 %v3496_v39  ;;  %v4096_v9 = vsel %vm3936_vm5, %v853_v63, 0  ;;  %v3471_v39 = vld [vmem:[%s4563_s1 + $0x158] sm:$0xff] }
  0x71   : > { %1055 = vmatmul.bf16.gmra.mxu1 %v3916_v10  ;;  %1075 = vmatmul.bf16.gmra.mxu2 %v3918_v11  ;;  %4591 = vst [vmem:[#allocation19_spill] sm:$0xff] %v4096_v9 }
  0x72   : > { %1095 = vmatmul.bf16.gmra.mxu3 %v3920_v12 }
  0x73   : > { %1035 = vmatmul.bf16.gmra.mxu0 %v3922_v13  ;;  %2239 = vmatpush.bf16.msra.mxu3 %v3487_v17 }
  0x81   : > { %1157 = vmatmul.bf16.vlgmr.msrb.gmra.mxu1 %v3942_v26  ;;  %1311 = vmatmul.bf16.vlgmr.msrb.gmra.mxu2 %v3946_v27  ;;  %v742_v27 = vshll.u32 %v3840_v49, 16 }
  0x82   : > { %1497 = vmatmul.bf16.vlgmr.msrb.gmra.mxu3 %v823_v32 }
  0x83   : > { %1684 = vmatmul.bf16.vlgmr.msrb.gmra.mxu0 %v3844_v51  ;;  %v700_v51 = vshll.u32 %v3922_v13, 16 }
  0x85   : > { %v702_v53 = vor.u32 %v700_v51, %v699_v47  ;;  %v846_v60 = vrot.slane %v700_v51, 1  ;;  %v4066_v47 = vsel %vm3936_vm5, %v851_v40, 0  ;;  %v3495_v40 = vld [vmem:[%s4563_s1 + $0x218] sm:$0xff] }
  0x86   : > { %2425 = vmatpush.bf16.msra.mxu0 %v3495_v40  ;;  %v856_v40 = vrot.slane %v735_v38, 1 }
  0x87   : > { %v3986_v55 = vsel %vm3932_vm4, 0, %v702_v53  ;;  %v847_v0 = vor.u32 %v846_v60, %v697_v45  ;;  %v725_v53 = vshrl.u32 %v3916_v10, 16 }
  0x89   : > { %v4008_v6 = vsel %vm3936_vm5, %v847_v0, 0  ;;  %v727_v61 = vrot.slane %v725_v53, 7  ;;  %v855_v41 = vor.u32 %v854_v35, %v725_v53  ;;  %v739_v53 = vshrl.u32 %v3840_v49, 16 }
  0x8b   : > { %v730_v0 = vor.u32 %v728_v62, %v727_v61 }
  0x8d   : > { %v4102_v15 = vsel %vm3932_vm4, 0, %v730_v0  ;;  %v4138_v0 = vsel %vm3936_vm5, %v855_v41, 0 }
  0x8e   : > { %4592 = vst [vmem:[#allocation20_spill] sm:$0xff] %v4102_v15 }
  0x8f   : > { %4595 = vst [vmem:[#allocation23_spill] sm:$0xff] %v4138_v0 }
  0x91   : > { %1162 = vmatmul.bf16.gmra.mxu1 %v823_v32  ;;  %1316 = vmatmul.bf16.gmra.mxu2 %v3969_v43 }
  0x92   : > { %1502 = vmatmul.bf16.gmra.mxu3 %v3973_v44 }
  0x93   : > { %1689 = vmatmul.bf16.gmra.mxu0 %v3898_v5 }
  0xa1   : > { %1167 = vmatmul.bf16.gmra.mxu1 %v3973_v44  ;;  %1321 = vmatmul.bf16.gmra.mxu2 %v3982_v54 }
  0xa2   : > { %1507 = vmatmul.bf16.gmra.mxu3 %v3986_v55 }
  0xa3   : > { %1694 = vmatmul.bf16.gmra.mxu0 %v3922_v13 }
  0xb1   : > { %1172 = vmatmul.bf16.gmra.mxu1 %v3986_v55  ;;  %1326 = vmatmul.bf16.gmra.mxu2 %v4008_v6 }
  0xb2   : > { %1512 = vmatmul.bf16.gmra.mxu3 %v4012_v7 }
  0xb3   : > { %1699 = vmatmul.bf16.gmra.mxu0 %v3778_v28  ;;  %v3480_v28 = vld [vmem:[%s4563_s1 + $0x1a0] sm:$0xff] }
  0xb4   : > { %2051 = vmatpush.bf16.msra.mxu2 %v3480_v28  ;;  %v732_v28 = vshrl.u32 %v3780_v29, 16 }
  0xb6   : > { %v734_v37 = vrot.slane %v732_v28, 7  ;;  %v857_v31 = vor.u32 %v856_v40, %v732_v28  ;;  %v746_v28 = vshrl.u32 %v3894_v3, 16 }
  0xb8   : > { %2052 = vmatpush.bf16.msra.mxu2 %v3479_v16  ;;  %v737_v59 = vor.u32 %v735_v38, %v734_v37 }
  0xba   : > { %v4144_v17 = vsel %vm3932_vm4, 0, %v737_v59  ;;  %v741_v59 = vrot.slane %v739_v53, 7 }
  0xbb   : > { %4596 = vst [vmem:[#allocation24_spill] sm:$0xff] %v4144_v17 }
  0xbc   : > { %v744_v26 = vor.u32 %v742_v27, %v741_v59 }
  0xbe   : > { %v4020_v18 = vpop.f32.mrf.mxu1  ;;  %v4171_v38 = vsel %vm3932_vm4, 0, %v744_v26 }
  0xc0   : > { %v4026_v20 = vpop.f32.mrf.mxu0 }
  0xc1   : > { %1177 = vmatmul.bf16.gmra.mxu1 %v4012_v7  ;;  %1331 = vmatmul.bf16.gmra.mxu2 %v4024_v19 }
  0xc2   : > { %1517 = vmatmul.bf16.gmra.mxu3 %v4030_v21 }
  0xc3   : > { %1704 = vmatmul.bf16.gmra.mxu0 %v3838_v48  ;;  %v3472_v48 = vld [vmem:[%s4563_s1 + $0x160] sm:$0xff] }
  0xc4   : > { %v4043_v32 = vpop.f32.mrf.mxu2  ;;  %1865 = vmatpush.bf16.msra.mxu1 %v3472_v48 }
  0xc5   : > { %v4045_v33 = vpop.f32.mrf.mxu3 }
  0xc6   : > { %4586 = vst [vmem:[#allocation14_spill] sm:$0xff] %v4045_v33  ;;  %v4050_v34 = vpop.f32.mrf.mxu1 }
  0xc8   : > { %v4052_v36 = vpop.f32.mrf.mxu0  ;;  %1866 = vmatpush.bf16.msra.mxu1 %v3471_v39 }
  0xcc   : > { %v4058_v42 = vpop.f32.mrf.mxu2 }
  0xcd   : > { %v4060_v45 = vpop.f32.mrf.mxu3 }
  0xce   : > { %4587 = vst [vmem:[#allocation15_spill] sm:$0xff] %v4060_v45  ;;  %v4062_v46 = vpop.f32.mrf.mxu1  ;;  %v3470_v45 = vld [vmem:[%s4563_s1 + $0x150] sm:$0xff] }
  0xcf   : > { %1867 = vmatpush.bf16.msra.mxu1 %v3470_v45 }
  0xd0   : > { %v4068_v51 = vpop.f32.mrf.mxu0 }
  0xd1   : > { %1182 = vmatmul.bf16.gmra.mxu1 %v4030_v21  ;;  %1336 = vmatmul.bf16.gmra.mxu2 %v4066_v47 }
  0xd2   : > { %1522 = vmatmul.bf16.gmra.mxu3 %v4072_v52 }
  0xd3   : > { %1709 = vmatmul.bf16.gmra.mxu0 %v3892_v2 }
  0xd4   : > { %v4079_v56 = vpop.f32.mrf.mxu2 }
  0xd5   : > { %v4081_v57 = vpop.f32.mrf.mxu3 }
  0xd6   : > { %4589 = vst [vmem:[#allocation17_spill] sm:$0xff] %v4081_v57  ;;  %v4083_v58 = vpop.f32.mrf.mxu1 }
  0xd8   : > { %v4085_v60 = vpop.f32.mrf.mxu0 }
  0xdc   : > { %v4088_v1 = vpop.f32.mrf.mxu2 }
  0xdd   : > { %v4090_v8 = vpop.f32.mrf.mxu3 }
  0xde   : > { %4590 = vst [vmem:[#allocation18_spill] sm:$0xff] %v4090_v8  ;;  %v4092_v2 = vpop.f32.mrf.mxu1  ;;  %v4166_v8 = vsel %vm3936_vm5, %v857_v31, 0  ;;  %v3478_v31 = vld [vmem:[%s4563_s1 + $0x190] sm:$0xff] }
  0xdf   : > { %4599 = vst [vmem:[#allocation27_spill] sm:$0xff] %v4166_v8  ;;  %2053 = vmatpush.bf16.msra.mxu2 %v3478_v31  ;;  %v3494_v31 = vld [vmem:[%s4563_s1 + $0x210] sm:$0xff] }
  0xe0   : > { %v4098_v14 = vpop.f32.mrf.mxu0  ;;  %2426 = vmatpush.bf16.msra.mxu0 %v3494_v31 }
  0xe1   : > { %1187 = vmatmul.bf16.gmra.mxu1 %v4072_v52  ;;  %1341 = vmatmul.bf16.gmra.mxu2 %v4096_v9 }
  0xe2   : > { %1527 = vmatmul.bf16.gmra.mxu3 %v4102_v15 }
  0xe3   : > { %1714 = vmatmul.bf16.gmra.mxu0 %v3916_v10 }
  0xe4   : > { %v4115_v23 = vpop.f32.mrf.mxu2 }
  0xe5   : > { %v4117_v25 = vpop.f32.mrf.mxu3 }
  0xe6   : > { %4593 = vst [vmem:[#allocation21_spill] sm:$0xff] %v4117_v25  ;;  %v4119_v48 = vpop.f32.mrf.mxu1 }
  0xe8   : > { %v4121_v10 = vpop.f32.mrf.mxu0 }
  0xec   : > { %v4130_v61 = vpop.f32.mrf.mxu2 }
  0xed   : > { %v4132_v62 = vpop.f32.mrf.mxu3 }
  0xee   : > { %4594 = vst [vmem:[#allocation22_spill] sm:$0xff] %v4132_v62  ;;  %v4134_v63 = vpop.f32.mrf.mxu1 }
  0xf0   : > { %v4140_v16 = vpop.f32.mrf.mxu0 }
  0xf1   : > { %1192 = vmatmul.bf16.gmra.mxu1 %v4102_v15  ;;  %1346 = vmatmul.bf16.gmra.mxu2 %v4138_v0  ;;  %v748_v0 = vrot.slane %v746_v28, 7  ;;  %v749_v15 = vshll.u32 %v3894_v3, 16 }
  0xf2   : > { %1532 = vmatmul.bf16.gmra.mxu3 %v4144_v17 }
  0xf3   : > { %1719 = vmatmul.bf16.gmra.mxu0 %v3780_v29 }
  0xf4   : > { %v4151_v35 = vpop.f32.mrf.mxu2 }
  0xf5   : > { %v4153_v37 = vpop.f32.mrf.mxu3 }
  0xf6   : > { %4597 = vst [vmem:[#allocation25_spill] sm:$0xff] %v4153_v37  ;;  %v4155_v39 = vpop.f32.mrf.mxu1 }
  0xf8   : > { %v4157_v41 = vpop.f32.mrf.mxu0 }
  0xfc   : > { %v4160_v62 = vpop.f32.mrf.mxu2 }
  0xfd   : > { %v4162_v25 = vpop.f32.mrf.mxu3 }
  0xfe   : > { %4598 = vst [vmem:[#allocation26_spill] sm:$0xff] %v4162_v25  ;;  %v1158_v29 = vpop.f32.mrf.mxu1  ;;  %v858_v25 = vrot.slane %v742_v27, 1 }
  0xff   : > { %v1159_v37 = vadd.f32 %v1158_v29, %v4026_v20  ;;  %v3486_v20 = vld [vmem:[%s4563_s1 + $0x1d0] sm:$0xff] }
 0x100   : > { %v1685_v57 = vpop.f32.mrf.mxu0  ;;  %2240 = vmatpush.bf16.msra.mxu3 %v3486_v20  ;;  %v859_v27 = vor.u32 %v858_v25, %v739_v53  ;;  %v751_v20 = vor.u32 %v749_v15, %v748_v0 }
 0x101   : > { %1197 = vmatmul.bf16.gmra.mxu1 %v4144_v17  ;;  %1351 = vmatmul.bf16.gmra.mxu2 %v4166_v8 }
 0x102   : > { %1537 = vmatmul.bf16.gmra.mxu3 %v4171_v38  ;;  %v4201_v45 = vsel %vm3932_vm4, 0, %v751_v20 }
 0x103   : > { %1724 = vmatmul.bf16.gmra.mxu0 %v3840_v49 }
 0x104   : > { %v1312_v26 = vpop.f32.mrf.mxu2 }
 0x105   : > { %v1392_v40 = vadd.f32 %v1312_v26, %v1159_v37  ;;  %v1498_v59 = vpop.f32.mrf.mxu3 }
 0x106   : > { %v1160_v29 = vpop.f32.mrf.mxu1 }
 0x107   : > { %v1578_v8 = vadd.f32 %v1498_v59, %v1392_v40  ;;  %v1161_v49 = vadd.f32 %v1160_v29, %v4052_v36  ;;  %v4196_v29 = vsel %vm3936_vm5, %v859_v27, 0 }
 0x108   : > { %v1687_v17 = vpop.f32.mrf.mxu0 }
 0x109   : > { %v4192_v37 = vadd.f32 %v1685_v57, %v1578_v8  ;;  %v753_v8 = vshrl.u32 %v3918_v11, 16 }
 0x10b   : > { %4600 = vst [vmem:[#allocation28_spill] sm:$0xff] %v4192_v37 }
 0x10c   : > { %v1314_v26 = vpop.f32.mrf.mxu2 }
 0x10d   : > { %v1393_v36 = vadd.f32 %v1314_v26, %v1161_v49  ;;  %v1500_v40 = vpop.f32.mrf.mxu3  ;;  %v860_v49 = vrot.slane %v749_v15, 1  ;;  %v755_v26 = vrot.slane %v753_v8, 7 }
 0x10e   : > { %v1163_v59 = vpop.f32.mrf.mxu1 }
 0x10f   : > { %v1579_v33 = vadd.f32 %v1500_v40, %v1393_v36  ;;  %v1164_v9 = vadd.f32 %v1163_v59, %v4068_v51  ;;  %v756_v36 = vshll.u32 %v3918_v11, 16 }
 0x110   : > { %v1690_v52 = vpop.f32.mrf.mxu0 }
 0x111   : > { %1202 = vmatmul.bf16.gmra.mxu1 %v4171_v38  ;;  %1356 = vmatmul.bf16.gmra.mxu2 %v4196_v29  ;;  %v4205_v57 = vadd.f32 %v1687_v17, %v1579_v33  ;;  %v861_v17 = vor.u32 %v860_v49, %v746_v28  ;;  %v758_v40 = vor.u32 %v756_v36, %v755_v26  ;;  %v3477_v28 = vld [vmem:[%s4563_s1 + $0x188] sm:$0xff] }
 0x112   : > { %1542 = vmatmul.bf16.gmra.mxu3 %v4201_v45  ;;  %2054 = vmatpush.bf16.msra.mxu2 %v3477_v28 }
 0x113   : > { %4601 = vst [vmem:[#allocation29_spill] sm:$0xff] %v4205_v57  ;;  %1729 = vmatmul.bf16.gmra.mxu0 %v3894_v3 }
 0x114   : > { %v1317_v25 = vpop.f32.mrf.mxu2 }
 0x115   : > { %v1394_v0 = vadd.f32 %v1317_v25, %v1164_v9  ;;  %v1503_v51 = vpop.f32.mrf.mxu3  ;;  %v4216_v9 = vsel %vm3936_vm5, %v861_v17, 0  ;;  %v763_v17 = vshll.u32 %v3782_v30, 16 }
 0x116   : > { %v1165_v53 = vpop.f32.mrf.mxu1 }
 0x117   : > { %v1580_v31 = vadd.f32 %v1503_v51, %v1394_v0  ;;  %v1166_v27 = vadd.f32 %v1165_v53, %v4085_v60  ;;  %v4221_v0 = vsel %vm3932_vm4, 0, %v758_v40  ;;  %v3469_v40 = vld [vmem:[%s4563_s1 + $0x148] sm:$0xff] }
 0x118   : > { %v1692_v20 = vpop.f32.mrf.mxu0  ;;  %1868 = vmatpush.bf16.msra.mxu1 %v3469_v40 }
 0x119   : > { %v4212_v33 = vadd.f32 %v1690_v52, %v1580_v31  ;;  %v862_v31 = vrot.slane %v756_v36, 1 }
 0x11b   : > { %v863_v36 = vor.u32 %v862_v31, %v753_v8 }
 0x11c   : > { %v1319_v59 = vpop.f32.mrf.mxu2 }
 0x11d   : > { %v1395_v3 = vadd.f32 %v1319_v59, %v1166_v27  ;;  %v1505_v57 = vpop.f32.mrf.mxu3  ;;  %v3493_v59 = vld [vmem:[%s4563_s1 + $0x208] sm:$0xff] }
 0x11e   : > { %v1168_v37 = vpop.f32.mrf.mxu1  ;;  %2427 = vmatpush.bf16.msra.mxu0 %v3493_v59 }
 0x11f   : > { %v1581_v15 = vadd.f32 %v1505_v57, %v1395_v3  ;;  %v1169_v25 = vadd.f32 %v1168_v37, %v4098_v14  ;;  %v3485_v14 = vld [vmem:[%s4563_s1 + $0x1c8] sm:$0xff]  ;;  %v760_v37 = vshrl.u32 %v3782_v30, 16 }
 0x120   : > { %v1695_v60 = vpop.f32.mrf.mxu0  ;;  %2241 = vmatpush.bf16.msra.mxu3 %v3485_v14 }
 0x121   : > { %1207 = vmatmul.bf16.gmra.mxu1 %v4201_v45  ;;  %1361 = vmatmul.bf16.gmra.mxu2 %v4216_v9  ;;  %v4225_v52 = vadd.f32 %v1692_v20, %v1581_v15  ;;  %v762_v26 = vrot.slane %v760_v37, 7 }
 0x122   : > { %1547 = vmatmul.bf16.gmra.mxu3 %v4221_v0 }
 0x123   : > { %1734 = vmatmul.bf16.gmra.mxu0 %v3918_v11  ;;  %v765_v15 = vor.u32 %v763_v17, %v762_v26  ;;  %v864_v26 = vrot.slane %v763_v17, 1 }
 0x124   : > { %v1322_v57 = vpop.f32.mrf.mxu2 }
 0x125   : > { %v1396_v51 = vadd.f32 %v1322_v57, %v1169_v25  ;;  %v1508_v53 = vpop.f32.mrf.mxu3  ;;  %v4248_v57 = vsel %vm3936_vm5, %v863_v36, 0  ;;  %v4253_v40 = vsel %vm3932_vm4, 0, %v765_v15 }
 0x126   : > { %v1170_v49 = vpop.f32.mrf.mxu1 }
 0x127   : > { %v1582_v27 = vadd.f32 %v1508_v53, %v1396_v51  ;;  %v1171_v11 = vadd.f32 %v1170_v49, %v4121_v10 }
 0x128   : > { %v1697_v20 = vpop.f32.mrf.mxu0 }
 0x129   : > { %v4244_v3 = vadd.f32 %v1695_v60, %v1582_v27  ;;  %v767_v60 = vshrl.u32 %v3842_v50, 16 }
 0x12b   : > { %4602 = vst [vmem:[#allocation30_spill] sm:$0xff] %v4244_v3 }
 0x12c   : > { %v1324_v25 = vpop.f32.mrf.mxu2 }
 0x12d   : > { %v1397_v10 = vadd.f32 %v1324_v25, %v1171_v11  ;;  %v1510_v28 = vpop.f32.mrf.mxu3  ;;  %v769_v25 = vrot.slane %v767_v60, 7 }
 0x12e   : > { %v1173_v14 = vpop.f32.mrf.mxu1 }
 0x12f   : > { %v1583_v51 = vadd.f32 %v1510_v28, %v1397_v10  ;;  %v1174_v53 = vadd.f32 %v1173_v14, %v4140_v16  ;;  %v770_v10 = vshll.u32 %v3842_v50, 16  ;;  %v865_v28 = vor.u32 %v864_v26, %v760_v37 }
 0x130   : > { %v1700_v49 = vpop.f32.mrf.mxu0 }
 0x131   : > { %1212 = vmatmul.bf16.gmra.mxu1 %v4221_v0  ;;  %1366 = vmatmul.bf16.gmra.mxu2 %v4248_v57  ;;  %v4257_v8 = vadd.f32 %v1697_v20, %v1583_v51  ;;  %v772_v14 = vor.u32 %v770_v10, %v769_v25 }
 0x132   : > { %1552 = vmatmul.bf16.gmra.mxu3 %v4253_v40 }
 0x133   : > { %4603 = vst [vmem:[#allocation31_spill] sm:$0xff] %v4257_v8  ;;  %1739 = vmatmul.bf16.gmra.mxu0 %v3782_v30 }
 0x134   : > { %v1327_v31 = vpop.f32.mrf.mxu2 }
 0x135   : > { %v1398_v27 = vadd.f32 %v1327_v31, %v1174_v53  ;;  %v1513_v16 = vpop.f32.mrf.mxu3  ;;  %v4268_v53 = vsel %vm3936_vm5, %v865_v28, 0 }
 0x136   : > { %v1175_v11 = vpop.f32.mrf.mxu1 }
 0x137   : > { %v1584_v59 = vadd.f32 %v1513_v16, %v1398_v27  ;;  %v1176_v36 = vadd.f32 %v1175_v11, %v4157_v41  ;;  %v4272_v41 = vsel %vm3932_vm4, 0, %v772_v14  ;;  %v774_v16 = vshrl.u32 %v3896_v4, 16 }
 0x138   : > { %v1702_v15 = vpop.f32.mrf.mxu0  ;;  %v777_v14 = vshll.u32 %v3896_v4, 16 }
 0x139   : > { %v4264_v20 = vadd.f32 %v1700_v49, %v1584_v59  ;;  %v3476_v49 = vld [vmem:[%s4563_s1 + $0x180] sm:$0xff]  ;;  %v776_v28 = vrot.slane %v774_v16, 7 }
 0x13a   : > { %2055 = vmatpush.bf16.msra.mxu2 %v3476_v49 }
 0x13c   : > { %v1329_v51 = vpop.f32.mrf.mxu2 }
 0x13d   : > { %v1399_v30 = vadd.f32 %v1329_v51, %v1176_v36  ;;  %v1515_v8 = vpop.f32.mrf.mxu3  ;;  %v3468_v51 = vld [vmem:[%s4563_s1 + $0x140] sm:$0xff] }
 0x13e   : > { %v1178_v3 = vpop.f32.mrf.mxu1  ;;  %1869 = vmatpush.bf16.msra.mxu1 %v3468_v51 }
 0x13f   : > { %v1585_v17 = vadd.f32 %v1515_v8, %v1399_v30  ;;  %v3484_v8 = vld [vmem:[%s4563_s1 + $0x1c0] sm:$0xff]  ;;  %v1179_v27 = vadd.f32 %v1178_v3, %v4020_v18 }
 0x140   : > { %v1705_v31 = vpop.f32.mrf.mxu0  ;;  %2242 = vmatpush.bf16.msra.mxu3 %v3484_v8  ;;  %v3492_v18 = vld [vmem:[%s4563_s1 + $0x200] sm:$0xff] }
 0x141   : > { %1217 = vmatmul.bf16.gmra.mxu1 %v4253_v40  ;;  %1371 = vmatmul.bf16.gmra.mxu2 %v4268_v53  ;;  %v4276_v37 = vadd.f32 %v1702_v15, %v1585_v17  ;;  %v866_v15 = vrot.slane %v770_v10, 1  ;;  %v779_v17 = vor.u32 %v777_v14, %v776_v28 }
 0x142   : > { %1557 = vmatmul.bf16.gmra.mxu3 %v4272_v41  ;;  %2428 = vmatpush.bf16.msra.mxu0 %v3492_v18  ;;  %v868_v18 = vrot.slane %v777_v14, 1 }
 0x143   : > { %4604 = vst [vmem:[#allocation32_spill] sm:$0xff] %v4276_v37  ;;  %1744 = vmatmul.bf16.gmra.mxu0 %v3842_v50  ;;  %v867_v30 = vor.u32 %v866_v15, %v767_v60  ;;  %v4304_v51 = vsel %vm3932_vm4, 0, %v779_v17 }
 0x144   : > { %v1332_v11 = vpop.f32.mrf.mxu2 }
 0x145   : > { %v1400_v26 = vadd.f32 %v1332_v11, %v1179_v27  ;;  %v1518_v59 = vpop.f32.mrf.mxu3 }
 0x146   : > { %v1180_v36 = vpop.f32.mrf.mxu1 }
 0x147   : > { %v1586_v50 = vadd.f32 %v1518_v59, %v1400_v26  ;;  %v1181_v10 = vadd.f32 %v1180_v36, %v4050_v34  ;;  %v4300_v26 = vsel %vm3936_vm5, %v867_v30, 0 }
 0x148   : > { %v1707_v25 = vpop.f32.mrf.mxu0 }
 0x149   : > { %v4295_v3 = vadd.f32 %v1705_v31, %v1586_v50  ;;  %v781_v31 = vshrl.u32 %v3920_v12, 16 }
 0x14b   : > { %v783_v17 = vrot.slane %v781_v31, 7 }
 0x14c   : > { %v1334_v49 = vpop.f32.mrf.mxu2 }
 0x14d   : > { %v1401_v8 = vadd.f32 %v1334_v49, %v1181_v10  ;;  %v1520_v27 = vpop.f32.mrf.mxu3  ;;  %v784_v49 = vshll.u32 %v3920_v12, 16 }
 0x14e   : > { %v1183_v11 = vpop.f32.mrf.mxu1 }
 0x14f   : > { %v1587_v59 = vadd.f32 %v1520_v27, %v1401_v8  ;;  %v1184_v60 = vadd.f32 %v1183_v11, %v4062_v46  ;;  %v869_v8 = vor.u32 %v868_v18, %v774_v16 }
 0x150   : > { %v1710_v37 = vpop.f32.mrf.mxu0 }
 0x151   : > { %1222 = vmatmul.bf16.gmra.mxu1 %v4272_v41  ;;  %1376 = vmatmul.bf16.gmra.mxu2 %v4300_v26  ;;  %v4308_v34 = vadd.f32 %v1707_v25, %v1587_v59 }
 0x152   : > { %1562 = vmatmul.bf16.gmra.mxu3 %v4304_v51 }
 0x153   : > { %4605 = vst [vmem:[#allocation33_spill] sm:$0xff] %v4308_v34  ;;  %1749 = vmatmul.bf16.gmra.mxu0 %v3896_v4  ;;  %v786_v4 = vor.u32 %v784_v49, %v783_v17 }
 0x154   : > { %v1337_v36 = vpop.f32.mrf.mxu2 }
 0x155   : > { %v1402_v15 = vadd.f32 %v1337_v36, %v1184_v60  ;;  %v1523_v50 = vpop.f32.mrf.mxu3  ;;  %v4320_v60 = vsel %vm3936_vm5, %v869_v8, 0  ;;  %v870_v8 = vrot.slane %v784_v49, 1 }
 0x156   : > { %v1185_v28 = vpop.f32.mrf.mxu1 }
 0x157   : > { %v1588_v30 = vadd.f32 %v1523_v50, %v1402_v15  ;;  %v1186_v27 = vadd.f32 %v1185_v28, %v4083_v58  ;;  %v4324_v15 = vsel %vm3932_vm4, 0, %v786_v4 }
 0x158   : > { %v1712_v10 = vpop.f32.mrf.mxu0 }
 0x159   : > { %v4315_v25 = vadd.f32 %v1710_v37, %v1588_v30  ;;  %v4326_v37 = vld [vmem:[#allocation2 + $0x30] sm:$0xff] }
 0x15a   : > { %v4578_v50 = vshrl.u32 %v4326_v37, 16 }
 0x15c   : > { %v1339_v59 = vpop.f32.mrf.mxu2 }
 0x15d   : > { %v1403_v46 = vadd.f32 %v1339_v59, %v1186_v27  ;;  %v1525_v11 = vpop.f32.mrf.mxu3  ;;  %v790_v59 = vrot.slane %v4578_v50, 7 }
 0x15e   : > { %v1188_v34 = vpop.f32.mrf.mxu1 }
 0x15f   : > { %v1589_v14 = vadd.f32 %v1525_v11, %v1403_v46  ;;  %v1189_v16 = vadd.f32 %v1188_v34, %v4092_v2  ;;  %v871_v11 = vor.u32 %v870_v8, %v781_v31 }
 0x160   : > { %v1715_v36 = vpop.f32.mrf.mxu0 }
 0x161   : > { %1227 = vmatmul.bf16.gmra.mxu1 %v4304_v51  ;;  %1381 = vmatmul.bf16.gmra.mxu2 %v4320_v60  ;;  %v4330_v58 = vadd.f32 %v1712_v10, %v1589_v14  ;;  %v791_v10 = vshll.u32 %v4326_v37, 16  ;;  %v4346_v49 = vsel %vm3936_vm5, %v871_v11, 0 }
 0x162   : > { %1567 = vmatmul.bf16.gmra.mxu3 %v4324_v15 }
 0x163   : > { %1754 = vmatmul.bf16.gmra.mxu0 %v3920_v12  ;;  %v793_v2 = vor.u32 %v791_v10, %v790_v59 }
 0x164   : > { %v1342_v28 = vpop.f32.mrf.mxu2 }
 0x165   : > { %v1404_v18 = vadd.f32 %v1342_v28, %v1189_v16  ;;  %v1528_v30 = vpop.f32.mrf.mxu3 }
 0x166   : > { %v1190_v17 = vpop.f32.mrf.mxu1 }
 0x167   : > { %v1590_v27 = vadd.f32 %v1528_v30, %v1404_v18  ;;  %v1191_v12 = vadd.f32 %v1190_v17, %v4119_v48 }
 0x168   : > { %v1717_v4 = vpop.f32.mrf.mxu0 }
 0x169   : > { %v4339_v46 = vadd.f32 %v1715_v36, %v1590_v27  ;;  %v4350_v36 = vsel %vm3932_vm4, 0, %v793_v2 }
 0x16c   : > { %v1344_v34 = vpop.f32.mrf.mxu2 }
 0x16d   : > { %v1405_v14 = vadd.f32 %v1344_v34, %v1191_v12  ;;  %v1530_v16 = vpop.f32.mrf.mxu3 }
 0x16e   : > { %v1193_v28 = vpop.f32.mrf.mxu1 }
 0x16f   : > { %v1591_v18 = vadd.f32 %v1530_v16, %v1405_v14  ;;  %v1194_v31 = vadd.f32 %v1193_v28, %v4134_v63 }
 0x170   : > { %v1720_v30 = vpop.f32.mrf.mxu0 }
 0x171   : > { %1232 = vmatmul.bf16.gmra.mxu1 %v4324_v15  ;;  %1386 = vmatmul.bf16.gmra.mxu2 %v4346_v49  ;;  %v4354_v48 = vadd.f32 %v1717_v4, %v1591_v18 }
 0x172   : > { %1572 = vmatmul.bf16.gmra.mxu3 %v4350_v36 }
 0x173   : > { %1759 = vmatmul.bf16.gmra.mxu0 %v4326_v37 }
 0x174   : > { %v1347_v17 = vpop.f32.mrf.mxu2 }
 0x175   : > { %v1406_v8 = vadd.f32 %v1347_v17, %v1194_v31  ;;  %v1533_v27 = vpop.f32.mrf.mxu3 }
 0x176   : > { %v1195_v59 = vpop.f32.mrf.mxu1 }
 0x177   : > { %v1592_v11 = vadd.f32 %v1533_v27, %v1406_v8  ;;  %v1196_v2 = vadd.f32 %v1195_v59, %v4155_v39 }
 0x178   : > { %v1722_v22 = vpop.f32.mrf.mxu0 }
 0x179   : > { %v4359_v12 = vadd.f32 %v1720_v30, %v1592_v11 }
 0x17c   : > { %v1349_v34 = vpop.f32.mrf.mxu2 }
 0x17d   : > { %v1407_v14 = vadd.f32 %v1349_v34, %v1196_v2  ;;  %v1535_v4 = vpop.f32.mrf.mxu3 }
 0x17e   : > { %v1198_v16 = vpop.f32.mrf.mxu1 }
 0x17f   : > { %v1593_v18 = vadd.f32 %v1535_v4, %v1407_v14  ;;  %v1199_v28 = vadd.f32 %v1198_v16, %v4043_v32 }
 0x180   : > { %v1725_v50 = vpop.f32.mrf.mxu0 }
 0x181   : > { %1870 = vmatmul.bf16.vlgmr.msra.gmra.mxu1 %v3969_v43  ;;  %2056 = vmatmul.bf16.vlgmr.msra.gmra.mxu2 %v3973_v44  ;;  %v4364_v63 = vadd.f32 %v1722_v22, %v1593_v18 }
 0x182   : > { %2243 = vmatmul.bf16.vlgmr.msra.gmra.mxu3 %v3898_v5 }
 0x183   : > { %2429 = vmatmul.bf16.vlgmr.msra.gmra.mxu0 %v3982_v54 }
 0x184   : > { %v1352_v30 = vpop.f32.mrf.mxu2 }
 0x185   : > { %v1408_v39 = vadd.f32 %v1352_v30, %v1199_v28  ;;  %v1538_v31 = vpop.f32.mrf.mxu3 }
 0x186   : > { %v1200_v17 = vpop.f32.mrf.mxu1 }
 0x187   : > { %v1594_v8 = vadd.f32 %v1538_v31, %v1408_v39  ;;  %v1201_v43 = vadd.f32 %v1200_v17, %v4058_v42 }
 0x188   : > { %v1727_v27 = vpop.f32.mrf.mxu0 }
 0x189   : > { %v4369_v59 = vadd.f32 %v1725_v50, %v1594_v8 }
 0x18c   : > { %v1354_v11 = vpop.f32.mrf.mxu2 }
 0x18d   : > { %v1409_v44 = vadd.f32 %v1354_v11, %v1201_v43  ;;  %v1540_v22 = vpop.f32.mrf.mxu3 }
 0x18e   : > { %v1203_v2 = vpop.f32.mrf.mxu1 }
 0x18f   : > { %v1595_v34 = vadd.f32 %v1540_v22, %v1409_v44  ;;  %v1204_v50 = vadd.f32 %v1203_v2, %v4079_v56 }
 0x190   : > { %v1730_v5 = vpop.f32.mrf.mxu0 }
 0x191   : > { %1875 = vmatmul.bf16.gmra.mxu1 %v3982_v54  ;;  %2061 = vmatmul.bf16.gmra.mxu2 %v3986_v55  ;;  %v4374_v32 = vadd.f32 %v1727_v27, %v1595_v34  ;;  %v3645_v27 = vld [vmem:[#allocation2 + $0x20] sm:$0xff] }
 0x192   : > { %2248 = vmatmul.bf16.gmra.mxu3 %v3922_v13 }
 0x193   : > { %2434 = vmatmul.bf16.gmra.mxu0 %v4008_v6 }
 0x194   : > { %v1357_v14 = vpop.f32.mrf.mxu2 }
 0x195   : > { %v1410_v42 = vadd.f32 %v1357_v14, %v1204_v50  ;;  %v1543_v4 = vpop.f32.mrf.mxu3 }
 0x196   : > { %v1205_v16 = vpop.f32.mrf.mxu1 }
 0x197   : > { %v1596_v18 = vadd.f32 %v1543_v4, %v1410_v42  ;;  %v1206_v54 = vadd.f32 %v1205_v16, %v4088_v1 }
 0x198   : > { %v1732_v28 = vpop.f32.mrf.mxu0 }
 0x199   : > { %v4379_v30 = vadd.f32 %v1730_v5, %v1596_v18  ;;  %v3646_v18 = vld [vmem:[#allocation2 + $0x58] sm:$0xff] }
 0x19c   : > { %v1359_v39 = vpop.f32.mrf.mxu2 }
 0x19d   : > { %v1411_v55 = vadd.f32 %v1359_v39, %v1206_v54  ;;  %v1545_v31 = vpop.f32.mrf.mxu3 }
 0x19e   : > { %v1208_v17 = vpop.f32.mrf.mxu1 }
 0x19f   : > { %v1597_v8 = vadd.f32 %v1545_v31, %v1411_v55  ;;  %v1209_v43 = vadd.f32 %v1208_v17, %v4115_v23 }
 0x1a0   : > { %v1735_v13 = vpop.f32.mrf.mxu0 }
 0x1a1   : > { %1880 = vmatmul.bf16.gmra.mxu1 %v4008_v6  ;;  %2066 = vmatmul.bf16.gmra.mxu2 %v4012_v7  ;;  %v4384_v56 = vadd.f32 %v1732_v28, %v1597_v8 }
 0x1a2   : > { %2253 = vmatmul.bf16.gmra.mxu3 %v3645_v27 }
 0x1a3   : > { %2439 = vmatmul.bf16.gmra.mxu0 %v4024_v19 }
 0x1a4   : > { %v1362_v11 = vpop.f32.mrf.mxu2 }
 0x1a5   : > { %v1412_v1 = vadd.f32 %v1362_v11, %v1209_v43  ;;  %v1548_v44 = vpop.f32.mrf.mxu3 }
 0x1a6   : > { %v1210_v22 = vpop.f32.mrf.mxu1 }
 0x1a7   : > { %v1598_v2 = vadd.f32 %v1548_v44, %v1412_v1  ;;  %v1211_v6 = vadd.f32 %v1210_v22, %v4130_v61  ;;  %v4606_v44 = vld [vmem:[#allocation16_spill] sm:$0xff]  ;;  %v3647_v22 = vld [vmem:[#allocation2 + $0x70] sm:$0xff] }
 0x1a8   : > { %v1737_v34 = vpop.f32.mrf.mxu0 }
 0x1a9   : > { %v4388_v5 = vadd.f32 %v1735_v13, %v1598_v2  ;;  %v4607_v2 = vld [vmem:[#allocation19_spill] sm:$0xff] }
 0x1ac   : > { %v1364_v50 = vpop.f32.mrf.mxu2 }
 0x1ad   : > { %v1413_v7 = vadd.f32 %v1364_v50, %v1211_v6  ;;  %v1550_v14 = vpop.f32.mrf.mxu3 }
 0x1ae   : > { %v1213_v42 = vpop.f32.mrf.mxu1 }
 0x1af   : > { %v1599_v4 = vadd.f32 %v1550_v14, %v1413_v7  ;;  %v1214_v28 = vadd.f32 %v1213_v42, %v4151_v35 }
 0x1b0   : > { %v1740_v16 = vpop.f32.mrf.mxu0 }
 0x1b1   : > { %1885 = vmatmul.bf16.gmra.mxu1 %v4024_v19  ;;  %2071 = vmatmul.bf16.gmra.mxu2 %v4030_v21  ;;  %v4393_v23 = vadd.f32 %v1737_v34, %v1599_v4  ;;  %v4608_v34 = vld [vmem:[#allocation14_spill] sm:$0xff] }
 0x1b2   : > { %2258 = vmatmul.bf16.gmra.mxu3 %v3646_v18  ;;  %v4609_v18 = vld [vmem:[#allocation15_spill] sm:$0xff] }
 0x1b3   : > { %2444 = vmatmul.bf16.gmra.mxu0 %v4066_v47 }
 0x1b4   : > { %v1367_v54 = vpop.f32.mrf.mxu2 }
 0x1b5   : > { %v1414_v61 = vadd.f32 %v1367_v54, %v1214_v28  ;;  %v1553_v39 = vpop.f32.mrf.mxu3 }
 0x1b6   : > { %v1215_v55 = vpop.f32.mrf.mxu1 }
 0x1b7   : > { %v1600_v31 = vadd.f32 %v1553_v39, %v1414_v61  ;;  %v1216_v19 = vadd.f32 %v1215_v55, %v4160_v62 }
 0x1b8   : > { %v1742_v17 = vpop.f32.mrf.mxu0 }
 0x1b9   : > { %v4397_v8 = vadd.f32 %v1740_v16, %v1600_v31 }
 0x1bc   : > { %v1369_v13 = vpop.f32.mrf.mxu2 }
 0x1bd   : > { %v1415_v21 = vadd.f32 %v1369_v13, %v1216_v19  ;;  %v1555_v27 = vpop.f32.mrf.mxu3  ;;  %v3648_v13 = vld [vmem:[#allocation2 + $0x10] sm:$0xff] }
 0x1be   : > { %v1218_v43 = vpop.f32.mrf.mxu1 }
 0x1bf   : > { %v1601_v11 = vadd.f32 %v1555_v27, %v1415_v21  ;;  %v1219_v6 = vadd.f32 %v1218_v43, %v4608_v34  ;;  %v4611_v21 = vld [vmem:[#allocation23_spill] sm:$0xff]  ;;  %v4612_v27 = vld [vmem:[#allocation17_spill] sm:$0xff] }
 0x1c0   : > { %v1745_v1 = vpop.f32.mrf.mxu0 }
 0x1c1   : > { %1890 = vmatmul.bf16.gmra.mxu1 %v4066_v47  ;;  %2076 = vmatmul.bf16.gmra.mxu2 %v4606_v44  ;;  %v4402_v35 = vadd.f32 %v1742_v17, %v1601_v11  ;;  %v4610_v17 = vld [vmem:[#allocation20_spill] sm:$0xff] }
 0x1c2   : > { %2263 = vmatmul.bf16.gmra.mxu3 %v3647_v22 }
 0x1c3   : > { %2449 = vmatmul.bf16.gmra.mxu0 %v4607_v2 }
 0x1c4   : > { %v1372_v50 = vpop.f32.mrf.mxu2 }
 0x1c5   : > { %v1416_v62 = vadd.f32 %v1372_v50, %v1219_v6  ;;  %v1558_v7 = vpop.f32.mrf.mxu3 }
 0x1c6   : > { %v1220_v14 = vpop.f32.mrf.mxu1 }
 0x1c7   : > { %v1602_v42 = vadd.f32 %v1558_v7, %v1416_v62  ;;  %v1221_v47 = vadd.f32 %v1220_v14, %v4609_v18  ;;  %v4613_v62 = vld [vmem:[#allocation18_spill] sm:$0xff] }
 0x1c8   : > { %v1747_v4 = vpop.f32.mrf.mxu0 }
 0x1c9   : > { %v4406_v16 = vadd.f32 %v1745_v1, %v1602_v42 }
 0x1cc   : > { %v1374_v28 = vpop.f32.mrf.mxu2 }
 0x1cd   : > { %v1417_v54 = vadd.f32 %v1374_v28, %v1221_v47  ;;  %v1560_v61 = vpop.f32.mrf.mxu3  ;;  %v4614_v28 = vld [vmem:[#allocation24_spill] sm:$0xff] }
 0x1ce   : > { %v1223_v39 = vpop.f32.mrf.mxu1 }
 0x1cf   : > { %v1603_v55 = vadd.f32 %v1560_v61, %v1417_v54  ;;  %v1224_v43 = vadd.f32 %v1223_v39, %v4612_v27  ;;  %v3649_v61 = vld [vmem:[#allocation2 + $0x50] sm:$0xff]  ;;  %v4615_v39 = vld [vmem:[#allocation27_spill] sm:$0xff] }
 0x1d0   : > { %v1750_v31 = vpop.f32.mrf.mxu0 }
 0x1d1   : > { %1895 = vmatmul.bf16.gmra.mxu1 %v4607_v2  ;;  %2081 = vmatmul.bf16.gmra.mxu2 %v4610_v17  ;;  %v4411_v19 = vadd.f32 %v1747_v4, %v1603_v55  ;;  %v4616_v55 = vld [vmem:[#allocation21_spill] sm:$0xff] }
 0x1d2   : > { %2268 = vmatmul.bf16.gmra.mxu3 %v3648_v13 }
 0x1d3   : > { %2454 = vmatmul.bf16.gmra.mxu0 %v4611_v21 }
 0x1d4   : > { %v1377_v11 = vpop.f32.mrf.mxu2 }
 0x1d5   : > { %v1418_v1 = vadd.f32 %v1377_v11, %v1224_v43  ;;  %v1563_v44 = vpop.f32.mrf.mxu3 }
 0x1d6   : > { %v1225_v22 = vpop.f32.mrf.mxu1 }
 0x1d7   : > { %v1604_v34 = vadd.f32 %v1563_v44, %v1418_v1  ;;  %v1226_v2 = vadd.f32 %v1225_v22, %v4613_v62  ;;  %v4617_v22 = vld [vmem:[#allocation22_spill] sm:$0xff] }
 0x1d8   : > { %v1752_v6 = vpop.f32.mrf.mxu0 }
 0x1d9   : > { %v4415_v50 = vadd.f32 %v1750_v31, %v1604_v34 }
 0x1dc   : > { %v1379_v7 = vpop.f32.mrf.mxu2 }
 0x1dd   : > { %v1419_v14 = vadd.f32 %v1379_v7, %v1226_v2  ;;  %v1565_v42 = vpop.f32.mrf.mxu3 }
 0x1de   : > { %v1228_v4 = vpop.f32.mrf.mxu1 }
 0x1df   : > { %v1605_v18 = vadd.f32 %v1565_v42, %v1419_v14  ;;  %v1229_v31 = vadd.f32 %v1228_v4, %v4616_v55  ;;  %v3650_v4 = vld [vmem:[#allocation2 + $0x48] sm:$0xff] }
 0x1e0   : > { %v1755_v47 = vpop.f32.mrf.mxu0 }
 0x1e1   : > { %1900 = vmatmul.bf16.gmra.mxu1 %v4611_v21  ;;  %2086 = vmatmul.bf16.gmra.mxu2 %v4614_v28  ;;  %v4420_v54 = vadd.f32 %v1752_v6, %v1605_v18  ;;  %v4618_v18 = vld [vmem:[#allocation25_spill] sm:$0xff] }
 0x1e2   : > { %2273 = vmatmul.bf16.gmra.mxu3 %v3649_v61 }
 0x1e3   : > { %2459 = vmatmul.bf16.gmra.mxu0 %v4615_v39 }
 0x1e4   : > { %v1382_v17 = vpop.f32.mrf.mxu2 }
 0x1e5   : > { %v1420_v13 = vadd.f32 %v1382_v17, %v1229_v31  ;;  %v1568_v27 = vpop.f32.mrf.mxu3 }
 0x1e6   : > { %v1230_v43 = vpop.f32.mrf.mxu1 }
 0x1e7   : > { %v1606_v11 = vadd.f32 %v1568_v27, %v1420_v13  ;;  %v1231_v21 = vadd.f32 %v1230_v43, %v4617_v22  ;;  %v4619_v43 = vld [vmem:[#allocation26_spill] sm:$0xff] }
 0x1e8   : > { %v1757_v1 = vpop.f32.mrf.mxu0 }
 0x1e9   : > { %v4424_v44 = vadd.f32 %v1755_v47, %v1606_v11 }
 0x1ec   : > { %v1384_v34 = vpop.f32.mrf.mxu2 }
 0x1ed   : > { %v1421_v62 = vadd.f32 %v1384_v34, %v1231_v21  ;;  %v1570_v6 = vpop.f32.mrf.mxu3 }
 0x1ee   : > { %v1233_v2 = vpop.f32.mrf.mxu1 }
 0x1ef   : > { %v1607_v7 = vadd.f32 %v1570_v6, %v1421_v62  ;;  %v1234_v47 = vadd.f32 %v1233_v2, %v4618_v18  ;;  %v3651_v6 = vld [vmem:[#allocation2 + $0x28] sm:$0xff] }
 0x1f0   : > { %v1760_v14 = vpop.f32.mrf.mxu0 }
 0x1f1   : > { %1905 = vmatmul.bf16.gmra.mxu1 %v4615_v39  ;;  %2091 = vmatmul.bf16.gmra.mxu2 %v4171_v38  ;;  %v4429_v42 = vadd.f32 %v1757_v1, %v1607_v7  ;;  %v4620_v7 = vld [vmem:[#allocation28_spill] sm:$0xff] }
 0x1f2   : > { %2278 = vmatmul.bf16.gmra.mxu3 %v3650_v4 }
 0x1f3   : > { %2464 = vmatmul.bf16.gmra.mxu0 %v4196_v29 }
 0x1f4   : > { %v1387_v28 = vpop.f32.mrf.mxu2 }
 0x1f5   : > { %v1422_v61 = vadd.f32 %v1387_v28, %v1234_v47  ;;  %v1573_v55 = vpop.f32.mrf.mxu3 }
 0x1f6   : > { %v1235_v31 = vpop.f32.mrf.mxu1 }
 0x1f7   : > { %v1608_v17 = vadd.f32 %v1573_v55, %v1422_v61  ;;  %v1236_v39 = vadd.f32 %v1235_v31, %v4619_v43  ;;  %v4621_v55 = vld [vmem:[#allocation29_spill] sm:$0xff] }
 0x1f8   : > { %v1762_v13 = vpop.f32.mrf.mxu0 }
 0x1f9   : > { %v4433_v27 = vadd.f32 %v1760_v14, %v1608_v17 }
 0x1fc   : > { %v1389_v11 = vpop.f32.mrf.mxu2 }
 0x1fd   : > { %v1423_v38 = vadd.f32 %v1389_v11, %v1236_v39  ;;  %v1575_v1 = vpop.f32.mrf.mxu3  ;;  %v4446_v39 = vld [vmem:[%s4564_s2] ss:$0 sm:$0xff] }
 0x1fe   : > { %v1871_v22 = vpop.f32.mrf.mxu1 }
 0x1ff   : > { %v1609_v21 = vadd.f32 %v1575_v1, %v1423_v38  ;;  %v1951_v14 = vadd.f32 %v1871_v22, %v4620_v7  ;;  %v3652_v22 = vld [vmem:[#allocation2 + $0x18] sm:$0xff] }
 0x200   : > { %v2430_v34 = vpop.f32.mrf.mxu0 }
 0x201   : > { %1910 = vmatmul.bf16.gmra.mxu1 %v4196_v29  ;;  %2096 = vmatmul.bf16.gmra.mxu2 %v4201_v45  ;;  %v4438_v62 = vadd.f32 %v1762_v13, %v1609_v21 }
 0x202   : > { %2283 = vmatmul.bf16.gmra.mxu3 %v3651_v6 }
 0x203   : > { %2469 = vmatmul.bf16.gmra.mxu0 %v4216_v9 }
 0x204   : > { %v2057_v2 = vpop.f32.mrf.mxu2 }
 0x205   : > { %v2244_v4 = vpop.f32.mrf.mxu3  ;;  %v2137_v47 = vadd.f32 %v2057_v2, %v1951_v14 }
 0x206   : > { %v1873_v18 = vpop.f32.mrf.mxu1 }
 0x207   : > { %v2324_v61 = vadd.f32 %v2244_v4, %v2137_v47  ;;  %v1952_v31 = vadd.f32 %v1873_v18, %v4621_v55 }
 0x208   : > { %v2432_v28 = vpop.f32.mrf.mxu0 }
 0x209   : > { %v2510_v13 = vadd.f32 %v2430_v34, %v2324_v61 }
 0x20b   : > { %v2546_v21 = vadd.f32 %v4446_v39, %v2510_v13 }
 0x20c   : > { %v2059_v17 = vpop.f32.mrf.mxu2 }
 0x20d   : > { %v2138_v29 = vadd.f32 %v2059_v17, %v1952_v31  ;;  %v2246_v43 = vpop.f32.mrf.mxu3 }
 0x20e   : > { %v1876_v45 = vpop.f32.mrf.mxu1 }
 0x20f   : > { %v2325_v11 = vadd.f32 %v2246_v43, %v2138_v29  ;;  %v1953_v7 = vadd.f32 %v1876_v45, %v4212_v33  ;;  %v3653_v33 = vld [vmem:[#allocation2 + $0x40] sm:$0xff] }
 0x210   : > { %v2435_v38 = vpop.f32.mrf.mxu0 }
 0x211   : > { %v2511_v1 = vadd.f32 %v2432_v28, %v2325_v11  ;;  %1915 = vmatmul.bf16.gmra.mxu1 %v4216_v9  ;;  %2101 = vmatmul.bf16.gmra.mxu2 %v4221_v0 }
 0x212   : > { %2288 = vmatmul.bf16.gmra.mxu3 %v3652_v22  ;;  %v4622_v22 = vld [vmem:[#allocation30_spill] sm:$0xff] }
 0x213   : > { %2474 = vmatmul.bf16.gmra.mxu0 %v4248_v57  ;;  %v2547_v34 = vadd.f32 %v4446_v39, %v2511_v1 }
 0x214   : > { %v2062_v6 = vpop.f32.mrf.mxu2 }
 0x215   : > { %v3503_v2 = vpack.c.bf16 %v2547_v34, %v2546_v21  ;;  %v2249_v14 = vpop.f32.mrf.mxu3  ;;  %v2139_v18 = vadd.f32 %v2062_v6, %v1953_v7  ;;  %v4623_v7 = vld [vmem:[#allocation31_spill] sm:$0xff] }
 0x216   : > { %v1878_v4 = vpop.f32.mrf.mxu1 }
 0x217   : > { %3504 = vst [vmem:[%s3736_s24] sm:$0xff] %v3503_v2   ;;  %v2326_v9 = vadd.f32 %v2249_v14, %v2139_v18  ;;  %v1954_v0 = vadd.f32 %v1878_v4, %v4225_v52 }
 0x218   : > { %v2437_v47 = vpop.f32.mrf.mxu0 }
 0x219   : > { %v2512_v17 = vadd.f32 %v2435_v38, %v2326_v9 }
 0x21b   : > { %v2548_v45 = vadd.f32 %v4446_v39, %v2512_v17 }
 0x21c   : > { %v2064_v28 = vpop.f32.mrf.mxu2 }
 0x21d   : > { %v2140_v61 = vadd.f32 %v2064_v28, %v1954_v0  ;;  %v2251_v55 = vpop.f32.mrf.mxu3 }
 0x21e   : > { %v1881_v31 = vpop.f32.mrf.mxu1 }
 0x21f   : > { %v2327_v29 = vadd.f32 %v2251_v55, %v2140_v61  ;;  %v1955_v38 = vadd.f32 %v1881_v31, %v4622_v22  ;;  %v3654_v55 = vld [vmem:[#allocation2 + $0x68] sm:$0xff] }
 0x220   : > { %v2440_v43 = vpop.f32.mrf.mxu0 }
 0x221   : > { %v2513_v13 = vadd.f32 %v2437_v47, %v2327_v29  ;;  %1920 = vmatmul.bf16.gmra.mxu1 %v4248_v57  ;;  %2106 = vmatmul.bf16.gmra.mxu2 %v4253_v40 }
 0x222   : > { %2293 = vmatmul.bf16.gmra.mxu3 %v3653_v33 }
 0x223   : > { %2479 = vmatmul.bf16.gmra.mxu0 %v4268_v53  ;;  %v2549_v52 = vadd.f32 %v4446_v39, %v2513_v13 }
 0x224   : > { %v2067_v11 = vpop.f32.mrf.mxu2 }
 0x225   : > { %v3508_v1 = vpack.c.bf16 %v2549_v52, %v2548_v45  ;;  %v2254_v21 = vpop.f32.mrf.mxu3  ;;  %v2141_v6 = vadd.f32 %v2067_v11, %v1955_v38 }
 0x226   : > { %v1883_v34 = vpop.f32.mrf.mxu1 }
 0x227   : > { %3580 = vst [vmem:[%s3736_s24 + $0x8] sm:$0xff] %v3508_v1   ;;  %v2328_v57 = vadd.f32 %v2254_v21, %v2141_v6  ;;  %v1956_v40 = vadd.f32 %v1883_v34, %v4623_v7  ;;  %v4624_v1 = vld [vmem:[#allocation32_spill] sm:$0xff] }
 0x228   : > { %v2442_v2 = vpop.f32.mrf.mxu0 }
 0x229   : > { %v2514_v9 = vadd.f32 %v2440_v43, %v2328_v57 }
 0x22b   : > { %v2550_v31 = vadd.f32 %v4446_v39, %v2514_v9 }
 0x22c   : > { %v2069_v14 = vpop.f32.mrf.mxu2 }
 0x22d   : > { %v2142_v4 = vadd.f32 %v2069_v14, %v1956_v40  ;;  %v2256_v18 = vpop.f32.mrf.mxu3 }
 0x22e   : > { %v1886_v47 = vpop.f32.mrf.mxu1 }
 0x22f   : > { %v2329_v0 = vadd.f32 %v2256_v18, %v2142_v4  ;;  %v1957_v43 = vadd.f32 %v1886_v47, %v4264_v20  ;;  %v3655_v20 = vld [vmem:[#allocation2 + $0x78] sm:$0xff] }
 0x230   : > { %v2445_v28 = vpop.f32.mrf.mxu0 }
 0x231   : > { %v2515_v61 = vadd.f32 %v2442_v2, %v2329_v0  ;;  %1925 = vmatmul.bf16.gmra.mxu1 %v4268_v53  ;;  %2111 = vmatmul.bf16.gmra.mxu2 %v4272_v41 }
 0x232   : > { %2298 = vmatmul.bf16.gmra.mxu3 %v3654_v55  ;;  %v4625_v55 = vld [vmem:[#allocation33_spill] sm:$0xff] }
 0x233   : > { %2484 = vmatmul.bf16.gmra.mxu0 %v4300_v26  ;;  %v2551_v17 = vadd.f32 %v4446_v39, %v2515_v61 }
 0x234   : > { %v2072_v29 = vpop.f32.mrf.mxu2 }
 0x235   : > { %v3513_v13 = vpack.c.bf16 %v2551_v17, %v2550_v31  ;;  %v2259_v33 = vpop.f32.mrf.mxu3  ;;  %v2143_v52 = vadd.f32 %v2072_v29, %v1957_v43 }
 0x236   : > { %v1888_v45 = vpop.f32.mrf.mxu1 }
 0x237   : > { %3581 = vst [vmem:[%s3736_s24 + $0x10] sm:$0xff] %v3513_v13   ;;  %v2330_v53 = vadd.f32 %v2259_v33, %v2143_v52  ;;  %v1958_v41 = vadd.f32 %v1888_v45, %v4624_v1 }
 0x238   : > { %v2447_v11 = vpop.f32.mrf.mxu0 }
 0x239   : > { %v2516_v6 = vadd.f32 %v2445_v28, %v2330_v53 }
 0x23b   : > { %v2552_v40 = vadd.f32 %v4446_v39, %v2516_v6 }
 0x23c   : > { %v2074_v22 = vpop.f32.mrf.mxu2 }
 0x23d   : > { %v2144_v38 = vadd.f32 %v2074_v22, %v1958_v41  ;;  %v2261_v21 = vpop.f32.mrf.mxu3 }
 0x23e   : > { %v1891_v34 = vpop.f32.mrf.mxu1 }
 0x23f   : > { %v2331_v2 = vadd.f32 %v2261_v21, %v2144_v38  ;;  %v1959_v47 = vadd.f32 %v1891_v34, %v4295_v3  ;;  %v3656_v3 = vld [vmem:[#allocation2 + $0x80] sm:$0xff] }
 0x240   : > { %v2450_v57 = vpop.f32.mrf.mxu0 }
 0x241   : > { %v2517_v7 = vadd.f32 %v2447_v11, %v2331_v2  ;;  %1930 = vmatmul.bf16.gmra.mxu1 %v4300_v26  ;;  %2116 = vmatmul.bf16.gmra.mxu2 %v4304_v51 }
 0x242   : > { %2303 = vmatmul.bf16.gmra.mxu3 %v3655_v20 }
 0x243   : > { %2489 = vmatmul.bf16.gmra.mxu0 %v4320_v60  ;;  %v2553_v14 = vadd.f32 %v4446_v39, %v2517_v7 }
 0x244   : > { %v2077_v4 = vpop.f32.mrf.mxu2 }
 0x245   : > { %v3518_v18 = vpack.c.bf16 %v2553_v14, %v2552_v40  ;;  %v2264_v9 = vpop.f32.mrf.mxu3  ;;  %v2145_v28 = vadd.f32 %v2077_v4, %v1959_v47 }
 0x246   : > { %v1893_v0 = vpop.f32.mrf.mxu1 }
 0x247   : > { %3582 = vst [vmem:[%s3736_s24 + $0x18] sm:$0xff] %v3518_v18   ;;  %v2332_v26 = vadd.f32 %v2264_v9, %v2145_v28  ;;  %v1960_v51 = vadd.f32 %v1893_v0, %v4625_v55 }
 0x248   : > { %v2452_v61 = vpop.f32.mrf.mxu0 }
 0x249   : > { %v2518_v43 = vadd.f32 %v2450_v57, %v2332_v26  ;;  %v4626_v57 = vshrl.u32 %v4326_v37, 16 }
 0x24b   : > { %v2554_v11 = vadd.f32 %v4446_v39, %v2518_v43 }
 0x24c   : > { %v2079_v31 = vpop.f32.mrf.mxu2 }
 0x24d   : > { %v2146_v17 = vadd.f32 %v2079_v31, %v1960_v51  ;;  %v2266_v29 = vpop.f32.mrf.mxu3 }
 0x24e   : > { %v1896_v13 = vpop.f32.mrf.mxu1 }
 0x24f   : > { %v2333_v33 = vadd.f32 %v2266_v29, %v2146_v17  ;;  %v1961_v22 = vadd.f32 %v1896_v13, %v4315_v25 }
 0x250   : > { %v2455_v45 = vpop.f32.mrf.mxu0 }
 0x251   : > { %v2519_v52 = vadd.f32 %v2452_v61, %v2333_v33  ;;  %1935 = vmatmul.bf16.gmra.mxu1 %v4320_v60  ;;  %2121 = vmatmul.bf16.gmra.mxu2 %v4324_v15  ;;  %v872_v60 = vrot.slane %v791_v10, 1 }
 0x252   : > { %2308 = vmatmul.bf16.gmra.mxu3 %v3656_v3  ;;  %v4627_v3 = vld [vmem:[#allocation12_spill] sm:$0xff] }
 0x253   : > { %2494 = vmatmul.bf16.gmra.mxu0 %v4346_v49  ;;  %v2555_v53 = vadd.f32 %v4446_v39, %v2519_v52  ;;  %v873_v7 = vor.u32 %v872_v60, %v4626_v57 }
 0x254   : > { %v2082_v1 = vpop.f32.mrf.mxu2 }
 0x255   : > { %v3523_v41 = vpack.c.bf16 %v2555_v53, %v2554_v11  ;;  %v2269_v38 = vpop.f32.mrf.mxu3  ;;  %v2147_v34 = vadd.f32 %v2082_v1, %v1961_v22  ;;  %v913_v9 = vsel %vm3936_vm5, %v873_v7, 0  ;;  %v4629_v11 = vld [vmem:[#allocation13_spill] sm:$0xff] }
 0x256   : > { %v1898_v21 = vpop.f32.mrf.mxu1 }
 0x257   : > { %3583 = vst [vmem:[%s3736_s24 + $0x20] sm:$0xff] %v3523_v41   ;;  %v2334_v15 = vadd.f32 %v2269_v38, %v2147_v34  ;;  %v1962_v2 = vadd.f32 %v1898_v21, %v4330_v58 }
 0x258   : > { %v2457_v6 = vpop.f32.mrf.mxu0 }
 0x259   : > { %v2520_v18 = vadd.f32 %v2455_v45, %v2334_v15 }
 0x25b   : > { %v2556_v58 = vadd.f32 %v4446_v39, %v2520_v18 }
 0x25c   : > { %v2084_v20 = vpop.f32.mrf.mxu2 }
 0x25d   : > { %v2148_v40 = vadd.f32 %v2084_v20, %v1962_v2  ;;  %v2271_v14 = vpop.f32.mrf.mxu3 }
 0x25e   : > { %v1901_v4 = vpop.f32.mrf.mxu1 }
 0x25f   : > { %v2335_v25 = vadd.f32 %v2271_v14, %v2148_v40  ;;  %v1963_v26 = vadd.f32 %v1901_v4, %v4339_v46  ;;  %v4628_v46 = vld [vmem:[#allocation11_spill] sm:$0xff] }
 0x260   : > { %v2460_v47 = vpop.f32.mrf.mxu0 }
 0x261   : > { %v2521_v0 = vadd.f32 %v2457_v6, %v2335_v25  ;;  %1940 = vmatmul.bf16.gmra.mxu1 %v4346_v49  ;;  %2126 = vmatmul.bf16.gmra.mxu2 %v4350_v36 }
 0x262   : > { %2313 = vmatmul.bf16.gmra.mxu3 %v4326_v37 }
 0x263   : > { %2499 = vmatmul.bf16.gmra.mxu0 %v913_v9  ;;  %v2557_v10 = vadd.f32 %v4446_v39, %v2521_v0 }
 0x264   : > { %v2087_v28 = vpop.f32.mrf.mxu2 }
 0x265   : > { %v3528_v61 = vpack.c.bf16 %v2557_v10, %v2556_v58  ;;  %v2274_v55 = vpop.f32.mrf.mxu3  ;;  %v2149_v24 = vadd.f32 %v2087_v28, %v1963_v26 }
 0x266   : > { %v1903_v51 = vpop.f32.mrf.mxu1 }
 0x267   : > { %3584 = vst [vmem:[%s3736_s24 + $0x28] sm:$0xff] %v3528_v61   ;;  %v2336_v17 = vadd.f32 %v2274_v55, %v2149_v24  ;;  %v1964_v49 = vadd.f32 %v1903_v51, %v4354_v48 }
 0x268   : > { %v2462_v31 = vpop.f32.mrf.mxu0 }
 0x269   : > { %v2522_v43 = vadd.f32 %v2460_v47, %v2336_v17 }
 0x26b   : > { %v2558_v53 = vadd.f32 %v4446_v39, %v2522_v43 }
 0x26c   : > { %v2089_v36 = vpop.f32.mrf.mxu2 }
 0x26d   : > { %v2150_v29 = vadd.f32 %v2089_v36, %v1964_v49  ;;  %v2276_v37 = vpop.f32.mrf.mxu3 }
 0x26e   : > { %v1906_v13 = vpop.f32.mrf.mxu1 }
 0x26f   : > { %v2337_v33 = vadd.f32 %v2276_v37, %v2150_v29  ;;  %v1965_v22 = vadd.f32 %v1906_v13, %v4359_v12 }
 0x270   : > { %v2465_v45 = vpop.f32.mrf.mxu0 }
 0x271   : > { %v2523_v52 = vadd.f32 %v2462_v31, %v2337_v33  ;;  %1945 = vmatmul.bf16.gmra.mxu1 %v913_v9  ;;  %2131 = vmatmul.bf16.gmra.mxu2 %v4627_v3 }
 0x272   : > { %2318 = vmatmul.bf16.gmra.mxu3 %v4628_v46 }
 0x273   : > { %2504 = vmatmul.bf16.gmra.mxu0 %v4629_v11  ;;  %v2559_v48 = vadd.f32 %v4446_v39, %v2523_v52 }
 0x274   : > { %v2092_v1 = vpop.f32.mrf.mxu2 }
 0x275   : > { %v3533_v41 = vpack.c.bf16 %v2559_v48, %v2558_v53  ;;  %v2279_v38 = vpop.f32.mrf.mxu3  ;;  %v2151_v34 = vadd.f32 %v2092_v1, %v1965_v22 }
 0x276   : > { %v1908_v21 = vpop.f32.mrf.mxu1 }
 0x277   : > { %3585 = vst [vmem:[%s3736_s24 + $0x30] sm:$0xff] %v3533_v41   ;;  %v2338_v60 = vadd.f32 %v2279_v38, %v2151_v34  ;;  %v1966_v15 = vadd.f32 %v1908_v21, %v4364_v63 }
 0x278   : > { %v2467_v6 = vpop.f32.mrf.mxu0 }
 0x279   : > { %v2524_v40 = vadd.f32 %v2465_v45, %v2338_v60 }
 0x27b   : > { %v2560_v25 = vadd.f32 %v4446_v39, %v2524_v40 }
 0x27c   : > { %v2094_v2 = vpop.f32.mrf.mxu2 }
 0x27d   : > { %v2152_v57 = vadd.f32 %v2094_v2, %v1966_v15  ;;  %v2281_v7 = vpop.f32.mrf.mxu3 }
 0x27e   : > { %v1911_v20 = vpop.f32.mrf.mxu1 }
 0x27f   : > { %v2339_v14 = vadd.f32 %v2281_v7, %v2152_v57  ;;  %v1967_v0 = vadd.f32 %v1911_v20, %v4369_v59 }
 0x280   : > { %v2470_v4 = vpop.f32.mrf.mxu0 }
 0x281   : > { %v2525_v18 = vadd.f32 %v2467_v6, %v2339_v14 }
 0x283   : > { %v2561_v12 = vadd.f32 %v4446_v39, %v2525_v18 }
 0x284   : > { %v2097_v47 = vpop.f32.mrf.mxu2 }
 0x285   : > { %v3538_v9 = vpack.c.bf16 %v2561_v12, %v2560_v25  ;;  %v2284_v58 = vpop.f32.mrf.mxu3  ;;  %v2153_v63 = vadd.f32 %v2097_v47, %v1967_v0 }
 0x286   : > { %v1913_v10 = vpop.f32.mrf.mxu1 }
 0x287   : > { %3586 = vst [vmem:[%s3736_s24 + $0x38] sm:$0xff] %v3538_v9   ;;  %v2340_v61 = vadd.f32 %v2284_v58, %v2153_v63  ;;  %v1968_v26 = vadd.f32 %v1913_v10, %v4374_v32 }
 0x288   : > { %v2472_v28 = vpop.f32.mrf.mxu0 }
 0x289   : > { %v2526_v17 = vadd.f32 %v2470_v4, %v2340_v61 }
 0x28b   : > { %v2562_v37 = vadd.f32 %v4446_v39, %v2526_v17 }
 0x28c   : > { %v2099_v55 = vpop.f32.mrf.mxu2 }
 0x28d   : > { %v2154_v51 = vadd.f32 %v2099_v55, %v1968_v26  ;;  %v2286_v24 = vpop.f32.mrf.mxu3 }
 0x28e   : > { %v1916_v31 = vpop.f32.mrf.mxu1 }
 0x28f   : > { %v2341_v49 = vadd.f32 %v2286_v24, %v2154_v51  ;;  %v1969_v33 = vadd.f32 %v1916_v31, %v4379_v30 }
 0x290   : > { %v2475_v36 = vpop.f32.mrf.mxu0 }
 0x291   : > { %v2527_v29 = vadd.f32 %v2472_v28, %v2341_v49 }
 0x293   : > { %v2563_v59 = vadd.f32 %v4446_v39, %v2527_v29 }
 0x294   : > { %v2102_v13 = vpop.f32.mrf.mxu2 }
 0x295   : > { %v3543_v43 = vpack.c.bf16 %v2563_v59, %v2562_v37  ;;  %v2289_v45 = vpop.f32.mrf.mxu3  ;;  %v2155_v32 = vadd.f32 %v2102_v13, %v1969_v33 }
 0x296   : > { %v1918_v52 = vpop.f32.mrf.mxu1 }
 0x297   : > { %3587 = vst [vmem:[%s3736_s24 + $0x40] sm:$0xff] %v3543_v43   ;;  %v2342_v46 = vadd.f32 %v2289_v45, %v2155_v32  ;;  %v1970_v11 = vadd.f32 %v1918_v52, %v4384_v56 }
 0x298   : > { %v2477_v3 = vpop.f32.mrf.mxu0 }
 0x299   : > { %v2528_v22 = vadd.f32 %v2475_v36, %v2342_v46 }
 0x29b   : > { %v2564_v6 = vadd.f32 %v4446_v39, %v2528_v22 }
 0x29c   : > { %v2104_v53 = vpop.f32.mrf.mxu2 }
 0x29d   : > { %v2156_v48 = vadd.f32 %v2104_v53, %v1970_v11  ;;  %v2291_v1 = vpop.f32.mrf.mxu3 }
 0x29e   : > { %v1921_v41 = vpop.f32.mrf.mxu1 }
 0x29f   : > { %v2343_v38 = vadd.f32 %v2291_v1, %v2156_v48  ;;  %v1971_v2 = vadd.f32 %v1921_v41, %v4388_v5 }
 0x2a0   : > { %v2480_v21 = vpop.f32.mrf.mxu0 }
 0x2a1   : > { %v2529_v34 = vadd.f32 %v2477_v3, %v2343_v38 }
 0x2a3   : > { %v2565_v30 = vadd.f32 %v4446_v39, %v2529_v34 }
 0x2a4   : > { %v2107_v60 = vpop.f32.mrf.mxu2 }
 0x2a5   : > { %v3548_v15 = vpack.c.bf16 %v2565_v30, %v2564_v6  ;;  %v2294_v57 = vpop.f32.mrf.mxu3  ;;  %v2157_v56 = vadd.f32 %v2107_v60, %v1971_v2 }
 0x2a6   : > { %v1923_v7 = vpop.f32.mrf.mxu1 }
 0x2a7   : > { %3588 = vst [vmem:[%s3736_s24 + $0x48] sm:$0xff] %v3548_v15   ;;  %v2344_v40 = vadd.f32 %v2294_v57, %v2157_v56  ;;  %v1972_v14 = vadd.f32 %v1923_v7, %v4393_v23 }
 0x2a8   : > { %v2482_v20 = vpop.f32.mrf.mxu0 }
 0x2a9   : > { %v2530_v47 = vadd.f32 %v2480_v21, %v2344_v40 }
 0x2ab   : > { %v2566_v10 = vadd.f32 %v4446_v39, %v2530_v47 }
 0x2ac   : > { %v2109_v4 = vpop.f32.mrf.mxu2 }
 0x2ad   : > { %v2158_v18 = vadd.f32 %v2109_v4, %v1972_v14  ;;  %v2296_v25 = vpop.f32.mrf.mxu3 }
 0x2ae   : > { %v1926_v12 = vpop.f32.mrf.mxu1 }
 0x2af   : > { %v2345_v9 = vadd.f32 %v2296_v25, %v2158_v18  ;;  %v1973_v61 = vadd.f32 %v1926_v12, %v4397_v8 }
 0x2b0   : > { %v2485_v0 = vpop.f32.mrf.mxu0 }
 0x2b1   : > { %v2531_v58 = vadd.f32 %v2482_v20, %v2345_v9 }
 0x2b3   : > { %v2567_v5 = vadd.f32 %v4446_v39, %v2531_v58 }
 0x2b4   : > { %v2112_v63 = vpop.f32.mrf.mxu2 }
 0x2b5   : > { %v3553_v28 = vpack.c.bf16 %v2567_v5, %v2566_v10  ;;  %v2299_v26 = vpop.f32.mrf.mxu3  ;;  %v2159_v23 = vadd.f32 %v2112_v63, %v1973_v61 }
 0x2b6   : > { %v1928_v55 = vpop.f32.mrf.mxu1 }
 0x2b7   : > { %3589 = vst [vmem:[%s3736_s24 + $0x50] sm:$0xff] %v3553_v28   ;;  %v2346_v24 = vadd.f32 %v2299_v26, %v2159_v23  ;;  %v1974_v31 = vadd.f32 %v1928_v55, %v4402_v35 }
 0x2b8   : > { %v2487_v51 = vpop.f32.mrf.mxu0 }
 0x2b9   : > { %v2532_v37 = vadd.f32 %v2485_v0, %v2346_v24 }
 0x2bb   : > { %v2568_v33 = vadd.f32 %v4446_v39, %v2532_v37 }
 0x2bc   : > { %v2114_v17 = vpop.f32.mrf.mxu2 }
 0x2bd   : > { %v2160_v49 = vadd.f32 %v2114_v17, %v1974_v31  ;;  %v2301_v36 = vpop.f32.mrf.mxu3 }
 0x2be   : > { %v1931_v29 = vpop.f32.mrf.mxu1 }
 0x2bf   : > { %v2347_v59 = vadd.f32 %v2301_v36, %v2160_v49  ;;  %v1975_v32 = vadd.f32 %v1931_v29, %v4406_v16 }
 0x2c0   : > { %v2490_v13 = vpop.f32.mrf.mxu0 }
 0x2c1   : > { %v2533_v43 = vadd.f32 %v2487_v51, %v2347_v59 }
 0x2c3   : > { %v2569_v8 = vadd.f32 %v4446_v39, %v2533_v43 }
 0x2c4   : > { %v2117_v45 = vpop.f32.mrf.mxu2 }
 0x2c5   : > { %v3558_v52 = vpack.c.bf16 %v2569_v8, %v2568_v33  ;;  %v2304_v3 = vpop.f32.mrf.mxu3  ;;  %v2161_v35 = vadd.f32 %v2117_v45, %v1975_v32 }
 0x2c6   : > { %v1933_v46 = vpop.f32.mrf.mxu1 }
 0x2c7   : > { %3590 = vst [vmem:[%s3736_s24 + $0x58] sm:$0xff] %v3558_v52   ;;  %v2348_v53 = vadd.f32 %v2304_v3, %v2161_v35  ;;  %v1976_v48 = vadd.f32 %v1933_v46, %v4411_v19 }
 0x2c8   : > { %v2492_v11 = vpop.f32.mrf.mxu0 }
 0x2c9   : > { %v2534_v21 = vadd.f32 %v2490_v13, %v2348_v53 }
 0x2cb   : > { %v2570_v60 = vadd.f32 %v4446_v39, %v2534_v21 }
 0x2cc   : > { %v2119_v1 = vpop.f32.mrf.mxu2 }
 0x2cd   : > { %v2162_v41 = vadd.f32 %v2119_v1, %v1976_v48  ;;  %v2306_v22 = vpop.f32.mrf.mxu3 }
 0x2ce   : > { %v1936_v38 = vpop.f32.mrf.mxu1 }
 0x2cf   : > { %v2349_v34 = vadd.f32 %v2306_v22, %v2162_v41  ;;  %v1977_v57 = vadd.f32 %v1936_v38, %v4415_v50 }
 0x2d0   : > { %v2495_v6 = vpop.f32.mrf.mxu0 }
 0x2d1   : > { %v2535_v30 = vadd.f32 %v2492_v11, %v2349_v34 }
 0x2d3   : > { %v2571_v16 = vadd.f32 %v4446_v39, %v2535_v30 }
 0x2d4   : > { %v2122_v15 = vpop.f32.mrf.mxu2 }
 0x2d5   : > { %v3563_v2 = vpack.c.bf16 %v2571_v16, %v2570_v60  ;;  %v2309_v7 = vpop.f32.mrf.mxu3  ;;  %v2163_v19 = vadd.f32 %v2122_v15, %v1977_v57 }
 0x2d6   : > { %v1938_v56 = vpop.f32.mrf.mxu1 }
 0x2d7   : > { %3591 = vst [vmem:[%s3736_s24 + $0x60] sm:$0xff] %v3563_v2   ;;  %v2350_v40 = vadd.f32 %v2309_v7, %v2163_v19  ;;  %v1978_v14 = vadd.f32 %v1938_v56, %v4420_v54 }
 0x2d8   : > { %v2497_v20 = vpop.f32.mrf.mxu0 }
 0x2d9   : > { %v2536_v47 = vadd.f32 %v2495_v6, %v2350_v40 }
 0x2db   : > { %v2572_v10 = vadd.f32 %v4446_v39, %v2536_v47 }
 0x2dc   : > { %v2124_v4 = vpop.f32.mrf.mxu2 }
 0x2dd   : > { %v2164_v18 = vadd.f32 %v2124_v4, %v1978_v14  ;;  %v2311_v25 = vpop.f32.mrf.mxu3 }
 0x2de   : > { %v1941_v12 = vpop.f32.mrf.mxu1 }
 0x2df   : > { %v2351_v9 = vadd.f32 %v2311_v25, %v2164_v18  ;;  %v1979_v28 = vadd.f32 %v1941_v12, %v4424_v44 }
 0x2e0   : > { %v2500_v58 = vpop.f32.mrf.mxu0 }
 0x2e1   : > { %v2537_v0 = vadd.f32 %v2497_v20, %v2351_v9 }
 0x2e3   : > { %v2573_v50 = vadd.f32 %v4446_v39, %v2537_v0 }
 0x2e4   : > { %v2127_v5 = vpop.f32.mrf.mxu2 }
 0x2e5   : > { %v3568_v63 = vpack.c.bf16 %v2573_v50, %v2572_v10  ;;  %v2314_v61 = vpop.f32.mrf.mxu3  ;;  %v2165_v54 = vadd.f32 %v2127_v5, %v1979_v28 }
 0x2e6   : > { %v1943_v26 = vpop.f32.mrf.mxu1 }
 0x2e7   : > { %3592 = vst [vmem:[%s3736_s24 + $0x68] sm:$0xff] %v3568_v63   ;;  %v2352_v55 = vadd.f32 %v2314_v61, %v2165_v54  ;;  %v1980_v23 = vadd.f32 %v1943_v26, %v4429_v42 }
 0x2e8   : > { %v2502_v51 = vpop.f32.mrf.mxu0 }
 0x2e9   : > { %v2538_v36 = vadd.f32 %v2500_v58, %v2352_v55 }
 0x2eb   : > { %v2574_v59 = vadd.f32 %v4446_v39, %v2538_v36 }
 0x2ec   : > { %v2129_v24 = vpop.f32.mrf.mxu2 }
 0x2ed   : > { %v2166_v31 = vadd.f32 %v2129_v24, %v1980_v23  ;;  %v2316_v17 = vpop.f32.mrf.mxu3 }
 0x2ee   : > { %v1946_v49 = vpop.f32.mrf.mxu1 }
 0x2ef   : > { %v2353_v29 = vadd.f32 %v2316_v17, %v2166_v31  ;;  %v1981_v33 = vadd.f32 %v1946_v49, %v4433_v27 }
 0x2f0   : > { %v2505_v45 = vpop.f32.mrf.mxu0 }
 0x2f1   : > { %v2539_v37 = vadd.f32 %v2502_v51, %v2353_v29 }
 0x2f3   : > { %v2575_v44 = vadd.f32 %v4446_v39, %v2539_v37 }
 0x2f4   : > { %v2132_v13 = vpop.f32.mrf.mxu2 }
 0x2f5   : > { %v3573_v43 = vpack.c.bf16 %v2575_v44, %v2574_v59  ;;  %v2319_v8 = vpop.f32.mrf.mxu3  ;;  %v2167_v42 = vadd.f32 %v2132_v13, %v1981_v33 }
 0x2f6   : > { %v1948_v52 = vpop.f32.mrf.mxu1 }
 0x2f7   : > { %3593 = vst [vmem:[%s3736_s24 + $0x70] sm:$0xff] %v3573_v43   ;;  %v2354_v32 = vadd.f32 %v2319_v8, %v2167_v42  ;;  %v1982_v3 = vadd.f32 %v1948_v52, %v4438_v62 }
 0x2f8   : > { %v2507_v1 = vpop.f32.mrf.mxu0 }
 0x2f9   : > { %v2540_v53 = vadd.f32 %v2505_v45, %v2354_v32 }
 0x2fb   : > { %v2576_v22 = vadd.f32 %v4446_v39, %v2540_v53 }
 0x2fc   : > { %v2134_v46 = vpop.f32.mrf.mxu2 }
 0x2fd   : > { %v2168_v35 = vadd.f32 %v2134_v46, %v1982_v3  ;;  %v2321_v11 = vpop.f32.mrf.mxu3 }
 0x2ff   : > { %v2355_v48 = vadd.f32 %v2321_v11, %v2168_v35 }
 0x301   : > { %v2541_v41 = vadd.f32 %v2507_v1, %v2355_v48 }
 0x303   : > { %v2577_v27 = vadd.f32 %v4446_v39, %v2541_v41 }
 0x305   : > { %v3578_v38 = vpack.c.bf16 %v2577_v27, %v2576_v22 }
 0x307   : > { %3594 = vst [vmem:[%s3736_s24 + $0x78] sm:$0xff] %v3578_v38  }
 0x308 PF: > { %s13_s14 = sadd.s32 1, %s3681_s14   ;;  %s4630_s12 = smov %s3677_s13 }
 0x309   : > { %p10_p5 = scmp.ge.s32.totalorder %s13_s14, 4   ;;  %s4631_s13 = smov %s4633_s15 }
 0x30b   :  { %12 = sbr.rel (!%p10_p5) target bundleno = 2 (0x2), region = 320 }
 0x310   :  { %2667 = vsyncmov [#allocation3] }
 0x313   :  { %s2668_s6 = vpop.sfrf %2667 }
 0x314   :  { %p3400_p6 = scmp.ne.s32.totalorder %s2668_s6, 0 }
 0x316   :  { %2672 = shalt.err (%p3400_p6)  }
 0x317   :  { %2674 = vsyncmov [#allocation3 + $0x1] }
 0x31a   :  { %s2675_s7 = vpop.sfrf %2674 }
 0x31b   :  { %p3401_p7 = scmp.ne.s32.totalorder %s2675_s7, 0 }
 0x31d   :  { %2679 = shalt.err (%p3401_p7)  }
 0x31e   :  { %2681 = vsyncmov [#allocation3 + $0x2] }
 0x321   :  { %s2682_s24 = vpop.sfrf %2681 }
 0x322   :  { %p3402_p8 = scmp.ne.s32.totalorder %s2682_s24, 0 }
 0x324   :  { %2686 = shalt.err (%p3402_p8)  }
 0x325   :  { %2688 = vsyncmov [#allocation3 + $0x3] }
 0x328   :  { %s2689_s8 = vpop.sfrf %2688 }
 0x329   :  { %p3403_p9 = scmp.ne.s32.totalorder %s2689_s8, 0 }
 0x32b   :  { %2693 = shalt.err (%p3403_p9)  }
 0x32c   :  { %2695 = vsyncmov [#allocation3 + $0x4] }
 0x32f   :  { %s2696_s15 = vpop.sfrf %2695 }
 0x330   :  { %p3404_p10 = scmp.ne.s32.totalorder %s2696_s15, 0 }
 0x332   :  { %2700 = shalt.err (%p3404_p10)  }
 0x333   :  { %2702 = vsyncmov [#allocation3 + $0x5] }
 0x336   :  { %s2703_s0 = vpop.sfrf %2702 }
 0x337   :  { %p3405_p11 = scmp.ne.s32.totalorder %s2703_s0, 0 }
 0x339   :  { %2707 = shalt.err (%p3405_p11)  }

</bundles_post_ra>
